<compile_context>
chip_gen: v6e
topology: v6e:2x2x1
jax: 0.10.0
libtpu: 0.0.40
codegen_flags: <defaults>
</compile_context>

<pallas_src>
import math

import numpy as np
import jax
import jax.numpy as jnp
from jax.experimental import pallas as pl
from jax.experimental.pallas import tpu as pltpu


# ----------------------------------------------------------------------------
# Fixed geometry (PyTorch module + chosen input size 2 x 1 x 16 x 16)
# ----------------------------------------------------------------------------
BATCH = 2
IMG = 16
L16 = BATCH * IMG * IMG              # 512: flat spatial length of the 16x16 stage
L8 = BATCH * (IMG // 2) ** 2         # 128: flat spatial length of the 8x8 stage
L4V = BATCH * (IMG // 4) ** 2        # 32 : valid flat length of the 4x4 stage
L4 = 128                             # 4x4 stage padded to a full lane multiple


# ----------------------------------------------------------------------------
# Constant 0/1 matrices (built once on host; shipped as bf16, async-copied in-kernel)
# ----------------------------------------------------------------------------
def _pool_select_matrix(n, h, w, out_len):
    """S[m, mo] = 1 where m is the top-left of the 2x2 window of pooled output mo."""
    ho, wo = h // 2, w // 2
    s = np.zeros((n * h * w, out_len), np.float32)
    for mo in range(n * ho * wo):
        nn = mo // (ho * wo)
        r = mo % (ho * wo)
        oh, ow = r // wo, r % wo
        m = nn * h * w + (2 * oh) * w + (2 * ow)
        s[m, mo] = 1.0
    return s


def _deconv_base_scatter(n, h, w, in_pad, out_len):
    """P0[m, mo] = 1 where mo = (nn, 2*ih, 2*iw) for valid input m = (nn, ih, iw).

    Only the tap-(0,0) "base" scatter is materialized; the other three 2x2 taps are
    produced in-kernel by rolling the scattered result by {1, OW, OW+1} lanes.
    Rows m >= n*h*w (the padded garbage lanes of the 4x4 stage) stay zero.
    """
    oh, ow = 2 * h, 2 * w
    p = np.zeros((in_pad, out_len), np.float32)
    for m in range(n * h * w):
        nn = m // (h * w)
        r = m % (h * w)
        ih, iw = r // w, r % w
        mo = nn * oh * ow + (2 * ih) * ow + (2 * iw)
        p[m, mo] = 1.0
    return p


_POOL1 = _pool_select_matrix(BATCH, 16, 16, L8)          # (512, 128)
_POOL2 = _pool_select_matrix(BATCH, 8, 8, L4)            # (128, 128), cols >= 32 zero
_SCAT1 = _deconv_base_scatter(BATCH, 4, 4, L4, L8)       # (128, 128), rows >= 32 zero
_SCAT2 = _deconv_base_scatter(BATCH, 8, 8, L8, L16)      # (128, 512)


# ----------------------------------------------------------------------------
# In-kernel helpers (traced inside the Pallas kernel)
# ----------------------------------------------------------------------------
def _edge_masks(hh, ww, length):
    """Nine fused (1, length) edge masks, one per 3x3 tap, computed once per stage."""
    assert hh & (hh - 1) == 0 and ww & (ww - 1) == 0, "bit-math needs power-of-two H/W"
    lane = jax.lax.broadcasted_iota(jnp.int32, (1, length), 1)
    wcol = jnp.bitwise_and(lane, ww - 1)
    hrow = jnp.bitwise_and(jnp.right_shift(lane, int(math.log2(ww))), hh - 1)
    h_ok = {-1: hrow >= 1, 0: None, 1: hrow <= hh - 2}
    w_ok = {-1: wcol >= 1, 0: None, 1: wcol <= ww - 2}
    masks = {}
    for dy in (-1, 0, 1):
        for dx in (-1, 0, 1):
            ho, wo = h_ok[dy], w_ok[dx]
            if ho is None and wo is None:
                masks[(dy, dx)] = None
            elif ho is None:
                masks[(dy, dx)] = wo.astype(jnp.float32)
            elif wo is None:
                masks[(dy, dx)] = ho.astype(jnp.float32)
            else:
                masks[(dy, dx)] = jnp.logical_and(ho, wo).astype(jnp.float32)
    return masks


def _shifted_tap(x, dy, dx, ww, length, masks):
    """tap[m] = x[m + dy*W + dx] where the neighbour is inside the image, else 0."""
    delta = dy * ww + dx
    t = x if delta == 0 else pltpu.roll(x, shift=(-delta) % length, axis=1)
    m = masks[(dy, dx)]
    return t if m is None else t * m


def _conv3x3_vpu(x, w_ref, b_ref, masks, ww, length, relu):
    """Cin == 1 conv: 9 VPU broadcast-MACs, no MXU."""
    cout = b_ref.shape[0]
    acc = jnp.zeros((cout, length), jnp.float32)
    for ky in range(3):
        for kx in range(3):
            t = _shifted_tap(x, ky - 1, kx - 1, ww, length, masks)
            acc = acc + w_ref[ky * 3 + kx] * t
    acc = acc + b_ref[...]
    return jnp.maximum(acc, 0.0) if relu else acc


def _conv3x3_mxu(x, w_ref, b_ref, masks, ww, length, relu):
    """Cin > 1 conv: 9 rolled taps concatenated in vregs (no VMEM scratch), 1 matmul."""
    taps = [_shifted_tap(x, ky - 1, kx - 1, ww, length, masks)
            for ky in range(3) for kx in range(3)]
    patch = jnp.concatenate(taps, axis=0)                           # (9*Cin, L)
    acc = jnp.dot(w_ref[...], patch, preferred_element_type=jnp.float32)
    acc = acc + b_ref[...]
    return jnp.maximum(acc, 0.0) if relu else acc


def _maxpool2x2(x, ww, length, sel_ref):
    """Max with +1/+W/+W+1 neighbours, stride-2 subsample via 0/1 selection matmul."""
    xm = jnp.maximum(
        jnp.maximum(x, pltpu.roll(x, shift=(-1) % length, axis=1)),
        jnp.maximum(pltpu.roll(x, shift=(-ww) % length, axis=1),
                    pltpu.roll(x, shift=(-(ww + 1)) % length, axis=1)))
    # bf16 x bf16 MXU matmul; the RHS is exact 0/1 so the result is the selected value.
    return jnp.dot(xm.astype(jnp.bfloat16), sel_ref[...],
                   preferred_element_type=jnp.float32)


def _deconv2x2(x, w_ref, b_ref, p0_ref, out_w, out_len):
    """2x2/stride-2 conv-transpose in exactly 2 MXU matmuls + 3 lane rolls.

    tapall = W_stack (4*Cout, Cin) @ x (Cin, L)
    scattered = tapall @ P0 (L, out_len)   -- base (even/even) positions only
    out = sum_k roll(scattered[k*Cout:(k+1)*Cout], {0, 1, OW, OW+1})
    """
    cout = b_ref.shape[0]
    tapall = jnp.dot(w_ref[...], x, preferred_element_type=jnp.float32)   # (4*Cout, L)
    scattered = jnp.dot(tapall.astype(jnp.bfloat16), p0_ref[...],
                        preferred_element_type=jnp.float32)               # (4*Cout, out)
    acc = scattered[0:cout, :]
    for k, off in ((1, 1), (2, out_w), (3, out_w + 1)):
        acc = acc + pltpu.roll(scattered[k * cout:(k + 1) * cout, :], shift=off, axis=1)
    return acc + b_ref[...]


# ----------------------------------------------------------------------------
# The fused Pallas kernel
# ----------------------------------------------------------------------------
def _autoencoder_kernel(
    x_ref,
    w1_ref, b1_ref,        # conv1: (9, 8, 1), (8, 1)
    w2_ref, b2_ref,        # conv2: (16, 72), (16, 1)
    w3_ref, b3_ref,        # conv3: (16, 144), (16, 1)
    d1w_ref, d1b_ref,      # deconv1: (32, 16), (8, 1)
    w4_ref, b4_ref,        # conv4: (8, 72), (8, 1)
    d2w_ref, d2b_ref,      # deconv2: (4, 8), (1, 1)
    w5_ref, b5_ref,        # conv5: (9, 1, 1), (1, 1)
    p1_hbm, p2_hbm, s1_hbm, s2_hbm,    # bf16 0/1 constants, memory_space=pl.ANY (HBM)
    o_ref,
    p1_vmem, p2_vmem, s1_vmem, s2_vmem,  # bf16 VMEM landing buffers
    dma_sem,                              # DMA semaphores (4,)
):
    # Kick off every constant-matrix DMA up front; each wait sits right before use so
    # the transfers hide behind the preceding conv compute.
    cp_p1 = pltpu.make_async_copy(p1_hbm, p1_vmem, dma_sem.at[0]); cp_p1.start()
    cp_p2 = pltpu.make_async_copy(p2_hbm, p2_vmem, dma_sem.at[1]); cp_p2.start()
    cp_s1 = pltpu.make_async_copy(s1_hbm, s1_vmem, dma_sem.at[2]); cp_s1.start()
    cp_s2 = pltpu.make_async_copy(s2_hbm, s2_vmem, dma_sem.at[3]); cp_s2.start()

    # Edge masks built once per geometry and shared across layers.
    masks16 = _edge_masks(16, 16, L16)    # conv1, conv5
    masks8 = _edge_masks(8, 8, L8)        # conv2, conv4
    masks4 = _edge_masks(4, 4, L4)        # conv3 (padded lanes discarded by SCAT1)

    x = x_ref[...]                                                            # (1, 512)
    a = _conv3x3_vpu(x, w1_ref, b1_ref, masks16, 16, L16, relu=True)          # (8, 512)
    cp_p1.wait()
    a = _maxpool2x2(a, 16, L16, p1_vmem)                                      # (8, 128)
    a = _conv3x3_mxu(a, w2_ref, b2_ref, masks8, 8, L8, relu=True)             # (16, 128)
    cp_p2.wait()
    a = _maxpool2x2(a, 8, L8, p2_vmem)                                        # (16, 128) pad
    a = _conv3x3_mxu(a, w3_ref, b3_ref, masks4, 4, L4, relu=True)             # (16, 128) pad
    cp_s1.wait()
    a = _deconv2x2(a, d1w_ref, d1b_ref, s1_vmem, out_w=8, out_len=L8)         # (8, 128)
    a = _conv3x3_mxu(a, w4_ref, b4_ref, masks8, 8, L8, relu=True)             # (8, 128)
    cp_s2.wait()
    a = _deconv2x2(a, d2w_ref, d2b_ref, s2_vmem, out_w=16, out_len=L16)       # (1, 512)
    a = _conv3x3_vpu(a, w5_ref, b5_ref, masks16, 16, L16, relu=False)         # (1, 512)
    o_ref[...] = a.astype(o_ref.dtype)


# ----------------------------------------------------------------------------
# Wrapper: layout plumbing + one pallas_call for the whole network
# ----------------------------------------------------------------------------
@jax.jit
def autoencoder_forward(params, x_nchw):
    n, c, h, w = x_nchw.shape
    assert (n, c, h, w) == (BATCH, 1, IMG, IMG), x_nchw.shape
    # NCHW -> (C, N*H*W): channels on sublanes, flat spatial on lanes.
    x_flat = jnp.transpose(x_nchw, (1, 0, 2, 3)).reshape(1, n * h * w)

    def conv_w_im2col(wt):                 # (Cout, Cin, 3, 3) -> (Cout, 9*Cin)
        co, ci = wt.shape[0], wt.shape[1]
        return jnp.transpose(wt, (0, 2, 3, 1)).reshape(co, 9 * ci)

    def conv_w_taps(wt):                   # Cin==1: (Cout, 1, 3, 3) -> (9, Cout, 1)
        co = wt.shape[0]
        return jnp.transpose(wt, (2, 3, 0, 1)).reshape(9, co, 1)

    def deconv_w_stack(wt):                # (Cin, Cout, 2, 2) -> (4*Cout, Cin), tap-major
        ci, co = wt.shape[0], wt.shape[1]
        return jnp.transpose(wt, (2, 3, 1, 0)).reshape(4 * co, ci)

    def col(b):
        return b.reshape(-1, 1)

    vmem = pl.BlockSpec(memory_space=pltpu.MemorySpace.VMEM)
    hbm = pl.BlockSpec(memory_space=pl.ANY)

    out = pl.pallas_call(
        _autoencoder_kernel,
        out_shape=jax.ShapeDtypeStruct((1, n * h * w), jnp.float32),
        in_specs=[vmem] * 15 + [hbm] * 4,
        out_specs=vmem,
        scratch_shapes=[
            pltpu.VMEM((L16, L8), jnp.bfloat16),   # pool1 select landing buffer
            pltpu.VMEM((L8, L4), jnp.bfloat16),    # pool2 select landing buffer
            pltpu.VMEM((L4, L8), jnp.bfloat16),    # deconv1 base scatter landing buffer
            pltpu.VMEM((L8, L16), jnp.bfloat16),   # deconv2 base scatter landing buffer
            pltpu.SemaphoreType.DMA((4,)),
        ],
    )(
        x_flat,
        conv_w_taps(params['conv1_w']), col(params['conv1_b']),
        conv_w_im2col(params['conv2_w']), col(params['conv2_b']),
        conv_w_im2col(params['conv3_w']), col(params['conv3_b']),
        deconv_w_stack(params['deconv1_w']), col(params['deconv1_b']),
        conv_w_im2col(params['conv4_w']), col(params['conv4_b']),
        deconv_w_stack(params['deconv2_w']), col(params['deconv2_b']),
        conv_w_taps(params['conv5_w']), col(params['conv5_b']),
        jnp.asarray(_POOL1, dtype=jnp.bfloat16),
        jnp.asarray(_POOL2, dtype=jnp.bfloat16),
        jnp.asarray(_SCAT1, dtype=jnp.bfloat16),
        jnp.asarray(_SCAT2, dtype=jnp.bfloat16),
    )
    # (1, N*H*W) -> NCHW
    return jnp.transpose(out.reshape(1, n, h, w), (1, 0, 2, 3))


# ----------------------------------------------------------------------------
# Deterministic parameter init (PyTorch shapes; synthetic values)
# ----------------------------------------------------------------------------
def init_params(key):
    def uni(k, shape, fan_in):
        bound = 1.0 / jnp.sqrt(jnp.float32(fan_in))
        return jax.random.uniform(k, shape, jnp.float32, -bound, bound)

    keys = jax.random.split(key, 16)
    p = {}
    p['conv1_w'] = uni(keys[0], (8, 1, 3, 3), 1 * 9)
    p['conv1_b'] = uni(keys[1], (8,), 1 * 9)
    p['conv2_w'] = uni(keys[2], (16, 8, 3, 3), 8 * 9)
    p['conv2_b'] = uni(keys[3], (16,), 8 * 9)
    p['conv3_w'] = uni(keys[4], (16, 16, 3, 3), 16 * 9)
    p['conv3_b'] = uni(keys[5], (16,), 16 * 9)
    p['deconv1_w'] = uni(keys[6], (16, 8, 2, 2), 16 * 4)
    p['deconv1_b'] = uni(keys[7], (8,), 16 * 4)
    p['conv4_w'] = uni(keys[8], (8, 8, 3, 3), 8 * 9)
    p['conv4_b'] = uni(keys[9], (8,), 8 * 9)
    p['deconv2_w'] = uni(keys[10], (8, 1, 2, 2), 8 * 4)
    p['deconv2_b'] = uni(keys[11], (1,), 8 * 4)
    p['conv5_w'] = uni(keys[12], (1, 1, 3, 3), 1 * 9)
    p['conv5_b'] = uni(keys[13], (1,), 1 * 9)
    return p


# ----------------------------------------------------------------------------
# Pure-JAX reference (mirrors PyTorch semantics) for a sanity check
# ----------------------------------------------------------------------------
def reference_forward(params, x_nchw):
    def conv(x, w, b):
        y = jax.lax.conv_general_dilated(
            x, w, window_strides=(1, 1), padding=((1, 1), (1, 1)),
            dimension_numbers=('NCHW', 'OIHW', 'NCHW'))
        return y + b[None, :, None, None]

    def pool(x):
        return jax.lax.reduce_window(x, -jnp.inf, jax.lax.max,
                                     (1, 1, 2, 2), (1, 1, 2, 2), 'VALID')

    def deconv(x, w, b):
        n, ci, h, wd = x.shape
        co = w.shape[1]
        y = jnp.einsum('nihw,iokl->nohwkl', x, w)
        y = y.transpose(0, 1, 2, 4, 3, 5).reshape(n, co, 2 * h, 2 * wd)
        return y + b[None, :, None, None]

    x = jax.nn.relu(conv(x_nchw, params['conv1_w'], params['conv1_b']))
    x = pool(x)
    x = jax.nn.relu(conv(x, params['conv2_w'], params['conv2_b']))
    x = pool(x)
    x = jax.nn.relu(conv(x, params['conv3_w'], params['conv3_b']))
    x = deconv(x, params['deconv1_w'], params['deconv1_b'])
    x = jax.nn.relu(conv(x, params['conv4_w'], params['conv4_b']))
    x = deconv(x, params['deconv2_w'], params['deconv2_b'])
    x = conv(x, params['conv5_w'], params['conv5_b'])
    return x


if __name__ == "__main__":
    key = jax.random.PRNGKey(0)
    k_x, k_p = jax.random.split(key)
    params = init_params(k_p)
    x = jax.random.normal(k_x, (BATCH, 1, IMG, IMG), jnp.float32)   # NCHW like PyTorch

    y = jax.block_until_ready(autoencoder_forward(params, x))
    assert y.shape == (BATCH, 1, IMG, IMG), y.shape

    y_ref = jax.block_until_ready(reference_forward(params, x))
    max_err = float(jnp.max(jnp.abs(y - y_ref)))
    assert max_err < 1e-2, f"mismatch vs reference: {max_err}"

    print("KERNEL_OK")
</pallas_src>

<mosaic_0001>
module attributes {stable_mosaic.version = 11 : i64} {
  func.func @_autoencoder_kernel(%arg0: memref<1x512xf32, #tpu.memory_space<vmem>>, %arg1: memref<9x8x1xf32, #tpu.memory_space<vmem>>, %arg2: memref<8x1xf32, #tpu.memory_space<vmem>>, %arg3: memref<16x72xf32, #tpu.memory_space<vmem>>, %arg4: memref<16x1xf32, #tpu.memory_space<vmem>>, %arg5: memref<16x144xf32, #tpu.memory_space<vmem>>, %arg6: memref<16x1xf32, #tpu.memory_space<vmem>>, %arg7: memref<32x16xf32, #tpu.memory_space<vmem>>, %arg8: memref<8x1xf32, #tpu.memory_space<vmem>>, %arg9: memref<8x72xf32, #tpu.memory_space<vmem>>, %arg10: memref<8x1xf32, #tpu.memory_space<vmem>>, %arg11: memref<4x8xf32, #tpu.memory_space<vmem>>, %arg12: memref<1x1xf32, #tpu.memory_space<vmem>>, %arg13: memref<9x1x1xf32, #tpu.memory_space<vmem>>, %arg14: memref<1x1xf32, #tpu.memory_space<vmem>>, %arg15: memref<512x128xbf16, #tpu.memory_space<any>>, %arg16: memref<128x128xbf16, #tpu.memory_space<any>>, %arg17: memref<128x128xbf16, #tpu.memory_space<any>>, %arg18: memref<128x512xbf16, #tpu.memory_space<any>>, %arg19: memref<1x512xf32, #tpu.memory_space<vmem>>, %arg20: memref<512x128xbf16, #tpu.memory_space<vmem>>, %arg21: memref<128x128xbf16, #tpu.memory_space<vmem>>, %arg22: memref<128x128xbf16, #tpu.memory_space<vmem>>, %arg23: memref<128x512xbf16, #tpu.memory_space<vmem>>, %arg24: memref<4x!tpu.dma_semaphore, #tpu.memory_space<semaphore_mem>>) attributes {dimension_semantics = [], scalar_prefetch = 0 : i64, scratch_operands = 5 : i64, tpu.core_type = #tpu.core_type<tc>} {
    %c0_i32 = arith.constant 0 : i32
    %0 = tpu.memref_slice %arg24[%c0_i32] : memref<4x!tpu.dma_semaphore, #tpu.memory_space<semaphore_mem>> -> memref<1x!tpu.dma_semaphore, #tpu.memory_space<semaphore_mem>>
    %1 = tpu.memref_squeeze %0 : memref<1x!tpu.dma_semaphore, #tpu.memory_space<semaphore_mem>> -> memref<!tpu.dma_semaphore, #tpu.memory_space<semaphore_mem>>
    tpu.enqueue_dma source(%arg15 : memref<512x128xbf16, #tpu.memory_space<any>>) target(%arg20 : memref<512x128xbf16, #tpu.memory_space<vmem>>) target_semaphore(%1 : memref<!tpu.dma_semaphore, #tpu.memory_space<semaphore_mem>>)
    %c1_i32 = arith.constant 1 : i32
    %2 = tpu.memref_slice %arg24[%c1_i32] : memref<4x!tpu.dma_semaphore, #tpu.memory_space<semaphore_mem>> -> memref<1x!tpu.dma_semaphore, #tpu.memory_space<semaphore_mem>>
    %3 = tpu.memref_squeeze %2 : memref<1x!tpu.dma_semaphore, #tpu.memory_space<semaphore_mem>> -> memref<!tpu.dma_semaphore, #tpu.memory_space<semaphore_mem>>
    tpu.enqueue_dma source(%arg16 : memref<128x128xbf16, #tpu.memory_space<any>>) target(%arg21 : memref<128x128xbf16, #tpu.memory_space<vmem>>) target_semaphore(%3 : memref<!tpu.dma_semaphore, #tpu.memory_space<semaphore_mem>>)
    %c2_i32 = arith.constant 2 : i32
    %4 = tpu.memref_slice %arg24[%c2_i32] : memref<4x!tpu.dma_semaphore, #tpu.memory_space<semaphore_mem>> -> memref<1x!tpu.dma_semaphore, #tpu.memory_space<semaphore_mem>>
    %5 = tpu.memref_squeeze %4 : memref<1x!tpu.dma_semaphore, #tpu.memory_space<semaphore_mem>> -> memref<!tpu.dma_semaphore, #tpu.memory_space<semaphore_mem>>
    tpu.enqueue_dma source(%arg17 : memref<128x128xbf16, #tpu.memory_space<any>>) target(%arg22 : memref<128x128xbf16, #tpu.memory_space<vmem>>) target_semaphore(%5 : memref<!tpu.dma_semaphore, #tpu.memory_space<semaphore_mem>>)
    %c3_i32 = arith.constant 3 : i32
    %6 = tpu.memref_slice %arg24[%c3_i32] : memref<4x!tpu.dma_semaphore, #tpu.memory_space<semaphore_mem>> -> memref<1x!tpu.dma_semaphore, #tpu.memory_space<semaphore_mem>>
    %7 = tpu.memref_squeeze %6 : memref<1x!tpu.dma_semaphore, #tpu.memory_space<semaphore_mem>> -> memref<!tpu.dma_semaphore, #tpu.memory_space<semaphore_mem>>
    tpu.enqueue_dma source(%arg18 : memref<128x512xbf16, #tpu.memory_space<any>>) target(%arg23 : memref<128x512xbf16, #tpu.memory_space<vmem>>) target_semaphore(%7 : memref<!tpu.dma_semaphore, #tpu.memory_space<semaphore_mem>>)
    %8 = tpu.iota {dimensions = array<i32: 1>} : vector<1x512xi32>
    %c15_i32 = arith.constant 15 : i32
    %9 = vector.broadcast %c15_i32 : i32 to vector<1x512xi32>
    %10 = arith.andi %8, %9 : vector<1x512xi32>
    %c4_i32 = arith.constant 4 : i32
    %11 = vector.broadcast %c4_i32 : i32 to vector<1x512xi32>
    %12 = arith.shrsi %8, %11 : vector<1x512xi32>
    %c15_i32_0 = arith.constant 15 : i32
    %13 = vector.broadcast %c15_i32_0 : i32 to vector<1x512xi32>
    %14 = arith.andi %12, %13 : vector<1x512xi32>
    %c1_i32_1 = arith.constant 1 : i32
    %15 = vector.broadcast %c1_i32_1 : i32 to vector<1x512xi32>
    %16 = arith.cmpi sge, %14, %15 : vector<1x512xi32>
    %c14_i32 = arith.constant 14 : i32
    %17 = vector.broadcast %c14_i32 : i32 to vector<1x512xi32>
    %18 = arith.cmpi sle, %14, %17 : vector<1x512xi32>
    %c1_i32_2 = arith.constant 1 : i32
    %19 = vector.broadcast %c1_i32_2 : i32 to vector<1x512xi32>
    %20 = arith.cmpi sge, %10, %19 : vector<1x512xi32>
    %c14_i32_3 = arith.constant 14 : i32
    %21 = vector.broadcast %c14_i32_3 : i32 to vector<1x512xi32>
    %22 = arith.cmpi sle, %10, %21 : vector<1x512xi32>
    %23 = arith.andi %16, %20 : vector<1x512xi1>
    %24 = arith.extui %23 : vector<1x512xi1> to vector<1x512xi32>
    %25 = arith.sitofp %24 : vector<1x512xi32> to vector<1x512xf32>
    %26 = arith.extui %16 : vector<1x512xi1> to vector<1x512xi32>
    %27 = arith.sitofp %26 : vector<1x512xi32> to vector<1x512xf32>
    %28 = arith.andi %16, %22 : vector<1x512xi1>
    %29 = arith.extui %28 : vector<1x512xi1> to vector<1x512xi32>
    %30 = arith.sitofp %29 : vector<1x512xi32> to vector<1x512xf32>
    %31 = arith.extui %20 : vector<1x512xi1> to vector<1x512xi32>
    %32 = arith.sitofp %31 : vector<1x512xi32> to vector<1x512xf32>
    %33 = arith.extui %22 : vector<1x512xi1> to vector<1x512xi32>
    %34 = arith.sitofp %33 : vector<1x512xi32> to vector<1x512xf32>
    %35 = arith.andi %18, %20 : vector<1x512xi1>
    %36 = arith.extui %35 : vector<1x512xi1> to vector<1x512xi32>
    %37 = arith.sitofp %36 : vector<1x512xi32> to vector<1x512xf32>
    %38 = arith.extui %18 : vector<1x512xi1> to vector<1x512xi32>
    %39 = arith.sitofp %38 : vector<1x512xi32> to vector<1x512xf32>
    %40 = arith.andi %18, %22 : vector<1x512xi1>
    %41 = arith.extui %40 : vector<1x512xi1> to vector<1x512xi32>
    %42 = arith.sitofp %41 : vector<1x512xi32> to vector<1x512xf32>
    %43 = tpu.iota {dimensions = array<i32: 1>} : vector<1x128xi32>
    %c7_i32 = arith.constant 7 : i32
    %44 = vector.broadcast %c7_i32 : i32 to vector<1x128xi32>
    %45 = arith.andi %43, %44 : vector<1x128xi32>
    %c3_i32_4 = arith.constant 3 : i32
    %46 = vector.broadcast %c3_i32_4 : i32 to vector<1x128xi32>
    %47 = arith.shrsi %43, %46 : vector<1x128xi32>
    %c7_i32_5 = arith.constant 7 : i32
    %48 = vector.broadcast %c7_i32_5 : i32 to vector<1x128xi32>
    %49 = arith.andi %47, %48 : vector<1x128xi32>
    %c1_i32_6 = arith.constant 1 : i32
    %50 = vector.broadcast %c1_i32_6 : i32 to vector<1x128xi32>
    %51 = arith.cmpi sge, %49, %50 : vector<1x128xi32>
    %c6_i32 = arith.constant 6 : i32
    %52 = vector.broadcast %c6_i32 : i32 to vector<1x128xi32>
    %53 = arith.cmpi sle, %49, %52 : vector<1x128xi32>
    %c1_i32_7 = arith.constant 1 : i32
    %54 = vector.broadcast %c1_i32_7 : i32 to vector<1x128xi32>
    %55 = arith.cmpi sge, %45, %54 : vector<1x128xi32>
    %c6_i32_8 = arith.constant 6 : i32
    %56 = vector.broadcast %c6_i32_8 : i32 to vector<1x128xi32>
    %57 = arith.cmpi sle, %45, %56 : vector<1x128xi32>
    %58 = arith.andi %51, %55 : vector<1x128xi1>
    %59 = arith.extui %58 : vector<1x128xi1> to vector<1x128xi32>
    %60 = arith.sitofp %59 : vector<1x128xi32> to vector<1x128xf32>
    %61 = arith.extui %51 : vector<1x128xi1> to vector<1x128xi32>
    %62 = arith.sitofp %61 : vector<1x128xi32> to vector<1x128xf32>
    %63 = arith.andi %51, %57 : vector<1x128xi1>
    %64 = arith.extui %63 : vector<1x128xi1> to vector<1x128xi32>
    %65 = arith.sitofp %64 : vector<1x128xi32> to vector<1x128xf32>
    %66 = arith.extui %55 : vector<1x128xi1> to vector<1x128xi32>
    %67 = arith.sitofp %66 : vector<1x128xi32> to vector<1x128xf32>
    %68 = arith.extui %57 : vector<1x128xi1> to vector<1x128xi32>
    %69 = arith.sitofp %68 : vector<1x128xi32> to vector<1x128xf32>
    %70 = arith.andi %53, %55 : vector<1x128xi1>
    %71 = arith.extui %70 : vector<1x128xi1> to vector<1x128xi32>
    %72 = arith.sitofp %71 : vector<1x128xi32> to vector<1x128xf32>
    %73 = arith.extui %53 : vector<1x128xi1> to vector<1x128xi32>
    %74 = arith.sitofp %73 : vector<1x128xi32> to vector<1x128xf32>
    %75 = arith.andi %53, %57 : vector<1x128xi1>
    %76 = arith.extui %75 : vector<1x128xi1> to vector<1x128xi32>
    %77 = arith.sitofp %76 : vector<1x128xi32> to vector<1x128xf32>
    %78 = tpu.iota {dimensions = array<i32: 1>} : vector<1x128xi32>
    %c3_i32_9 = arith.constant 3 : i32
    %79 = vector.broadcast %c3_i32_9 : i32 to vector<1x128xi32>
    %80 = arith.andi %78, %79 : vector<1x128xi32>
    %c2_i32_10 = arith.constant 2 : i32
    %81 = vector.broadcast %c2_i32_10 : i32 to vector<1x128xi32>
    %82 = arith.shrsi %78, %81 : vector<1x128xi32>
    %c3_i32_11 = arith.constant 3 : i32
    %83 = vector.broadcast %c3_i32_11 : i32 to vector<1x128xi32>
    %84 = arith.andi %82, %83 : vector<1x128xi32>
    %c1_i32_12 = arith.constant 1 : i32
    %85 = vector.broadcast %c1_i32_12 : i32 to vector<1x128xi32>
    %86 = arith.cmpi sge, %84, %85 : vector<1x128xi32>
    %c2_i32_13 = arith.constant 2 : i32
    %87 = vector.broadcast %c2_i32_13 : i32 to vector<1x128xi32>
    %88 = arith.cmpi sle, %84, %87 : vector<1x128xi32>
    %c1_i32_14 = arith.constant 1 : i32
    %89 = vector.broadcast %c1_i32_14 : i32 to vector<1x128xi32>
    %90 = arith.cmpi sge, %80, %89 : vector<1x128xi32>
    %c2_i32_15 = arith.constant 2 : i32
    %91 = vector.broadcast %c2_i32_15 : i32 to vector<1x128xi32>
    %92 = arith.cmpi sle, %80, %91 : vector<1x128xi32>
    %93 = arith.andi %86, %90 : vector<1x128xi1>
    %94 = arith.extui %93 : vector<1x128xi1> to vector<1x128xi32>
    %95 = arith.sitofp %94 : vector<1x128xi32> to vector<1x128xf32>
    %96 = arith.extui %86 : vector<1x128xi1> to vector<1x128xi32>
    %97 = arith.sitofp %96 : vector<1x128xi32> to vector<1x128xf32>
    %98 = arith.andi %86, %92 : vector<1x128xi1>
    %99 = arith.extui %98 : vector<1x128xi1> to vector<1x128xi32>
    %100 = arith.sitofp %99 : vector<1x128xi32> to vector<1x128xf32>
    %101 = arith.extui %90 : vector<1x128xi1> to vector<1x128xi32>
    %102 = arith.sitofp %101 : vector<1x128xi32> to vector<1x128xf32>
    %103 = arith.extui %92 : vector<1x128xi1> to vector<1x128xi32>
    %104 = arith.sitofp %103 : vector<1x128xi32> to vector<1x128xf32>
    %105 = arith.andi %88, %90 : vector<1x128xi1>
    %106 = arith.extui %105 : vector<1x128xi1> to vector<1x128xi32>
    %107 = arith.sitofp %106 : vector<1x128xi32> to vector<1x128xf32>
    %108 = arith.extui %88 : vector<1x128xi1> to vector<1x128xi32>
    %109 = arith.sitofp %108 : vector<1x128xi32> to vector<1x128xf32>
    %110 = arith.andi %88, %92 : vector<1x128xi1>
    %111 = arith.extui %110 : vector<1x128xi1> to vector<1x128xi32>
    %112 = arith.sitofp %111 : vector<1x128xi32> to vector<1x128xf32>
    %c0 = arith.constant 0 : index
    %c0_16 = arith.constant 0 : index
    %113 = vector.load %arg0[%c0, %c0_16] : memref<1x512xf32, #tpu.memory_space<vmem>>, vector<1x512xf32>
    %cst = arith.constant 0.000000e+00 : f32
    %114 = vector.broadcast %cst : f32 to vector<8x512xf32>
    %c17_i32 = arith.constant 17 : i32
    %115 = tpu.dynamic_rotate %113 by %c17_i32 dim 1 : vector<1x512xf32>, i32 -> vector<1x512xf32>
    %116 = arith.mulf %115, %25 : vector<1x512xf32>
    %c0_17 = arith.constant 0 : index
    %c0_18 = arith.constant 0 : index
    %c0_19 = arith.constant 0 : index
    %117 = vector.load %arg1[%c0_17, %c0_18, %c0_19] : memref<9x8x1xf32, #tpu.memory_space<vmem>>, vector<1x8x1xf32>
    %118 = vector.shape_cast %117 : vector<1x8x1xf32> to vector<8x1xf32>
    %119 = vector.broadcast %118 : vector<8x1xf32> to vector<8x512xf32>
    %120 = vector.broadcast %116 : vector<1x512xf32> to vector<8x512xf32>
    %121 = arith.mulf %119, %120 : vector<8x512xf32>
    %122 = arith.addf %114, %121 : vector<8x512xf32>
    %c16_i32 = arith.constant 16 : i32
    %123 = tpu.dynamic_rotate %113 by %c16_i32 dim 1 : vector<1x512xf32>, i32 -> vector<1x512xf32>
    %124 = arith.mulf %123, %27 : vector<1x512xf32>
    %c1 = arith.constant 1 : index
    %c0_20 = arith.constant 0 : index
    %c0_21 = arith.constant 0 : index
    %125 = vector.load %arg1[%c1, %c0_20, %c0_21] : memref<9x8x1xf32, #tpu.memory_space<vmem>>, vector<1x8x1xf32>
    %126 = vector.shape_cast %125 : vector<1x8x1xf32> to vector<8x1xf32>
    %127 = vector.broadcast %126 : vector<8x1xf32> to vector<8x512xf32>
    %128 = vector.broadcast %124 : vector<1x512xf32> to vector<8x512xf32>
    %129 = arith.mulf %127, %128 : vector<8x512xf32>
    %130 = arith.addf %122, %129 : vector<8x512xf32>
    %c15_i32_22 = arith.constant 15 : i32
    %131 = tpu.dynamic_rotate %113 by %c15_i32_22 dim 1 : vector<1x512xf32>, i32 -> vector<1x512xf32>
    %132 = arith.mulf %131, %30 : vector<1x512xf32>
    %c2 = arith.constant 2 : index
    %c0_23 = arith.constant 0 : index
    %c0_24 = arith.constant 0 : index
    %133 = vector.load %arg1[%c2, %c0_23, %c0_24] : memref<9x8x1xf32, #tpu.memory_space<vmem>>, vector<1x8x1xf32>
    %134 = vector.shape_cast %133 : vector<1x8x1xf32> to vector<8x1xf32>
    %135 = vector.broadcast %134 : vector<8x1xf32> to vector<8x512xf32>
    %136 = vector.broadcast %132 : vector<1x512xf32> to vector<8x512xf32>
    %137 = arith.mulf %135, %136 : vector<8x512xf32>
    %138 = arith.addf %130, %137 : vector<8x512xf32>
    %c1_i32_25 = arith.constant 1 : i32
    %139 = tpu.dynamic_rotate %113 by %c1_i32_25 dim 1 : vector<1x512xf32>, i32 -> vector<1x512xf32>
    %140 = arith.mulf %139, %32 : vector<1x512xf32>
    %c3 = arith.constant 3 : index
    %c0_26 = arith.constant 0 : index
    %c0_27 = arith.constant 0 : index
    %141 = vector.load %arg1[%c3, %c0_26, %c0_27] : memref<9x8x1xf32, #tpu.memory_space<vmem>>, vector<1x8x1xf32>
    %142 = vector.shape_cast %141 : vector<1x8x1xf32> to vector<8x1xf32>
    %143 = vector.broadcast %142 : vector<8x1xf32> to vector<8x512xf32>
    %144 = vector.broadcast %140 : vector<1x512xf32> to vector<8x512xf32>
    %145 = arith.mulf %143, %144 : vector<8x512xf32>
    %146 = arith.addf %138, %145 : vector<8x512xf32>
    %c4 = arith.constant 4 : index
    %c0_28 = arith.constant 0 : index
    %c0_29 = arith.constant 0 : index
    %147 = vector.load %arg1[%c4, %c0_28, %c0_29] : memref<9x8x1xf32, #tpu.memory_space<vmem>>, vector<1x8x1xf32>
    %148 = vector.shape_cast %147 : vector<1x8x1xf32> to vector<8x1xf32>
    %149 = vector.broadcast %148 : vector<8x1xf32> to vector<8x512xf32>
    %150 = vector.broadcast %113 : vector<1x512xf32> to vector<8x512xf32>
    %151 = arith.mulf %149, %150 : vector<8x512xf32>
    %152 = arith.addf %146, %151 : vector<8x512xf32>
    %c511_i32 = arith.constant 511 : i32
    %153 = tpu.dynamic_rotate %113 by %c511_i32 dim 1 : vector<1x512xf32>, i32 -> vector<1x512xf32>
    %154 = arith.mulf %153, %34 : vector<1x512xf32>
    %c5 = arith.constant 5 : index
    %c0_30 = arith.constant 0 : index
    %c0_31 = arith.constant 0 : index
    %155 = vector.load %arg1[%c5, %c0_30, %c0_31] : memref<9x8x1xf32, #tpu.memory_space<vmem>>, vector<1x8x1xf32>
    %156 = vector.shape_cast %155 : vector<1x8x1xf32> to vector<8x1xf32>
    %157 = vector.broadcast %156 : vector<8x1xf32> to vector<8x512xf32>
    %158 = vector.broadcast %154 : vector<1x512xf32> to vector<8x512xf32>
    %159 = arith.mulf %157, %158 : vector<8x512xf32>
    %160 = arith.addf %152, %159 : vector<8x512xf32>
    %c497_i32 = arith.constant 497 : i32
    %161 = tpu.dynamic_rotate %113 by %c497_i32 dim 1 : vector<1x512xf32>, i32 -> vector<1x512xf32>
    %162 = arith.mulf %161, %37 : vector<1x512xf32>
    %c6 = arith.constant 6 : index
    %c0_32 = arith.constant 0 : index
    %c0_33 = arith.constant 0 : index
    %163 = vector.load %arg1[%c6, %c0_32, %c0_33] : memref<9x8x1xf32, #tpu.memory_space<vmem>>, vector<1x8x1xf32>
    %164 = vector.shape_cast %163 : vector<1x8x1xf32> to vector<8x1xf32>
    %165 = vector.broadcast %164 : vector<8x1xf32> to vector<8x512xf32>
    %166 = vector.broadcast %162 : vector<1x512xf32> to vector<8x512xf32>
    %167 = arith.mulf %165, %166 : vector<8x512xf32>
    %168 = arith.addf %160, %167 : vector<8x512xf32>
    %c496_i32 = arith.constant 496 : i32
    %169 = tpu.dynamic_rotate %113 by %c496_i32 dim 1 : vector<1x512xf32>, i32 -> vector<1x512xf32>
    %170 = arith.mulf %169, %39 : vector<1x512xf32>
    %c7 = arith.constant 7 : index
    %c0_34 = arith.constant 0 : index
    %c0_35 = arith.constant 0 : index
    %171 = vector.load %arg1[%c7, %c0_34, %c0_35] : memref<9x8x1xf32, #tpu.memory_space<vmem>>, vector<1x8x1xf32>
    %172 = vector.shape_cast %171 : vector<1x8x1xf32> to vector<8x1xf32>
    %173 = vector.broadcast %172 : vector<8x1xf32> to vector<8x512xf32>
    %174 = vector.broadcast %170 : vector<1x512xf32> to vector<8x512xf32>
    %175 = arith.mulf %173, %174 : vector<8x512xf32>
    %176 = arith.addf %168, %175 : vector<8x512xf32>
    %c495_i32 = arith.constant 495 : i32
    %177 = tpu.dynamic_rotate %113 by %c495_i32 dim 1 : vector<1x512xf32>, i32 -> vector<1x512xf32>
    %178 = arith.mulf %177, %42 : vector<1x512xf32>
    %c8 = arith.constant 8 : index
    %c0_36 = arith.constant 0 : index
    %c0_37 = arith.constant 0 : index
    %179 = vector.load %arg1[%c8, %c0_36, %c0_37] : memref<9x8x1xf32, #tpu.memory_space<vmem>>, vector<1x8x1xf32>
    %180 = vector.shape_cast %179 : vector<1x8x1xf32> to vector<8x1xf32>
    %181 = vector.broadcast %180 : vector<8x1xf32> to vector<8x512xf32>
    %182 = vector.broadcast %178 : vector<1x512xf32> to vector<8x512xf32>
    %183 = arith.mulf %181, %182 : vector<8x512xf32>
    %184 = arith.addf %176, %183 : vector<8x512xf32>
    %c0_38 = arith.constant 0 : index
    %c0_39 = arith.constant 0 : index
    %185 = vector.load %arg2[%c0_38, %c0_39] : memref<8x1xf32, #tpu.memory_space<vmem>>, vector<8x1xf32>
    %186 = vector.broadcast %185 : vector<8x1xf32> to vector<8x512xf32>
    %187 = arith.addf %184, %186 : vector<8x512xf32>
    %cst_40 = arith.constant 0.000000e+00 : f32
    %188 = vector.broadcast %cst_40 : f32 to vector<8x512xf32>
    %189 = arith.maximumf %187, %188 : vector<8x512xf32>
    %c0_i32_41 = arith.constant 0 : i32
    %190 = tpu.memref_slice %arg24[%c0_i32_41] : memref<4x!tpu.dma_semaphore, #tpu.memory_space<semaphore_mem>> -> memref<1x!tpu.dma_semaphore, #tpu.memory_space<semaphore_mem>>
    %191 = tpu.memref_squeeze %190 : memref<1x!tpu.dma_semaphore, #tpu.memory_space<semaphore_mem>> -> memref<!tpu.dma_semaphore, #tpu.memory_space<semaphore_mem>>
    tpu.wait_dma2 semaphore(%191 : memref<!tpu.dma_semaphore, #tpu.memory_space<semaphore_mem>>) src(%arg15 : memref<512x128xbf16, #tpu.memory_space<any>>) dst(%arg20 : memref<512x128xbf16, #tpu.memory_space<vmem>>)
    %c511_i32_42 = arith.constant 511 : i32
    %192 = tpu.dynamic_rotate %189 by %c511_i32_42 dim 1 : vector<8x512xf32>, i32 -> vector<8x512xf32>
    %193 = arith.maximumf %189, %192 : vector<8x512xf32>
    %c496_i32_43 = arith.constant 496 : i32
    %194 = tpu.dynamic_rotate %189 by %c496_i32_43 dim 1 : vector<8x512xf32>, i32 -> vector<8x512xf32>
    %c495_i32_44 = arith.constant 495 : i32
    %195 = tpu.dynamic_rotate %189 by %c495_i32_44 dim 1 : vector<8x512xf32>, i32 -> vector<8x512xf32>
    %196 = arith.maximumf %194, %195 : vector<8x512xf32>
    %197 = arith.maximumf %193, %196 : vector<8x512xf32>
    %198 = arith.truncf %197 : vector<8x512xf32> to vector<8x512xbf16>
    %c0_45 = arith.constant 0 : index
    %c0_46 = arith.constant 0 : index
    %199 = vector.load %arg20[%c0_45, %c0_46] : memref<512x128xbf16, #tpu.memory_space<vmem>>, vector<512x128xbf16>
    %cst_47 = arith.constant dense<0.000000e+00> : vector<8x128xf32>
    %200 = tpu.matmul %198, %199, %cst_47 {dimension_numbers = #tpu.dot_dimension_numbers<[1], [0], [0], [1], [0, 0, 1, 1], [], []>} : vector<8x512xbf16>, vector<512x128xbf16>, vector<8x128xf32> -> vector<8x128xf32>
    %c9_i32 = arith.constant 9 : i32
    %201 = tpu.dynamic_rotate %200 by %c9_i32 dim 1 : vector<8x128xf32>, i32 -> vector<8x128xf32>
    %202 = vector.broadcast %60 : vector<1x128xf32> to vector<8x128xf32>
    %203 = arith.mulf %201, %202 : vector<8x128xf32>
    %c8_i32 = arith.constant 8 : i32
    %204 = tpu.dynamic_rotate %200 by %c8_i32 dim 1 : vector<8x128xf32>, i32 -> vector<8x128xf32>
    %205 = vector.broadcast %62 : vector<1x128xf32> to vector<8x128xf32>
    %206 = arith.mulf %204, %205 : vector<8x128xf32>
    %c7_i32_48 = arith.constant 7 : i32
    %207 = tpu.dynamic_rotate %200 by %c7_i32_48 dim 1 : vector<8x128xf32>, i32 -> vector<8x128xf32>
    %208 = vector.broadcast %65 : vector<1x128xf32> to vector<8x128xf32>
    %209 = arith.mulf %207, %208 : vector<8x128xf32>
    %c1_i32_49 = arith.constant 1 : i32
    %210 = tpu.dynamic_rotate %200 by %c1_i32_49 dim 1 : vector<8x128xf32>, i32 -> vector<8x128xf32>
    %211 = vector.broadcast %67 : vector<1x128xf32> to vector<8x128xf32>
    %212 = arith.mulf %210, %211 : vector<8x128xf32>
    %c127_i32 = arith.constant 127 : i32
    %213 = tpu.dynamic_rotate %200 by %c127_i32 dim 1 : vector<8x128xf32>, i32 -> vector<8x128xf32>
    %214 = vector.broadcast %69 : vector<1x128xf32> to vector<8x128xf32>
    %215 = arith.mulf %213, %214 : vector<8x128xf32>
    %c121_i32 = arith.constant 121 : i32
    %216 = tpu.dynamic_rotate %200 by %c121_i32 dim 1 : vector<8x128xf32>, i32 -> vector<8x128xf32>
    %217 = vector.broadcast %72 : vector<1x128xf32> to vector<8x128xf32>
    %218 = arith.mulf %216, %217 : vector<8x128xf32>
    %c120_i32 = arith.constant 120 : i32
    %219 = tpu.dynamic_rotate %200 by %c120_i32 dim 1 : vector<8x128xf32>, i32 -> vector<8x128xf32>
    %220 = vector.broadcast %74 : vector<1x128xf32> to vector<8x128xf32>
    %221 = arith.mulf %219, %220 : vector<8x128xf32>
    %c119_i32 = arith.constant 119 : i32
    %222 = tpu.dynamic_rotate %200 by %c119_i32 dim 1 : vector<8x128xf32>, i32 -> vector<8x128xf32>
    %223 = vector.broadcast %77 : vector<1x128xf32> to vector<8x128xf32>
    %224 = arith.mulf %222, %223 : vector<8x128xf32>
    %225 = tpu.concatenate %203, %206, %209, %212, %200, %215, %218, %221, %224 in 0 : vector<8x128xf32>, vector<8x128xf32>, vector<8x128xf32>, vector<8x128xf32>, vector<8x128xf32>, vector<8x128xf32>, vector<8x128xf32>, vector<8x128xf32>, vector<8x128xf32> -> vector<72x128xf32>
    %c0_50 = arith.constant 0 : index
    %c0_51 = arith.constant 0 : index
    %226 = vector.load %arg3[%c0_50, %c0_51] : memref<16x72xf32, #tpu.memory_space<vmem>>, vector<16x72xf32>
    %cst_52 = arith.constant dense<0.000000e+00> : vector<16x128xf32>
    %227 = tpu.matmul %226, %225, %cst_52 {dimension_numbers = #tpu.dot_dimension_numbers<[1], [0], [0], [1], [0, 0, 1, 1], [], []>} : vector<16x72xf32>, vector<72x128xf32>, vector<16x128xf32> -> vector<16x128xf32>
    %c0_53 = arith.constant 0 : index
    %c0_54 = arith.constant 0 : index
    %228 = vector.load %arg4[%c0_53, %c0_54] : memref<16x1xf32, #tpu.memory_space<vmem>>, vector<16x1xf32>
    %229 = vector.broadcast %228 : vector<16x1xf32> to vector<16x128xf32>
    %230 = arith.addf %227, %229 : vector<16x128xf32>
    %cst_55 = arith.constant 0.000000e+00 : f32
    %231 = vector.broadcast %cst_55 : f32 to vector<16x128xf32>
    %232 = arith.maximumf %230, %231 : vector<16x128xf32>
    %c1_i32_56 = arith.constant 1 : i32
    %233 = tpu.memref_slice %arg24[%c1_i32_56] : memref<4x!tpu.dma_semaphore, #tpu.memory_space<semaphore_mem>> -> memref<1x!tpu.dma_semaphore, #tpu.memory_space<semaphore_mem>>
    %234 = tpu.memref_squeeze %233 : memref<1x!tpu.dma_semaphore, #tpu.memory_space<semaphore_mem>> -> memref<!tpu.dma_semaphore, #tpu.memory_space<semaphore_mem>>
    tpu.wait_dma2 semaphore(%234 : memref<!tpu.dma_semaphore, #tpu.memory_space<semaphore_mem>>) src(%arg16 : memref<128x128xbf16, #tpu.memory_space<any>>) dst(%arg21 : memref<128x128xbf16, #tpu.memory_space<vmem>>)
    %c127_i32_57 = arith.constant 127 : i32
    %235 = tpu.dynamic_rotate %232 by %c127_i32_57 dim 1 : vector<16x128xf32>, i32 -> vector<16x128xf32>
    %236 = arith.maximumf %232, %235 : vector<16x128xf32>
    %c120_i32_58 = arith.constant 120 : i32
    %237 = tpu.dynamic_rotate %232 by %c120_i32_58 dim 1 : vector<16x128xf32>, i32 -> vector<16x128xf32>
    %c119_i32_59 = arith.constant 119 : i32
    %238 = tpu.dynamic_rotate %232 by %c119_i32_59 dim 1 : vector<16x128xf32>, i32 -> vector<16x128xf32>
    %239 = arith.maximumf %237, %238 : vector<16x128xf32>
    %240 = arith.maximumf %236, %239 : vector<16x128xf32>
    %241 = arith.truncf %240 : vector<16x128xf32> to vector<16x128xbf16>
    %c0_60 = arith.constant 0 : index
    %c0_61 = arith.constant 0 : index
    %242 = vector.load %arg21[%c0_60, %c0_61] : memref<128x128xbf16, #tpu.memory_space<vmem>>, vector<128x128xbf16>
    %cst_62 = arith.constant dense<0.000000e+00> : vector<16x128xf32>
    %243 = tpu.matmul %241, %242, %cst_62 {dimension_numbers = #tpu.dot_dimension_numbers<[1], [0], [0], [1], [0, 0, 1, 1], [], []>} : vector<16x128xbf16>, vector<128x128xbf16>, vector<16x128xf32> -> vector<16x128xf32>
    %c5_i32 = arith.constant 5 : i32
    %244 = tpu.dynamic_rotate %243 by %c5_i32 dim 1 : vector<16x128xf32>, i32 -> vector<16x128xf32>
    %245 = vector.broadcast %95 : vector<1x128xf32> to vector<16x128xf32>
    %246 = arith.mulf %244, %245 : vector<16x128xf32>
    %c4_i32_63 = arith.constant 4 : i32
    %247 = tpu.dynamic_rotate %243 by %c4_i32_63 dim 1 : vector<16x128xf32>, i32 -> vector<16x128xf32>
    %248 = vector.broadcast %97 : vector<1x128xf32> to vector<16x128xf32>
    %249 = arith.mulf %247, %248 : vector<16x128xf32>
    %c3_i32_64 = arith.constant 3 : i32
    %250 = tpu.dynamic_rotate %243 by %c3_i32_64 dim 1 : vector<16x128xf32>, i32 -> vector<16x128xf32>
    %251 = vector.broadcast %100 : vector<1x128xf32> to vector<16x128xf32>
    %252 = arith.mulf %250, %251 : vector<16x128xf32>
    %c1_i32_65 = arith.constant 1 : i32
    %253 = tpu.dynamic_rotate %243 by %c1_i32_65 dim 1 : vector<16x128xf32>, i32 -> vector<16x128xf32>
    %254 = vector.broadcast %102 : vector<1x128xf32> to vector<16x128xf32>
    %255 = arith.mulf %253, %254 : vector<16x128xf32>
    %c127_i32_66 = arith.constant 127 : i32
    %256 = tpu.dynamic_rotate %243 by %c127_i32_66 dim 1 : vector<16x128xf32>, i32 -> vector<16x128xf32>
    %257 = vector.broadcast %104 : vector<1x128xf32> to vector<16x128xf32>
    %258 = arith.mulf %256, %257 : vector<16x128xf32>
    %c125_i32 = arith.constant 125 : i32
    %259 = tpu.dynamic_rotate %243 by %c125_i32 dim 1 : vector<16x128xf32>, i32 -> vector<16x128xf32>
    %260 = vector.broadcast %107 : vector<1x128xf32> to vector<16x128xf32>
    %261 = arith.mulf %259, %260 : vector<16x128xf32>
    %c124_i32 = arith.constant 124 : i32
    %262 = tpu.dynamic_rotate %243 by %c124_i32 dim 1 : vector<16x128xf32>, i32 -> vector<16x128xf32>
    %263 = vector.broadcast %109 : vector<1x128xf32> to vector<16x128xf32>
    %264 = arith.mulf %262, %263 : vector<16x128xf32>
    %c123_i32 = arith.constant 123 : i32
    %265 = tpu.dynamic_rotate %243 by %c123_i32 dim 1 : vector<16x128xf32>, i32 -> vector<16x128xf32>
    %266 = vector.broadcast %112 : vector<1x128xf32> to vector<16x128xf32>
    %267 = arith.mulf %265, %266 : vector<16x128xf32>
    %268 = tpu.concatenate %246, %249, %252, %255, %243, %258, %261, %264, %267 in 0 : vector<16x128xf32>, vector<16x128xf32>, vector<16x128xf32>, vector<16x128xf32>, vector<16x128xf32>, vector<16x128xf32>, vector<16x128xf32>, vector<16x128xf32>, vector<16x128xf32> -> vector<144x128xf32>
    %c0_67 = arith.constant 0 : index
    %c0_68 = arith.constant 0 : index
    %269 = vector.load %arg5[%c0_67, %c0_68] : memref<16x144xf32, #tpu.memory_space<vmem>>, vector<16x144xf32>
    %cst_69 = arith.constant dense<0.000000e+00> : vector<16x128xf32>
    %270 = tpu.matmul %269, %268, %cst_69 {dimension_numbers = #tpu.dot_dimension_numbers<[1], [0], [0], [1], [0, 0, 1, 1], [], []>} : vector<16x144xf32>, vector<144x128xf32>, vector<16x128xf32> -> vector<16x128xf32>
    %c0_70 = arith.constant 0 : index
    %c0_71 = arith.constant 0 : index
    %271 = vector.load %arg6[%c0_70, %c0_71] : memref<16x1xf32, #tpu.memory_space<vmem>>, vector<16x1xf32>
    %272 = vector.broadcast %271 : vector<16x1xf32> to vector<16x128xf32>
    %273 = arith.addf %270, %272 : vector<16x128xf32>
    %cst_72 = arith.constant 0.000000e+00 : f32
    %274 = vector.broadcast %cst_72 : f32 to vector<16x128xf32>
    %275 = arith.maximumf %273, %274 : vector<16x128xf32>
    %c2_i32_73 = arith.constant 2 : i32
    %276 = tpu.memref_slice %arg24[%c2_i32_73] : memref<4x!tpu.dma_semaphore, #tpu.memory_space<semaphore_mem>> -> memref<1x!tpu.dma_semaphore, #tpu.memory_space<semaphore_mem>>
    %277 = tpu.memref_squeeze %276 : memref<1x!tpu.dma_semaphore, #tpu.memory_space<semaphore_mem>> -> memref<!tpu.dma_semaphore, #tpu.memory_space<semaphore_mem>>
    tpu.wait_dma2 semaphore(%277 : memref<!tpu.dma_semaphore, #tpu.memory_space<semaphore_mem>>) src(%arg17 : memref<128x128xbf16, #tpu.memory_space<any>>) dst(%arg22 : memref<128x128xbf16, #tpu.memory_space<vmem>>)
    %c0_74 = arith.constant 0 : index
    %c0_75 = arith.constant 0 : index
    %278 = vector.load %arg7[%c0_74, %c0_75] : memref<32x16xf32, #tpu.memory_space<vmem>>, vector<32x16xf32>
    %cst_76 = arith.constant dense<0.000000e+00> : vector<32x128xf32>
    %279 = tpu.matmul %278, %275, %cst_76 {dimension_numbers = #tpu.dot_dimension_numbers<[1], [0], [0], [1], [0, 0, 1, 1], [], []>} : vector<32x16xf32>, vector<16x128xf32>, vector<32x128xf32> -> vector<32x128xf32>
    %280 = arith.truncf %279 : vector<32x128xf32> to vector<32x128xbf16>
    %c0_77 = arith.constant 0 : index
    %c0_78 = arith.constant 0 : index
    %281 = vector.load %arg22[%c0_77, %c0_78] : memref<128x128xbf16, #tpu.memory_space<vmem>>, vector<128x128xbf16>
    %cst_79 = arith.constant dense<0.000000e+00> : vector<32x128xf32>
    %282 = tpu.matmul %280, %281, %cst_79 {dimension_numbers = #tpu.dot_dimension_numbers<[1], [0], [0], [1], [0, 0, 1, 1], [], []>} : vector<32x128xbf16>, vector<128x128xbf16>, vector<32x128xf32> -> vector<32x128xf32>
    %283 = vector.extract_strided_slice %282 {offsets = [0, 0], sizes = [8, 128], strides = [1, 1]} : vector<32x128xf32> to vector<8x128xf32>
    %284 = vector.extract_strided_slice %282 {offsets = [8, 0], sizes = [8, 128], strides = [1, 1]} : vector<32x128xf32> to vector<8x128xf32>
    %c1_i32_80 = arith.constant 1 : i32
    %285 = tpu.dynamic_rotate %284 by %c1_i32_80 dim 1 : vector<8x128xf32>, i32 -> vector<8x128xf32>
    %286 = arith.addf %283, %285 : vector<8x128xf32>
    %287 = vector.extract_strided_slice %282 {offsets = [16, 0], sizes = [8, 128], strides = [1, 1]} : vector<32x128xf32> to vector<8x128xf32>
    %c8_i32_81 = arith.constant 8 : i32
    %288 = tpu.dynamic_rotate %287 by %c8_i32_81 dim 1 : vector<8x128xf32>, i32 -> vector<8x128xf32>
    %289 = arith.addf %286, %288 : vector<8x128xf32>
    %290 = vector.extract_strided_slice %282 {offsets = [24, 0], sizes = [8, 128], strides = [1, 1]} : vector<32x128xf32> to vector<8x128xf32>
    %c9_i32_82 = arith.constant 9 : i32
    %291 = tpu.dynamic_rotate %290 by %c9_i32_82 dim 1 : vector<8x128xf32>, i32 -> vector<8x128xf32>
    %292 = arith.addf %289, %291 : vector<8x128xf32>
    %c0_83 = arith.constant 0 : index
    %c0_84 = arith.constant 0 : index
    %293 = vector.load %arg8[%c0_83, %c0_84] : memref<8x1xf32, #tpu.memory_space<vmem>>, vector<8x1xf32>
    %294 = vector.broadcast %293 : vector<8x1xf32> to vector<8x128xf32>
    %295 = arith.addf %292, %294 : vector<8x128xf32>
    %c9_i32_85 = arith.constant 9 : i32
    %296 = tpu.dynamic_rotate %295 by %c9_i32_85 dim 1 : vector<8x128xf32>, i32 -> vector<8x128xf32>
    %297 = vector.broadcast %60 : vector<1x128xf32> to vector<8x128xf32>
    %298 = arith.mulf %296, %297 : vector<8x128xf32>
    %c8_i32_86 = arith.constant 8 : i32
    %299 = tpu.dynamic_rotate %295 by %c8_i32_86 dim 1 : vector<8x128xf32>, i32 -> vector<8x128xf32>
    %300 = vector.broadcast %62 : vector<1x128xf32> to vector<8x128xf32>
    %301 = arith.mulf %299, %300 : vector<8x128xf32>
    %c7_i32_87 = arith.constant 7 : i32
    %302 = tpu.dynamic_rotate %295 by %c7_i32_87 dim 1 : vector<8x128xf32>, i32 -> vector<8x128xf32>
    %303 = vector.broadcast %65 : vector<1x128xf32> to vector<8x128xf32>
    %304 = arith.mulf %302, %303 : vector<8x128xf32>
    %c1_i32_88 = arith.constant 1 : i32
    %305 = tpu.dynamic_rotate %295 by %c1_i32_88 dim 1 : vector<8x128xf32>, i32 -> vector<8x128xf32>
    %306 = vector.broadcast %67 : vector<1x128xf32> to vector<8x128xf32>
    %307 = arith.mulf %305, %306 : vector<8x128xf32>
    %c127_i32_89 = arith.constant 127 : i32
    %308 = tpu.dynamic_rotate %295 by %c127_i32_89 dim 1 : vector<8x128xf32>, i32 -> vector<8x128xf32>
    %309 = vector.broadcast %69 : vector<1x128xf32> to vector<8x128xf32>
    %310 = arith.mulf %308, %309 : vector<8x128xf32>
    %c121_i32_90 = arith.constant 121 : i32
    %311 = tpu.dynamic_rotate %295 by %c121_i32_90 dim 1 : vector<8x128xf32>, i32 -> vector<8x128xf32>
    %312 = vector.broadcast %72 : vector<1x128xf32> to vector<8x128xf32>
    %313 = arith.mulf %311, %312 : vector<8x128xf32>
    %c120_i32_91 = arith.constant 120 : i32
    %314 = tpu.dynamic_rotate %295 by %c120_i32_91 dim 1 : vector<8x128xf32>, i32 -> vector<8x128xf32>
    %315 = vector.broadcast %74 : vector<1x128xf32> to vector<8x128xf32>
    %316 = arith.mulf %314, %315 : vector<8x128xf32>
    %c119_i32_92 = arith.constant 119 : i32
    %317 = tpu.dynamic_rotate %295 by %c119_i32_92 dim 1 : vector<8x128xf32>, i32 -> vector<8x128xf32>
    %318 = vector.broadcast %77 : vector<1x128xf32> to vector<8x128xf32>
    %319 = arith.mulf %317, %318 : vector<8x128xf32>
    %320 = tpu.concatenate %298, %301, %304, %307, %295, %310, %313, %316, %319 in 0 : vector<8x128xf32>, vector<8x128xf32>, vector<8x128xf32>, vector<8x128xf32>, vector<8x128xf32>, vector<8x128xf32>, vector<8x128xf32>, vector<8x128xf32>, vector<8x128xf32> -> vector<72x128xf32>
    %c0_93 = arith.constant 0 : index
    %c0_94 = arith.constant 0 : index
    %321 = vector.load %arg9[%c0_93, %c0_94] : memref<8x72xf32, #tpu.memory_space<vmem>>, vector<8x72xf32>
    %cst_95 = arith.constant dense<0.000000e+00> : vector<8x128xf32>
    %322 = tpu.matmul %321, %320, %cst_95 {dimension_numbers = #tpu.dot_dimension_numbers<[1], [0], [0], [1], [0, 0, 1, 1], [], []>} : vector<8x72xf32>, vector<72x128xf32>, vector<8x128xf32> -> vector<8x128xf32>
    %c0_96 = arith.constant 0 : index
    %c0_97 = arith.constant 0 : index
    %323 = vector.load %arg10[%c0_96, %c0_97] : memref<8x1xf32, #tpu.memory_space<vmem>>, vector<8x1xf32>
    %324 = vector.broadcast %323 : vector<8x1xf32> to vector<8x128xf32>
    %325 = arith.addf %322, %324 : vector<8x128xf32>
    %cst_98 = arith.constant 0.000000e+00 : f32
    %326 = vector.broadcast %cst_98 : f32 to vector<8x128xf32>
    %327 = arith.maximumf %325, %326 : vector<8x128xf32>
    %c3_i32_99 = arith.constant 3 : i32
    %328 = tpu.memref_slice %arg24[%c3_i32_99] : memref<4x!tpu.dma_semaphore, #tpu.memory_space<semaphore_mem>> -> memref<1x!tpu.dma_semaphore, #tpu.memory_space<semaphore_mem>>
    %329 = tpu.memref_squeeze %328 : memref<1x!tpu.dma_semaphore, #tpu.memory_space<semaphore_mem>> -> memref<!tpu.dma_semaphore, #tpu.memory_space<semaphore_mem>>
    tpu.wait_dma2 semaphore(%329 : memref<!tpu.dma_semaphore, #tpu.memory_space<semaphore_mem>>) src(%arg18 : memref<128x512xbf16, #tpu.memory_space<any>>) dst(%arg23 : memref<128x512xbf16, #tpu.memory_space<vmem>>)
    %c0_100 = arith.constant 0 : index
    %c0_101 = arith.constant 0 : index
    %330 = vector.load %arg11[%c0_100, %c0_101] : memref<4x8xf32, #tpu.memory_space<vmem>>, vector<4x8xf32>
    %cst_102 = arith.constant dense<0.000000e+00> : vector<4x128xf32>
    %331 = tpu.matmul %330, %327, %cst_102 {dimension_numbers = #tpu.dot_dimension_numbers<[1], [0], [0], [1], [0, 0, 1, 1], [], []>} : vector<4x8xf32>, vector<8x128xf32>, vector<4x128xf32> -> vector<4x128xf32>
    %332 = arith.truncf %331 : vector<4x128xf32> to vector<4x128xbf16>
    %c0_103 = arith.constant 0 : index
    %c0_104 = arith.constant 0 : index
    %333 = vector.load %arg23[%c0_103, %c0_104] : memref<128x512xbf16, #tpu.memory_space<vmem>>, vector<128x512xbf16>
    %cst_105 = arith.constant dense<0.000000e+00> : vector<4x512xf32>
    %334 = tpu.matmul %332, %333, %cst_105 {dimension_numbers = #tpu.dot_dimension_numbers<[1], [0], [0], [1], [0, 0, 1, 1], [], []>} : vector<4x128xbf16>, vector<128x512xbf16>, vector<4x512xf32> -> vector<4x512xf32>
    %335 = vector.extract_strided_slice %334 {offsets = [0, 0], sizes = [1, 512], strides = [1, 1]} : vector<4x512xf32> to vector<1x512xf32>
    %336 = vector.extract_strided_slice %334 {offsets = [1, 0], sizes = [1, 512], strides = [1, 1]} : vector<4x512xf32> to vector<1x512xf32>
    %c1_i32_106 = arith.constant 1 : i32
    %337 = tpu.dynamic_rotate %336 by %c1_i32_106 dim 1 : vector<1x512xf32>, i32 -> vector<1x512xf32>
    %338 = arith.addf %335, %337 : vector<1x512xf32>
    %339 = vector.extract_strided_slice %334 {offsets = [2, 0], sizes = [1, 512], strides = [1, 1]} : vector<4x512xf32> to vector<1x512xf32>
    %c16_i32_107 = arith.constant 16 : i32
    %340 = tpu.dynamic_rotate %339 by %c16_i32_107 dim 1 : vector<1x512xf32>, i32 -> vector<1x512xf32>
    %341 = arith.addf %338, %340 : vector<1x512xf32>
    %342 = vector.extract_strided_slice %334 {offsets = [3, 0], sizes = [1, 512], strides = [1, 1]} : vector<4x512xf32> to vector<1x512xf32>
    %c17_i32_108 = arith.constant 17 : i32
    %343 = tpu.dynamic_rotate %342 by %c17_i32_108 dim 1 : vector<1x512xf32>, i32 -> vector<1x512xf32>
    %344 = arith.addf %341, %343 : vector<1x512xf32>
    %c0_109 = arith.constant 0 : index
    %c0_110 = arith.constant 0 : index
    %345 = vector.load %arg12[%c0_109, %c0_110] : memref<1x1xf32, #tpu.memory_space<vmem>>, vector<1x1xf32>
    %346 = vector.broadcast %345 : vector<1x1xf32> to vector<1x512xf32>
    %347 = arith.addf %344, %346 : vector<1x512xf32>
    %cst_111 = arith.constant 0.000000e+00 : f32
    %348 = vector.broadcast %cst_111 : f32 to vector<1x512xf32>
    %c17_i32_112 = arith.constant 17 : i32
    %349 = tpu.dynamic_rotate %347 by %c17_i32_112 dim 1 : vector<1x512xf32>, i32 -> vector<1x512xf32>
    %350 = arith.mulf %349, %25 : vector<1x512xf32>
    %c0_113 = arith.constant 0 : index
    %c0_114 = arith.constant 0 : index
    %c0_115 = arith.constant 0 : index
    %351 = vector.load %arg13[%c0_113, %c0_114, %c0_115] : memref<9x1x1xf32, #tpu.memory_space<vmem>>, vector<1x1x1xf32>
    %352 = vector.shape_cast %351 : vector<1x1x1xf32> to vector<1x1xf32>
    %353 = vector.broadcast %352 : vector<1x1xf32> to vector<1x512xf32>
    %354 = arith.mulf %353, %350 : vector<1x512xf32>
    %355 = arith.addf %348, %354 : vector<1x512xf32>
    %c16_i32_116 = arith.constant 16 : i32
    %356 = tpu.dynamic_rotate %347 by %c16_i32_116 dim 1 : vector<1x512xf32>, i32 -> vector<1x512xf32>
    %357 = arith.mulf %356, %27 : vector<1x512xf32>
    %c1_117 = arith.constant 1 : index
    %c0_118 = arith.constant 0 : index
    %c0_119 = arith.constant 0 : index
    %358 = vector.load %arg13[%c1_117, %c0_118, %c0_119] : memref<9x1x1xf32, #tpu.memory_space<vmem>>, vector<1x1x1xf32>
    %359 = vector.shape_cast %358 : vector<1x1x1xf32> to vector<1x1xf32>
    %360 = vector.broadcast %359 : vector<1x1xf32> to vector<1x512xf32>
    %361 = arith.mulf %360, %357 : vector<1x512xf32>
    %362 = arith.addf %355, %361 : vector<1x512xf32>
    %c15_i32_120 = arith.constant 15 : i32
    %363 = tpu.dynamic_rotate %347 by %c15_i32_120 dim 1 : vector<1x512xf32>, i32 -> vector<1x512xf32>
    %364 = arith.mulf %363, %30 : vector<1x512xf32>
    %c2_121 = arith.constant 2 : index
    %c0_122 = arith.constant 0 : index
    %c0_123 = arith.constant 0 : index
    %365 = vector.load %arg13[%c2_121, %c0_122, %c0_123] : memref<9x1x1xf32, #tpu.memory_space<vmem>>, vector<1x1x1xf32>
    %366 = vector.shape_cast %365 : vector<1x1x1xf32> to vector<1x1xf32>
    %367 = vector.broadcast %366 : vector<1x1xf32> to vector<1x512xf32>
    %368 = arith.mulf %367, %364 : vector<1x512xf32>
    %369 = arith.addf %362, %368 : vector<1x512xf32>
    %c1_i32_124 = arith.constant 1 : i32
    %370 = tpu.dynamic_rotate %347 by %c1_i32_124 dim 1 : vector<1x512xf32>, i32 -> vector<1x512xf32>
    %371 = arith.mulf %370, %32 : vector<1x512xf32>
    %c3_125 = arith.constant 3 : index
    %c0_126 = arith.constant 0 : index
    %c0_127 = arith.constant 0 : index
    %372 = vector.load %arg13[%c3_125, %c0_126, %c0_127] : memref<9x1x1xf32, #tpu.memory_space<vmem>>, vector<1x1x1xf32>
    %373 = vector.shape_cast %372 : vector<1x1x1xf32> to vector<1x1xf32>
    %374 = vector.broadcast %373 : vector<1x1xf32> to vector<1x512xf32>
    %375 = arith.mulf %374, %371 : vector<1x512xf32>
    %376 = arith.addf %369, %375 : vector<1x512xf32>
    %c4_128 = arith.constant 4 : index
    %c0_129 = arith.constant 0 : index
    %c0_130 = arith.constant 0 : index
    %377 = vector.load %arg13[%c4_128, %c0_129, %c0_130] : memref<9x1x1xf32, #tpu.memory_space<vmem>>, vector<1x1x1xf32>
    %378 = vector.shape_cast %377 : vector<1x1x1xf32> to vector<1x1xf32>
    %379 = vector.broadcast %378 : vector<1x1xf32> to vector<1x512xf32>
    %380 = arith.mulf %379, %347 : vector<1x512xf32>
    %381 = arith.addf %376, %380 : vector<1x512xf32>
    %c511_i32_131 = arith.constant 511 : i32
    %382 = tpu.dynamic_rotate %347 by %c511_i32_131 dim 1 : vector<1x512xf32>, i32 -> vector<1x512xf32>
    %383 = arith.mulf %382, %34 : vector<1x512xf32>
    %c5_132 = arith.constant 5 : index
    %c0_133 = arith.constant 0 : index
    %c0_134 = arith.constant 0 : index
    %384 = vector.load %arg13[%c5_132, %c0_133, %c0_134] : memref<9x1x1xf32, #tpu.memory_space<vmem>>, vector<1x1x1xf32>
    %385 = vector.shape_cast %384 : vector<1x1x1xf32> to vector<1x1xf32>
    %386 = vector.broadcast %385 : vector<1x1xf32> to vector<1x512xf32>
    %387 = arith.mulf %386, %383 : vector<1x512xf32>
    %388 = arith.addf %381, %387 : vector<1x512xf32>
    %c497_i32_135 = arith.constant 497 : i32
    %389 = tpu.dynamic_rotate %347 by %c497_i32_135 dim 1 : vector<1x512xf32>, i32 -> vector<1x512xf32>
    %390 = arith.mulf %389, %37 : vector<1x512xf32>
    %c6_136 = arith.constant 6 : index
    %c0_137 = arith.constant 0 : index
    %c0_138 = arith.constant 0 : index
    %391 = vector.load %arg13[%c6_136, %c0_137, %c0_138] : memref<9x1x1xf32, #tpu.memory_space<vmem>>, vector<1x1x1xf32>
    %392 = vector.shape_cast %391 : vector<1x1x1xf32> to vector<1x1xf32>
    %393 = vector.broadcast %392 : vector<1x1xf32> to vector<1x512xf32>
    %394 = arith.mulf %393, %390 : vector<1x512xf32>
    %395 = arith.addf %388, %394 : vector<1x512xf32>
    %c496_i32_139 = arith.constant 496 : i32
    %396 = tpu.dynamic_rotate %347 by %c496_i32_139 dim 1 : vector<1x512xf32>, i32 -> vector<1x512xf32>
    %397 = arith.mulf %396, %39 : vector<1x512xf32>
    %c7_140 = arith.constant 7 : index
    %c0_141 = arith.constant 0 : index
    %c0_142 = arith.constant 0 : index
    %398 = vector.load %arg13[%c7_140, %c0_141, %c0_142] : memref<9x1x1xf32, #tpu.memory_space<vmem>>, vector<1x1x1xf32>
    %399 = vector.shape_cast %398 : vector<1x1x1xf32> to vector<1x1xf32>
    %400 = vector.broadcast %399 : vector<1x1xf32> to vector<1x512xf32>
    %401 = arith.mulf %400, %397 : vector<1x512xf32>
    %402 = arith.addf %395, %401 : vector<1x512xf32>
    %c495_i32_143 = arith.constant 495 : i32
    %403 = tpu.dynamic_rotate %347 by %c495_i32_143 dim 1 : vector<1x512xf32>, i32 -> vector<1x512xf32>
    %404 = arith.mulf %403, %42 : vector<1x512xf32>
    %c8_144 = arith.constant 8 : index
    %c0_145 = arith.constant 0 : index
    %c0_146 = arith.constant 0 : index
    %405 = vector.load %arg13[%c8_144, %c0_145, %c0_146] : memref<9x1x1xf32, #tpu.memory_space<vmem>>, vector<1x1x1xf32>
    %406 = vector.shape_cast %405 : vector<1x1x1xf32> to vector<1x1xf32>
    %407 = vector.broadcast %406 : vector<1x1xf32> to vector<1x512xf32>
    %408 = arith.mulf %407, %404 : vector<1x512xf32>
    %409 = arith.addf %402, %408 : vector<1x512xf32>
    %c0_147 = arith.constant 0 : index
    %c0_148 = arith.constant 0 : index
    %410 = vector.load %arg14[%c0_147, %c0_148] : memref<1x1xf32, #tpu.memory_space<vmem>>, vector<1x1xf32>
    %411 = vector.broadcast %410 : vector<1x1xf32> to vector<1x512xf32>
    %412 = arith.addf %409, %411 : vector<1x512xf32>
    %c0_149 = arith.constant 0 : index
    %c0_150 = arith.constant 0 : index
    %413 = vector.load %arg19[%c0_149, %c0_150] : memref<1x512xf32, #tpu.memory_space<vmem>>, vector<1x512xf32>
    tpu.vector_store %arg19[%c0_149, %c0_150], %412 {strides = array<i32>} : memref<1x512xf32, #tpu.memory_space<vmem>>, vector<1x512xf32>,
    return
  }
}

</mosaic_0001>

<bundles_post_ra>
// kernel: autoencoder_forward.1
= control target key start
LH: loop header
LB: loop body
LE: loop exit
PB: predicated region body
PF: predicated region fallthrough
CT: control target
= control target key end

     0   :  { %s5242_s0 = inlined_call_operand.vmem [shape: f32[1,512], index: 0, kind: input, shape index: {}]   ;;  %s5243_s1 = inlined_call_operand.vmem [shape: f32[9,8,1], index: 1, kind: input, shape index: {}]   ;;  %s5244_s2 = inlined_call_operand.vmem [shape: f32[8,1], index: 2, kind: input, shape index: {}]   ;;  %s5245_s3 = inlined_call_operand.vmem [shape: f32[16,72], index: 3, kind: input, shape index: {}]   ;;  %s5246_s4 = inlined_call_operand.vmem [shape: f32[16,1], index: 4, kind: input, shape index: {}]   ;;  %s5247_s5 = inlined_call_operand.vmem [shape: f32[16,144], index: 5, kind: input, shape index: {}]   ;;  %s5248_s6 = inlined_call_operand.vmem [shape: f32[16,1], index: 6, kind: input, shape index: {}]   ;;  %s5249_s7 = inlined_call_operand.vmem [shape: f32[32,16], index: 7, kind: input, shape index: {}]   ;;  %s5250_s8 = inlined_call_operand.vmem [shape: f32[8,1], index: 8, kind: input, shape index: {}]   ;;  %s5251_s9 = inlined_call_operand.vmem [shape: f32[8,72], index: 9, kind: input, shape index: {}]   ;;  %s5252_s10 = inlined_call_operand.vmem [shape: f32[8,1], index: 10, kind: input, shape index: {}]   ;;  %s5253_s11 = inlined_call_operand.vmem [shape: f32[4,8], index: 11, kind: input, shape index: {}]   ;;  %s5254_s12 = inlined_call_operand.<no memory space> [shape: f32[1,1], index: 12, kind: input, shape index: {}]   ;;  %s5255_s13 = inlined_call_operand.vmem [shape: f32[9,1,1], index: 13, kind: input, shape index: {}]   ;;  %s5256_s16 = inlined_call_operand.vmem [shape: bf16[128,128], index: 16, kind: input, shape index: {}]   ;;  %s5257_s17 = inlined_call_operand.vmem [shape: bf16[128,128], index: 17, kind: input, shape index: {}]   ;;  %s5258_s18 = inlined_call_operand.vmem [shape: bf16[128,512], index: 18, kind: input, shape index: {}]   ;;  %s5259_s19 = inlined_call_operand.vmem [shape: f32[1,512], index: 19, kind: output, shape index: {}]   ;;  %s5260_s14 = inlined_call_operand.<no memory space> [shape: f32[1,1], index: 14, kind: input, shape index: {}]   ;;  %s5261_s15 = inlined_call_operand.vmem [shape: bf16[512,128], index: 15, kind: input, shape index: {}]  }
   0x1   :  { %5350 = sst [smem:[#allocation82_spill]] %s5242_s0  ;;  %v24_v0 = vstv %s5254_s12  ;;  %v26_v1 = vstv %s5260_s14  ;;  %v92_v2 = vld [vmem:[%s5261_s15] sm:$0xff]  ;;  %v94_v3 = vld [vmem:[%s5261_s15 + $0x8] sm:$0xff] }
   0x2   :  { %5351 = sst [smem:[#allocation83_spill]] %s5243_s1  ;;  %25 = vst [vmem:[#allocation7] sm:$0x1] %v24_v0  ;;  %27 = vst [vmem:[#allocation8] sm:$0x1] %v26_v1  ;;  %v96_v4 = vld [vmem:[%s5261_s15 + $0x10] sm:$0xff] }
   0x3   :  { %5352 = sst [smem:[#allocation84_spill]] %s5244_s2  ;;  %93 = vst [vmem:[#allocation2] sm:$0xff] %v92_v2  ;;  %95 = vst [vmem:[#allocation2 + $0x8] sm:$0xff] %v94_v3  ;;  %v98_v5 = vld [vmem:[%s5261_s15 + $0x18] sm:$0xff]  ;;  %v100_v6 = vld [vmem:[%s5261_s15 + $0x20] sm:$0xff] }
   0x4   :  { %5353 = sst [smem:[#allocation85_spill]] %s5245_s3  ;;  %97 = vst [vmem:[#allocation2 + $0x10] sm:$0xff] %v96_v4  ;;  %99 = vst [vmem:[#allocation2 + $0x18] sm:$0xff] %v98_v5  ;;  %v102_v7 = vld [vmem:[%s5261_s15 + $0x28] sm:$0xff]  ;;  %v104_v8 = vld [vmem:[%s5261_s15 + $0x30] sm:$0xff] }
   0x5   :  { %101 = vst [vmem:[#allocation2 + $0x20] sm:$0xff] %v100_v6  ;;  %v106_v9 = vld [vmem:[%s5261_s15 + $0x38] sm:$0xff]  ;;  %103 = vst [vmem:[#allocation2 + $0x28] sm:$0xff] %v102_v7  ;;  %v108_v10 = vld [vmem:[%s5261_s15 + $0x40] sm:$0xff] }
   0x6   :  { %105 = vst [vmem:[#allocation2 + $0x30] sm:$0xff] %v104_v8  ;;  %107 = vst [vmem:[#allocation2 + $0x38] sm:$0xff] %v106_v9  ;;  %v110_v11 = vld [vmem:[%s5261_s15 + $0x48] sm:$0xff]  ;;  %v112_v12 = vld [vmem:[%s5261_s15 + $0x50] sm:$0xff] }
   0x7   :  { %109 = vst [vmem:[#allocation2 + $0x40] sm:$0xff] %v108_v10  ;;  %111 = vst [vmem:[#allocation2 + $0x48] sm:$0xff] %v110_v11  ;;  %v114_v13 = vld [vmem:[%s5261_s15 + $0x58] sm:$0xff]  ;;  %v116_v14 = vld [vmem:[%s5261_s15 + $0x60] sm:$0xff] }
   0x8   :  { %113 = vst [vmem:[#allocation2 + $0x50] sm:$0xff] %v112_v12  ;;  %v118_v15 = vld [vmem:[%s5261_s15 + $0x68] sm:$0xff]  ;;  %115 = vst [vmem:[#allocation2 + $0x58] sm:$0xff] %v114_v13  ;;  %v120_v16 = vld [vmem:[%s5261_s15 + $0x70] sm:$0xff] }
   0x9   :  { %117 = vst [vmem:[#allocation2 + $0x60] sm:$0xff] %v116_v14  ;;  %119 = vst [vmem:[#allocation2 + $0x68] sm:$0xff] %v118_v15  ;;  %v122_v17 = vld [vmem:[%s5261_s15 + $0x78] sm:$0xff]  ;;  %v124_v18 = vld [vmem:[%s5261_s15 + $0x80] sm:$0xff] }
   0xa   :  { %121 = vst [vmem:[#allocation2 + $0x70] sm:$0xff] %v120_v16  ;;  %123 = vst [vmem:[#allocation2 + $0x78] sm:$0xff] %v122_v17  ;;  %v126_v19 = vld [vmem:[%s5261_s15 + $0x88] sm:$0xff]  ;;  %v128_v20 = vld [vmem:[%s5261_s15 + $0x90] sm:$0xff] }
   0xb   :  { %125 = vst [vmem:[#allocation2 + $0x80] sm:$0xff] %v124_v18  ;;  %v130_v21 = vld [vmem:[%s5261_s15 + $0x98] sm:$0xff]  ;;  %127 = vst [vmem:[#allocation2 + $0x88] sm:$0xff] %v126_v19  ;;  %v132_v22 = vld [vmem:[%s5261_s15 + $0xa0] sm:$0xff] }
   0xc   :  { %129 = vst [vmem:[#allocation2 + $0x90] sm:$0xff] %v128_v20  ;;  %131 = vst [vmem:[#allocation2 + $0x98] sm:$0xff] %v130_v21  ;;  %v134_v23 = vld [vmem:[%s5261_s15 + $0xa8] sm:$0xff]  ;;  %v136_v24 = vld [vmem:[%s5261_s15 + $0xb0] sm:$0xff] }
   0xd   :  { %133 = vst [vmem:[#allocation2 + $0xa0] sm:$0xff] %v132_v22  ;;  %135 = vst [vmem:[#allocation2 + $0xa8] sm:$0xff] %v134_v23  ;;  %v138_v25 = vld [vmem:[%s5261_s15 + $0xb8] sm:$0xff]  ;;  %v140_v26 = vld [vmem:[%s5261_s15 + $0xc0] sm:$0xff] }
   0xe   :  { %137 = vst [vmem:[#allocation2 + $0xb0] sm:$0xff] %v136_v24  ;;  %v142_v27 = vld [vmem:[%s5261_s15 + $0xc8] sm:$0xff]  ;;  %139 = vst [vmem:[#allocation2 + $0xb8] sm:$0xff] %v138_v25  ;;  %v144_v28 = vld [vmem:[%s5261_s15 + $0xd0] sm:$0xff] }
   0xf   :  { %141 = vst [vmem:[#allocation2 + $0xc0] sm:$0xff] %v140_v26  ;;  %143 = vst [vmem:[#allocation2 + $0xc8] sm:$0xff] %v142_v27  ;;  %v146_v29 = vld [vmem:[%s5261_s15 + $0xd8] sm:$0xff]  ;;  %v148_v30 = vld [vmem:[%s5261_s15 + $0xe0] sm:$0xff] }
  0x10   :  { %145 = vst [vmem:[#allocation2 + $0xd0] sm:$0xff] %v144_v28  ;;  %147 = vst [vmem:[#allocation2 + $0xd8] sm:$0xff] %v146_v29  ;;  %v150_v31 = vld [vmem:[%s5261_s15 + $0xe8] sm:$0xff]  ;;  %v152_v32 = vld [vmem:[%s5261_s15 + $0xf0] sm:$0xff] }
  0x11   :  { %149 = vst [vmem:[#allocation2 + $0xe0] sm:$0xff] %v148_v30  ;;  %v154_v33 = vld [vmem:[%s5261_s15 + $0xf8] sm:$0xff]  ;;  %151 = vst [vmem:[#allocation2 + $0xe8] sm:$0xff] %v150_v31 }
  0x12   :  { %153 = vst [vmem:[#allocation2 + $0xf0] sm:$0xff] %v152_v32  ;;  %155 = vst [vmem:[#allocation2 + $0xf8] sm:$0xff] %v154_v33 }
  0x13   :  { %163 = vsyncadd [#allocation6], 4096  ;;  %v198_v34 = vld [vmem:[%s5256_s16] sm:$0xff]  ;;  %v200_v35 = vld [vmem:[%s5256_s16 + $0x8] sm:$0xff] }
  0x14   :  { %199 = vst [vmem:[#allocation3] sm:$0xff] %v198_v34  ;;  %201 = vst [vmem:[#allocation3 + $0x8] sm:$0xff] %v200_v35  ;;  %v202_v36 = vld [vmem:[%s5256_s16 + $0x10] sm:$0xff]  ;;  %v204_v37 = vld [vmem:[%s5256_s16 + $0x18] sm:$0xff] }
  0x15   :  { %v206_v38 = vld [vmem:[%s5256_s16 + $0x20] sm:$0xff]  ;;  %203 = vst [vmem:[#allocation3 + $0x10] sm:$0xff] %v202_v36  ;;  %205 = vst [vmem:[#allocation3 + $0x18] sm:$0xff] %v204_v37  ;;  %v208_v39 = vld [vmem:[%s5256_s16 + $0x28] sm:$0xff] }
  0x16   :  { %207 = vst [vmem:[#allocation3 + $0x20] sm:$0xff] %v206_v38  ;;  %v210_v40 = vld [vmem:[%s5256_s16 + $0x30] sm:$0xff]  ;;  %v212_v41 = vld [vmem:[%s5256_s16 + $0x38] sm:$0xff]  ;;  %209 = vst [vmem:[#allocation3 + $0x28] sm:$0xff] %v208_v39 }
  0x17   :  { %211 = vst [vmem:[#allocation3 + $0x30] sm:$0xff] %v210_v40  ;;  %213 = vst [vmem:[#allocation3 + $0x38] sm:$0xff] %v212_v41 }
  0x18   :  { %221 = vsyncadd [#allocation6 + $0x1], 1024  ;;  %v256_v42 = vld [vmem:[%s5257_s17] sm:$0xff]  ;;  %v258_v43 = vld [vmem:[%s5257_s17 + $0x8] sm:$0xff] }
  0x19   :  { %257 = vst [vmem:[#allocation4] sm:$0xff] %v256_v42  ;;  %259 = vst [vmem:[#allocation4 + $0x8] sm:$0xff] %v258_v43  ;;  %v260_v44 = vld [vmem:[%s5257_s17 + $0x10] sm:$0xff]  ;;  %v262_v45 = vld [vmem:[%s5257_s17 + $0x18] sm:$0xff] }
  0x1a   :  { %v264_v46 = vld [vmem:[%s5257_s17 + $0x20] sm:$0xff]  ;;  %261 = vst [vmem:[#allocation4 + $0x10] sm:$0xff] %v260_v44  ;;  %263 = vst [vmem:[#allocation4 + $0x18] sm:$0xff] %v262_v45  ;;  %v266_v47 = vld [vmem:[%s5257_s17 + $0x28] sm:$0xff] }
  0x1b   :  { %265 = vst [vmem:[#allocation4 + $0x20] sm:$0xff] %v264_v46  ;;  %v268_v48 = vld [vmem:[%s5257_s17 + $0x30] sm:$0xff]  ;;  %v270_v49 = vld [vmem:[%s5257_s17 + $0x38] sm:$0xff]  ;;  %267 = vst [vmem:[#allocation4 + $0x28] sm:$0xff] %v266_v47 }
  0x1c   :  { %269 = vst [vmem:[#allocation4 + $0x30] sm:$0xff] %v268_v48  ;;  %271 = vst [vmem:[#allocation4 + $0x38] sm:$0xff] %v270_v49 }
  0x1d   :  { %279 = vsyncadd [#allocation6 + $0x2], 1024  ;;  %v3727_v50 = vld [vmem:[%s5258_s18] sm:$0xff]  ;;  %v3732_v51 = vld [vmem:[%s5258_s18 + $0x8] sm:$0xff]  ;;  %v5264_v18 = vlaneseq  ;;  %v5265_v19 = vmov 0   ;;  %s5387_s17 = sld [smem:[#allocation82_spill]] }
  0x1e   :  { %5354 = vst [vmem:[#allocation17_spill] sm:$0xff] %v3727_v50  ;;  %5355 = vst [vmem:[#allocation18_spill] sm:$0xff] %v3732_v51  ;;  %v3737_v52 = vld [vmem:[%s5258_s18 + $0x10] sm:$0xff]  ;;  %v3742_v53 = vld [vmem:[%s5258_s18 + $0x18] sm:$0xff]  ;;  %3339 = vset.pattern.permute.xlu0 %v5265_v19  ;;  %3340 = vset.pattern.permute.xlu1 %v5265_v19 }
  0x1f   :  { %5356 = vst [vmem:[#allocation19_spill] sm:$0xff] %v3737_v52  ;;  %5357 = vst [vmem:[#allocation20_spill] sm:$0xff] %v3742_v53  ;;  %v3747_v54 = vld [vmem:[%s5258_s18 + $0x20] sm:$0xff]  ;;  %v3752_v55 = vld [vmem:[%s5258_s18 + $0x28] sm:$0xff]  ;;  %v3887_v20 = vshrl.u32 %v5264_v18, 7 }
  0x20   :  { %5358 = vst [vmem:[#allocation21_spill] sm:$0xff] %v3747_v54  ;;  %5359 = vst [vmem:[#allocation22_spill] sm:$0xff] %v3752_v55  ;;  %v3757_v56 = vld [vmem:[%s5258_s18 + $0x30] sm:$0xff]  ;;  %v3762_v57 = vld [vmem:[%s5258_s18 + $0x38] sm:$0xff] }
  0x21   :  { %5360 = vst [vmem:[#allocation23_spill] sm:$0xff] %v3757_v56  ;;  %5361 = vst [vmem:[#allocation24_spill] sm:$0xff] %v3762_v57  ;;  %v3767_v58 = vld [vmem:[%s5258_s18 + $0x40] sm:$0xff]  ;;  %v3772_v59 = vld [vmem:[%s5258_s18 + $0x48] sm:$0xff]  ;;  %v565_v22 = vsub.s32 2, %v3887_v20  ;;  %v3894_v23 = vsub.s32 0, %v3887_v20 }
  0x22   :  { %5362 = vst [vmem:[#allocation25_spill] sm:$0xff] %v3767_v58  ;;  %5363 = vst [vmem:[#allocation26_spill] sm:$0xff] %v3772_v59  ;;  %v3777_v60 = vld [vmem:[%s5258_s18 + $0x50] sm:$0xff]  ;;  %v3782_v61 = vld [vmem:[%s5258_s18 + $0x58] sm:$0xff]  ;;  %v569_v24 = vsub.s32 3, %v3887_v20  ;;  %v561_v25 = vsub.s32 1, %v3887_v20 }
  0x23   :  { %5364 = vst [vmem:[#allocation27_spill] sm:$0xff] %v3777_v60  ;;  %5365 = vst [vmem:[#allocation28_spill] sm:$0xff] %v3782_v61  ;;  %v3787_v62 = vld [vmem:[%s5258_s18 + $0x60] sm:$0xff]  ;;  %v3792_v63 = vld [vmem:[%s5258_s18 + $0x68] sm:$0xff] }
  0x24   :  { %5366 = vst [vmem:[#allocation29_spill] sm:$0xff] %v3787_v62  ;;  %5367 = vst [vmem:[#allocation30_spill] sm:$0xff] %v3792_v63  ;;  %v3797_v0 = vld [vmem:[%s5258_s18 + $0x70] sm:$0xff]  ;;  %v3802_v1 = vld [vmem:[%s5258_s18 + $0x78] sm:$0xff] }
  0x25   :  { %5368 = vst [vmem:[#allocation31_spill] sm:$0xff] %v3797_v0  ;;  %5369 = vst [vmem:[#allocation32_spill] sm:$0xff] %v3802_v1  ;;  %v3807_v2 = vld [vmem:[%s5258_s18 + $0x80] sm:$0xff]  ;;  %v3812_v3 = vld [vmem:[%s5258_s18 + $0x88] sm:$0xff] }
  0x26   :  { %5370 = vst [vmem:[#allocation33_spill] sm:$0xff] %v3807_v2  ;;  %5371 = vst [vmem:[#allocation34_spill] sm:$0xff] %v3812_v3  ;;  %v3817_v4 = vld [vmem:[%s5258_s18 + $0x90] sm:$0xff]  ;;  %v3822_v5 = vld [vmem:[%s5258_s18 + $0x98] sm:$0xff] }
  0x27   :  { %5372 = vst [vmem:[#allocation35_spill] sm:$0xff] %v3817_v4  ;;  %5373 = vst [vmem:[#allocation36_spill] sm:$0xff] %v3822_v5  ;;  %v3827_v6 = vld [vmem:[%s5258_s18 + $0xa0] sm:$0xff]  ;;  %v3832_v7 = vld [vmem:[%s5258_s18 + $0xa8] sm:$0xff] }
  0x28   :  { %5374 = vst [vmem:[#allocation37_spill] sm:$0xff] %v3827_v6  ;;  %5375 = vst [vmem:[#allocation38_spill] sm:$0xff] %v3832_v7  ;;  %v3837_v8 = vld [vmem:[%s5258_s18 + $0xb0] sm:$0xff]  ;;  %v3842_v9 = vld [vmem:[%s5258_s18 + $0xb8] sm:$0xff] }
  0x29   :  { %5376 = vst [vmem:[#allocation39_spill] sm:$0xff] %v3837_v8  ;;  %5377 = vst [vmem:[#allocation40_spill] sm:$0xff] %v3842_v9  ;;  %v3847_v10 = vld [vmem:[%s5258_s18 + $0xc0] sm:$0xff]  ;;  %v3852_v11 = vld [vmem:[%s5258_s18 + $0xc8] sm:$0xff] }
  0x2a   :  { %5378 = vst [vmem:[#allocation41_spill] sm:$0xff] %v3847_v10  ;;  %5379 = vst [vmem:[#allocation42_spill] sm:$0xff] %v3852_v11  ;;  %v3857_v12 = vld [vmem:[%s5258_s18 + $0xd0] sm:$0xff]  ;;  %v3862_v13 = vld [vmem:[%s5258_s18 + $0xd8] sm:$0xff] }
  0x2b   :  { %5380 = vst [vmem:[#allocation43_spill] sm:$0xff] %v3857_v12  ;;  %5381 = vst [vmem:[#allocation44_spill] sm:$0xff] %v3862_v13  ;;  %v3867_v14 = vld [vmem:[%s5258_s18 + $0xe0] sm:$0xff]  ;;  %v3872_v15 = vld [vmem:[%s5258_s18 + $0xe8] sm:$0xff] }
  0x2c   :  { %5382 = vst [vmem:[#allocation45_spill] sm:$0xff] %v3867_v14  ;;  %5383 = vst [vmem:[#allocation46_spill] sm:$0xff] %v3872_v15  ;;  %v3877_v16 = vld [vmem:[%s5258_s18 + $0xf0] sm:$0xff]  ;;  %v3882_v17 = vld [vmem:[%s5258_s18 + $0xf8] sm:$0xff] }
  0x2d   :  { %5384 = vst [vmem:[#allocation47_spill] sm:$0xff] %v3877_v16  ;;  %5385 = vst [vmem:[#allocation48_spill] sm:$0xff] %v3882_v17  ;;  %v553_v21 = vld [vmem:[%s5387_s17] sm:$0xf] }
  0x2e   :  { %5386 = vst [vmem:[#allocation49_spill] sm:$0xff] %v3887_v20 }
  0x2f   :  { %385 = vsyncadd [#allocation6 + $0x3], 4096  ;;  %v3898_v26 = vrot.slane %v553_v21, %v565_v22  ;;  %v3901_v27 = vrot.slane %v553_v21, %v3894_v23  ;;  %s3451_s18 = smov 17   ;;  %v3907_v28 = vrot.slane %v553_v21, %v569_v24  ;;  %v3909_v29 = vrot.slane %v553_v21, %v561_v25  ;;  %s5388_s21 = sld [smem:[#allocation83_spill]] }
  0x30   :  { %s3452_s1 = smov 16   ;;  %s3453_s2 = smov 15   ;;  %v3992_v38 = vand.u32 127, %v5264_v18  ;;  %v5268_v48 = vmov 0.0   ;;  %v5422_v7 = vmov 0  ;;  %v5426_v2 = vmov 0 }
  0x31   :  { %579 = vrot.lane.b32.xlu1 %v3898_v26, %s3451_s18  ;;  %575 = vrot.lane.b32.xlu0 %v3901_v27, %s3451_s18  ;;  %s3454_s24 = smov 1   ;;  %s3455_s26 = smov 127   ;;  %v5430_v13 = vmov 0  ;;  %v5444_v15 = vmov 0.0  }
  0x32   :  { %s3456_s29 = smov 113   ;;  %s3457_s30 = smov 112   ;;  %v500_v41 = vshra.s32 %v3992_v38, 3  ;;  %v527_v42 = vshra.s32 %v3992_v38, 2  ;;  %v499_v43 = vand.u32 7, %v3992_v38  ;;  %v526_v45 = vand.u32 3, %v3992_v38 }
  0x33   :  { %s5346_s22 = smov 111   ;;  %s5389_s3 = sld [smem:[#allocation84_spill]]  ;;  %v388_v51 = vadd.s32 128, %v3992_v38  ;;  %v389_v53 = vadd.s32 256, %v3992_v38  ;;  %v395_v55 = vshra.s32 %v3992_v38, 4  ;;  %v391_v54 = vand.u32 15, %v3992_v38 }
  0x34   :  { %v501_v44 = vand.u32 7, %v500_v41  ;;  %v528_v46 = vand.u32 3, %v527_v42  ;;  %vm504_vm2 = vcmp.ge.s32.totalorder %v499_v43, 1  ;;  %vm4008_vm3 = vcmp.le.s32.totalorder %v499_v43, 6 }
  0x35   :  { %581 = vrot.lane.b32.xlu1 %v3907_v28, %s3451_s18  ;;  %577 = vrot.lane.b32.xlu0 %v3909_v29, %s3451_s18  ;;  %v592_v30 = vld [vmem:[%s5388_s21] sm:$0xff]  ;;  %v3016_v31 = vld [vmem:[%s5388_s21 + $0x8] sm:$0xff]  ;;  %v4016_v21 = vsel %vm504_vm2, 1.0, %v5268_v48  ;;  %v4021_v22 = vsel %vm4008_vm3, 1.0, %v5268_v48  ;;  %vm4032_vm8 = vcmp.ge.s32.totalorder %v526_v45, 1  ;;  %vm532_vm10 = vcmp.le.s32.totalorder %v526_v45, 2 }
  0x36   :  { %v3017_v32 = vld [vmem:[%s5388_s21 + $0x10] sm:$0xff]  ;;  %v3018_v33 = vld [vmem:[%s5388_s21 + $0x18] sm:$0xff]  ;;  %v3019_v34 = vld [vmem:[%s5388_s21 + $0x20] sm:$0xff]  ;;  %vm502_vm0 = vcmp.ge.s32.totalorder %v501_v44, 1  ;;  %vm503_vm1 = vcmp.le.s32.totalorder %v501_v44, 6  ;;  %5393 = vst [vmem:[#allocation51_spill] sm:$0xff] %v4016_v21 }
  0x37   :  { %v3020_v35 = vld [vmem:[%s5388_s21 + $0x28] sm:$0xff]  ;;  %v3021_v36 = vld [vmem:[%s5388_s21 + $0x30] sm:$0xff]  ;;  %v3022_v37 = vld [vmem:[%s5388_s21 + $0x38] sm:$0xff]  ;;  %v4013_v49 = vsel %vm502_vm0, 1.0, %v5268_v48  ;;  %5394 = vst [vmem:[#allocation52_spill] sm:$0xff] %v4021_v22  ;;  %v4025_v24 = vsel %vm503_vm1, 1.0, %v5268_v48 }
  0x38   :  { %v3023_v39 = vld [vmem:[%s5388_s21 + $0x40] sm:$0xff]  ;;  %vm506_vm4 = vmand %vm502_vm0, %vm504_vm2  ;;  %5392 = vst [vmem:[#allocation50_spill] sm:$0xff] %v4013_v49  ;;  %vm529_vm6 = vcmp.ge.s32.totalorder %v528_v46, 1  ;;  %vm530_vm7 = vcmp.le.s32.totalorder %v528_v46, 2  ;;  %v390_v46 = vadd.s32 384, %v3992_v38  ;;  %v396_v52 = vshra.s32 %v388_v51, 4 }
  0x39   :  { %622 = vrot.lane.b32.xlu1 %v3901_v27, %s3452_s1  ;;  %595 = vperm.xlu0 %3339, %v592_v30   ;;  %v973_v40 = vld [vmem:[%s5389_s3] sm:$0xff]  ;;  %5395 = vst [vmem:[#allocation53_spill] sm:$0xff] %v4025_v24  ;;  %v4028_v25 = vsel %vm506_vm4, 1.0, %v5268_v48  ;;  %vm511_vm5 = vmand %vm502_vm0, %vm4008_vm3  ;;  %v397_v59 = vshra.s32 %v389_v53, 4  ;;  %v4112_v56 = vand.u32 15, %v395_v55  ;;  %v392_v60 = vand.u32 15, %v388_v51 }
  0x3a   :  { %5396 = vst [vmem:[#allocation54_spill] sm:$0xff] %v4028_v25  ;;  %vm518_vm9 = vmand %vm503_vm1, %vm504_vm2  ;;  %v398_v57 = vshra.s32 %v390_v46, 4  ;;  %v394_v63 = vand.u32 15, %v390_v46  ;;  %v4118_v3 = vand.u32 15, %v396_v52  ;;  %v393_v5 = vand.u32 15, %v389_v53 }
  0x3b   :  { %vm523_vm11 = vmand %vm503_vm1, %vm4008_vm3  ;;  %v4120_v62 = vand.u32 15, %v397_v59  ;;  %vm5296_vm0 = vcmp.ge.s32.totalorder %v4112_v56, 1  ;;  %vm4123_vm1 = vcmp.ge.s32.totalorder %v391_v54, 1  ;;  %v5412_v55 = vmov 0 }
  0x3c   :  { %vm533_vm12 = vmand %vm529_vm6, %vm4032_vm8  ;;  %v4114_v1 = vand.u32 15, %v398_v57  ;;  %vm4128_vm3 = vcmp.ge.s32.totalorder %v394_v63, 1  ;;  %vm5299_vm4 = vcmp.ge.s32.totalorder %v4118_v3, 1  ;;  %v5418_v59 = vmov 0 }
  0x3d   :  { %624 = vrot.lane.b32.xlu1 %v3909_v29, %s3452_s1  ;;  %626 = vrot.lane.b32.xlu0 %v3898_v26, %s3452_s1  ;;  %vm538_vm13 = vmand %vm529_vm6, %vm532_vm10  ;;  %v5413_v55 = vsel %vm4128_vm3, 4294967295, %v5412_v55  ;;  %v4347_v12 = vsel %vm4123_vm1, 1.0, %v5444_v15 }
  0x3e   :  { %vm545_vm14 = vmand %vm530_vm7, %vm4032_vm8  ;;  %vm5294_vm2 = vcmp.ge.s32.totalorder %v4114_v1, 1 }
  0x3f   :  { %v4079_v41 = vsel %vm545_vm14, 1.0, %v5268_v48  ;;  %vm550_vm15 = vmand %vm530_vm7, %vm532_vm10  ;;  %vm4190_vm14 = vcmp.le.s32.totalorder %v391_v54, 14 }
  0x40   :  { %5408 = vst [vmem:[#allocation64_spill] sm:$0xff] %v4079_v41  ;;  %v4083_v42 = vsel %vm550_vm15, 1.0, %v5268_v48  ;;  %v5431_v13 = vsel %vm4190_vm14, 4294967295, %v5430_v13 }
  0x41   :  { %628 = vrot.lane.b32.xlu1 %v3907_v28, %s3452_s1  ;;  %643 = vperm.xlu0 %3339, %v3016_v31   ;;  %v4037_v31 = vsel %vm511_vm5, 1.0, %v5268_v48  ;;  %5409 = vst [vmem:[#allocation65_spill] sm:$0xff] %v4083_v42  ;;  %vm4137_vm5 = vcmp.ge.s32.totalorder %v392_v60, 1 }
  0x42   :  { %5399 = vst [vmem:[#allocation55_spill] sm:$0xff] %v4037_v31  ;;  %v4332_v49 = vsel %vm4137_vm5, 1.0, %v5444_v15 }
  0x45   :  { %670 = vrot.lane.b32.xlu1 %v3901_v27, %s3453_s2  ;;  %672 = vrot.lane.b32.xlu0 %v3909_v29, %s3453_s2 }
  0x49   :  { %674 = vrot.lane.b32.xlu1 %v3898_v26, %s3453_s2  ;;  %676 = vrot.lane.b32.xlu0 %v3907_v28, %s3453_s2 }
  0x4d   :  { %691 = vperm.xlu1 %3340, %v3017_v32   ;;  %718 = vrot.lane.b32.xlu0 %v3901_v27, %s3454_s24  ;;  %v4042_v32 = vsel %vm529_vm6, 1.0, %v5268_v48  ;;  %vm4145_vm6 = vmand %vm5296_vm0, %vm4123_vm1 }
  0x4e   :  { %5400 = vst [vmem:[#allocation56_spill] sm:$0xff] %v4042_v32  ;;  %v4241_v17 = vsel %vm4145_vm6, 1.0, %v5444_v15  ;;  %vm5452_vm6 = vcmp.ge.s32.totalorder %v4118_v3, 1 }
  0x4f   :  { %5445 = vst [vmem:[#allocation66_spill] sm:$0xff] %v4241_v17  ;;  %v4266_v42 = vsel %vm5452_vm6, 1.0, %v5444_v15  ;;  %vm678_vm6 = vcmp.lt.s32.totalorder %v3992_v38, 15 }
  0x51   :  { %720 = vrot.lane.b32.xlu1 %v3909_v29, %s3454_s24  ;;  %722 = vrot.lane.b32.xlu0 %v3898_v26, %s3454_s24 }
  0x55   :  { %724 = vrot.lane.b32.xlu1 %v3907_v28, %s3454_s24  ;;  %739 = vperm.xlu0 %3339, %v3018_v33   ;;  %v4047_v33 = vsel %vm4032_vm8, 1.0, %v5268_v48  ;;  %vm4150_vm8 = vcmp.ge.s32.totalorder %v393_v5, 1 }
  0x56   :  { %5401 = vst [vmem:[#allocation57_spill] sm:$0xff] %v4047_v33  ;;  %v5419_v59 = vsel %vm4150_vm8, 4294967295, %v5418_v59 }
  0x59   :  { %770 = vperm.xlu1 %3340, %v3019_v34   ;;  %781 = vrot.lane.b32.xlu0 %v3901_v27, %s3455_s26  ;;  %v4050_v34 = vsel %vm518_vm9, 1.0, %v5268_v48  ;;  %vm4158_vm9 = vmand %vm5294_vm2, %vm4128_vm3  ;;  %vm4202_vm2 = vcmp.le.s32.totalorder %v394_v63, 14  ;;  %vm5441_vm3 = vcmp.ge.s32.totalorder %v4114_v1, 1 }
  0x5a   :  { %5402 = vst [vmem:[#allocation58_spill] sm:$0xff] %v4050_v34  ;;  %v4261_v53 = vsel %vm4158_vm9, 1.0, %v5444_v15  ;;  %vm5456_vm9 = vcmp.le.s32.totalorder %v4118_v3, 14 }
  0x5b   :  { %5451 = vst [vmem:[#allocation68_spill] sm:$0xff] %v4261_v53 }
  0x5d   :  { %783 = vrot.lane.b32.xlu1 %v3909_v29, %s3455_s26  ;;  %785 = vrot.lane.b32.xlu0 %v3898_v26, %s3455_s26 }
  0x61   :  { %787 = vrot.lane.b32.xlu1 %v3907_v28, %s3455_s26  ;;  %802 = vperm.xlu0 %3339, %v3020_v35   ;;  %v4056_v35 = vsel %vm532_vm10, 1.0, %v5268_v48  ;;  %vm4162_vm10 = vcmp.le.s32.totalorder %v392_v60, 14 }
  0x62   :  { %5403 = vst [vmem:[#allocation59_spill] sm:$0xff] %v4056_v35  ;;  %v5423_v7 = vsel %vm4162_vm10, 4294967295, %v5422_v7  ;;  %vm4198_vm15 = vmand %vm5299_vm4, %vm4162_vm10 }
  0x63   :  { %v4299_v35 = vsel %vm4198_vm15, 1.0, %v5444_v15  ;;  %vm726_vm15 = vcmp.lt.s32.totalorder %v3992_v38, 1 }
  0x64   :  { %5459 = vst [vmem:[#allocation70_spill] sm:$0xff] %v4299_v35 }
  0x65   :  { %829 = vrot.lane.b32.xlu1 %v3901_v27, %s3456_s29  ;;  %831 = vrot.lane.b32.xlu0 %v3909_v29, %s3456_s29 }
  0x69   :  { %833 = vrot.lane.b32.xlu1 %v3898_v26, %s3456_s29  ;;  %835 = vrot.lane.b32.xlu0 %v3907_v28, %s3456_s29 }
  0x6d   :  { %850 = vperm.xlu1 %3340, %v3021_v36   ;;  %877 = vrot.lane.b32.xlu0 %v3901_v27, %s3457_s30  ;;  %v4060_v36 = vsel %vm530_vm7, 1.0, %v5268_v48  ;;  %vm5306_vm7 = vcmp.ge.s32.totalorder %v4120_v62, 1 }
  0x6e   :  { %5404 = vst [vmem:[#allocation60_spill] sm:$0xff] %v4060_v36 }
  0x71   :  { %879 = vrot.lane.b32.xlu1 %v3909_v29, %s3457_s30  ;;  %881 = vrot.lane.b32.xlu0 %v3898_v26, %s3457_s30 }
  0x75   :  { %883 = vrot.lane.b32.xlu1 %v3907_v28, %s3457_s30  ;;  %898 = vperm.xlu0 %3339, %v3022_v37   ;;  %v4063_v37 = vsel %vm523_vm11, 1.0, %v5268_v48  ;;  %vm4170_vm11 = vmand %vm5299_vm4, %vm4137_vm5  ;;  %vm5438_vm4 = vcmp.ge.s32.totalorder %v4112_v56, 1 }
  0x76   :  { %5405 = vst [vmem:[#allocation61_spill] sm:$0xff] %v4063_v37  ;;  %vm4219_vm10 = vmand %vm5438_vm4, %vm4190_vm14 }
  0x77   :  { %vm4282_vm14 = vmand %vm5456_vm9, %vm4137_vm5  ;;  %vm5466_vm5 = vnez %v5431_v13 }
  0x78   :  { %v4357_v54 = vsel %vm5466_vm5, 1.0, %v5444_v15  ;;  %v4394_v24 = vsel %vm4282_vm14, 1.0, %v5444_v15 }
  0x79   :  { %925 = vrot.lane.b32.xlu1 %v3901_v27, %s5346_s22  ;;  %927 = vrot.lane.b32.xlu0 %v3909_v29, %s5346_s22 }
  0x7d   :  { %929 = vrot.lane.b32.xlu1 %v3898_v26, %s5346_s22  ;;  %931 = vrot.lane.b32.xlu0 %v3907_v28, %s5346_s22 }
  0x81   :  { %946 = vperm.xlu1 %3340, %v3023_v39   ;;  %976 = vperm.xlu0 %3339, %v973_v40   ;;  %v4069_v39 = vsel %vm533_vm12, 1.0, %v5268_v48  ;;  %v4073_v40 = vsel %vm538_vm13, 1.0, %v5268_v48  ;;  %vm4174_vm12 = vcmp.le.s32.totalorder %v393_v5, 14  ;;  %vm4186_vm13 = vmand %vm5306_vm7, %vm4150_vm8  ;;  %v4322_v5 = vsel %vm4219_vm10, 1.0, %v5444_v15 }
  0x82   :  { %5406 = vst [vmem:[#allocation62_spill] sm:$0xff] %v4069_v39  ;;  %5407 = vst [vmem:[#allocation63_spill] sm:$0xff] %v4073_v40  ;;  %v5427_v2 = vsel %vm4174_vm12, 4294967295, %v5426_v2  ;;  %v4289_v40 = vsel %vm4170_vm11, 1.0, %v5444_v15  ;;  %v4294_v33 = vsel %vm4186_vm13, 1.0, %v5444_v15  ;;  %vm5461_vm11 = vcmp.le.s32.totalorder %v4120_v62, 14 }
  0x83   :  { %vm4210_vm0 = vmand %vm5306_vm7, %vm4174_vm12  ;;  %5464 = vst [vmem:[#allocation71_spill] sm:$0xff] %v4322_v5  ;;  %vm5465_vm13 = vnez %v5413_v55  ;;  %vm5467_vm10 = vnez %v5423_v7  ;;  %v4372_v55 = vsel %vm4202_vm2, 1.0, %v5444_v15 }
  0x84   :  { %vm4233_vm12 = vmand %vm5441_vm3, %vm4202_vm2  ;;  %vm5448_vm3 = vcmp.le.s32.totalorder %v4112_v56, 14  ;;  %v4317_v60 = vsel %vm4210_vm0, 1.0, %v5444_v15  ;;  %v4352_v52 = vsel %vm5465_vm13, 1.0, %v5444_v15 }
  0x85   :  { %vm5446_vm7 = vmmov %vm5438_vm4  ;;  %vm410_vm4 = vcmp.le.s32.totalorder %v4114_v1, 14  ;;  %v4327_v25 = vsel %vm4233_vm12, 1.0, %v5444_v15  ;;  %vm5468_vm12 = vnez %v5427_v2 }
  0x86   :  { %v4247_v14 = vsel %vm5446_vm7, 1.0, %v5444_v15  ;;  %vm4253_vm8 = vmand %vm5448_vm3, %vm4123_vm1  ;;  %vm5453_vm7 = vcmp.ge.s32.totalorder %v4120_v62, 1  ;;  %vm5454_vm3 = vcmp.ge.s32.totalorder %v4114_v1, 1  ;;  %v4367_v0 = vsel %vm5468_vm12, 1.0, %v5444_v15 }
  0x87   :  { %5447 = vst [vmem:[#allocation67_spill] sm:$0xff] %v4247_v14  ;;  %v4271_v39 = vsel %vm5453_vm7, 1.0, %v5444_v15  ;;  %v4276_v32 = vsel %vm5454_vm3, 1.0, %v5444_v15  ;;  %vm5460_vm7 = vnez %v5419_v59  ;;  %vm470_vm0 = vmand %vm410_vm4, %vm5465_vm13  ;;  %v4362_v59 = vsel %vm5467_vm10, 1.0, %v5444_v15 }
  0x88   :  { %5455 = vst [vmem:[#allocation69_spill] sm:$0xff] %v4276_v32  ;;  %vm4310_vm3 = vmand %vm5461_vm11, %vm5460_vm7  ;;  %v4342_v8 = vsel %vm5460_vm7, 1.0, %v5444_v15  ;;  %vm5469_vm1 = vcmp.le.s32.totalorder %v4112_v56, 14  ;;  %v4389_v34 = vsel %vm4253_vm8, 1.0, %v5444_v15  ;;  %v4402_v37 = vsel %vm470_vm0, 1.0, %v5444_v15 }
  0x89   :  { %vm4378_vm9 = vmand %vm5469_vm1, %vm5466_vm5  ;;  %5472 = vst [vmem:[#allocation72_spill] sm:$0xff] %v4389_v34  ;;  %v4399_v13 = vsel %vm4310_vm3, 1.0, %v5444_v15  ;;  %vm5474_vm7 = vcmp.le.s32.totalorder %v4118_v3, 14  ;;  %vm5475_vm8 = vcmp.lt.s32.totalorder %v3992_v38, 17  ;;  %vm5481_vm0 = vcmp.lt.s32.totalorder %v3992_v38, 16 }
  0x8a   :  { %5473 = vst [vmem:[#allocation73_spill] sm:$0xff] %v4402_v37  ;;  %vm488_vm11 = vmand %vm5474_vm7, %vm5467_vm10  ;;  %vm5483_vm10 = vcmp.le.s32.totalorder %v4120_v62, 14  ;;  %v4442_v3 = vsel %vm410_vm4, 1.0, %v5444_v15 }
  0x8b   :  { %vm5476_vm14 = vmmov %vm5475_vm8  ;;  %v4437_v56 = vsel %vm5483_vm10, 1.0, %v5444_v15  ;;  %5485 = vst [vmem:[#allocation77_spill] sm:$0xff] %v4442_v3 }
  0x8c   :  { %vm5477_vm3 = vmmov %vm5469_vm1  ;;  %5484 = vst [vmem:[#allocation76_spill] sm:$0xff] %v4437_v56  ;;  %v4458_v56 = vsel %vm488_vm11, 1.0, %v5444_v15  ;;  %vm885_vm11 = vcmp.lt.s32.totalorder %v3992_v38, 112 }
  0x8d   :  { %v4419_v9 = vsel %vm5477_vm3, 1.0, %v5444_v15  ;;  %vm5479_vm13 = vmmov %vm5474_vm7  ;;  %5489 = vst [vmem:[#allocation79_spill] sm:$0xff] %v4458_v56  ;;  %vm837_vm3 = vcmp.lt.s32.totalorder %v3992_v38, 113 }
  0x8e   :  { %5478 = vst [vmem:[#allocation74_spill] sm:$0xff] %v4419_v9  ;;  %v4424_v7 = vsel %vm5479_vm13, 1.0, %v5444_v15  ;;  %vm5482_vm5 = vmmov %vm5481_vm0  ;;  %v4455_v9 = vsel %vm4378_vm9, 1.0, %v5444_v15  ;;  %vm789_vm9 = vcmp.lt.s32.totalorder %v3992_v38, 127 }
  0x8f   :  { %5480 = vst [vmem:[#allocation75_spill] sm:$0xff] %v4424_v7  ;;  %vm5486_vm1 = vmmov %vm5475_vm8 }
  0x90   :  { %vm5487_vm7 = vmmov %vm5481_vm0  ;;  %5488 = vst [vmem:[#allocation78_spill] sm:$0xff] %v4455_v9 }
  0x91   :  { %vm5492_vm13 = vmmov %vm5483_vm10 }
  0xa3   :  { %v4085_v43 = vpop.permute.xlu1 %579  ;;  %v4089_v45 = vpop.permute.xlu0 %575 }
  0xa7   :  { %v4087_v44 = vpop.permute.xlu1 %581  ;;  %v4093_v18 = vpop.permute.xlu0 %577 }
  0xa8   :  { %v587_v16 = vsel %vm5475_vm8, %v4087_v44, %v4089_v45  ;;  %v586_v46 = vsel %vm5476_vm14, %v4089_v45, %v4093_v18  ;;  %v584_v7 = vsel %vm5486_vm1, %v4085_v43, %v4087_v44  ;;  %vm5490_vm8 = vmmov %vm5486_vm1 }
  0xa9   :  { %v588_v3 = vmul.f32 %v4241_v17, %v587_v16  ;;  %v585_v44 = vsel %vm5490_vm8, %v4093_v18, %v4085_v43  ;;  %v589_v37 = vmul.f32 %v4289_v40, %v586_v46  ;;  %vm5491_vm14 = vmmov %vm5481_vm0 }
  0xab   :  { %v4091_v47 = vpop.permute.xlu1 %622 }
  0xaf   :  { %v4095_v30 = vpop.permute.xlu1 %624 }
  0xb0   :  { %v633_v34 = vsel %vm5481_vm0, %v4091_v47, %v4095_v30  ;;  %vm4560_vm0 = vmand %vm5492_vm13, %vm5468_vm12 }
  0xb1   :  { %v636_v56 = vmul.f32 %v4266_v42, %v633_v34 }
  0xb3   :  { %v4100_v20 = vpop.permute.xlu1 %628 }
  0xb4   :  { %v4097_v19 = vpop.permute.xlu0 %595 }
  0xb7   :  { %v4109_v61 = vpop.permute.xlu1 %670 }
  0xb8   :  { %v4102_v48 = vpop.permute.xlu0 %626 }
  0xb9   :  { %v632_v45 = vsel %vm5482_vm5, %v4095_v30, %v4102_v48  ;;  %v631_v30 = vsel %vm5487_vm7, %v4102_v48, %v4100_v20  ;;  %v634_v48 = vsel %vm5491_vm14, %v4100_v20, %v4091_v47  ;;  %v591_v20 = vmul.f32 %v4261_v53, %v584_v7  ;;  %vm490_vm5 = vmand %vm410_vm4, %vm4202_vm2 }
  0xba   :  { %v637_v16 = vmul.f32 %v4271_v39, %v632_v45  ;;  %v638_v47 = vmul.f32 %v4276_v32, %v631_v30  ;;  %v590_v45 = vmul.f32 %v4294_v33, %v585_v44  ;;  %v635_v17 = vmul.f32 %v4247_v14, %v634_v48 }
  0xbb   :  { %v4132_v57 = vpop.permute.xlu1 %674  ;;  %v605_v30 = vrot.slane %v589_v37, %v3894_v23  ;;  %vm933_vm2 = vcmp.lt.s32.totalorder %v3992_v38, 111 }
  0xbc   :  { %v4107_v50 = vpop.permute.xlu0 %643  ;;  %v661_v37 = vrot.slane %v638_v47, %v3894_v23 }
  0xc0   :  { %v4116_v58 = vpop.permute.xlu0 %672 }
  0xc1   :  { %v681_v18 = vsel %vm678_vm6, %v4109_v61, %v4116_v58 }
  0xc2   :  { %v684_v44 = vmul.f32 %v4299_v35, %v681_v18  ;;  %v649_v35 = vrot.slane %v635_v17, %v3894_v23 }
  0xc4   :  { %v4134_v51 = vpop.permute.xlu0 %676 }
  0xc5   :  { %v682_v43 = vsel %vm678_vm6, %v4134_v51, %v4109_v61  ;;  %v679_v34 = vsel %vm678_vm6, %v4132_v57, %v4134_v51  ;;  %v680_v61 = vsel %vm678_vm6, %v4116_v58, %v4132_v57  ;;  %v601_v51 = vrot.slane %v588_v3, %v3894_v23 }
  0xc6   :  { %v683_v48 = vmul.f32 %v4322_v5, %v682_v43  ;;  %v653_v58 = vrot.slane %v636_v56, %v3894_v23  ;;  %v657_v57 = vrot.slane %v637_v16, %v3894_v23  ;;  %v613_v3 = vrot.slane %v591_v20, %v3894_v23 }
  0xc7   :  { %v685_v18 = vmul.f32 %v4317_v60, %v680_v61  ;;  %v609_v5 = vrot.slane %v590_v45, %v3894_v23  ;;  %v615_v56 = vmul.f32 %v605_v30, %v4097_v19  ;;  %v662_v61 = vmul.f32 %v649_v35, %v4107_v50 }
  0xc8   :  { %v4178_v4 = vpop.permute.xlu1 %691  ;;  %v4180_v11 = vpop.permute.xlu0 %718  ;;  %v663_v16 = vmul.f32 %v653_v58, %v4107_v50 }
  0xc9   :  { %v616_v35 = vmul.f32 %v609_v5, %v4097_v19 }
  0xcc   :  { %v4223_v63 = vpop.permute.xlu1 %720  ;;  %v4225_v10 = vpop.permute.xlu0 %722 }
  0xcd   :  { %v729_v46 = vsel %vm726_vm15, %v4180_v11, %v4223_v63  ;;  %v728_v7 = vsel %vm726_vm15, %v4223_v63, %v4225_v10  ;;  %v686_v63 = vmul.f32 %v4327_v25, %v679_v34  ;;  %v701_v34 = vrot.slane %v684_v44, %v3894_v23 }
  0xce   :  { %v732_v14 = vmul.f32 %v4332_v49, %v729_v46  ;;  %v733_v43 = vmul.f32 %v4342_v8, %v728_v7  ;;  %v697_v46 = vrot.slane %v683_v48, %v3894_v23  ;;  %v664_v7 = vmul.f32 %v657_v57, %v4107_v50 }
  0xcf   :  { %v709_v30 = vrot.slane %v686_v63, %v3894_v23  ;;  %v665_v48 = vmul.f32 %v661_v37, %v4107_v50  ;;  %v711_v58 = vmul.f32 %v701_v34, %v4178_v4  ;;  %v617_v50 = vmul.f32 %v613_v3, %v4097_v19 }
  0xd0   :  { %v4302_v41 = vpop.permute.xlu1 %724  ;;  %v4304_v36 = vpop.permute.xlu0 %739  ;;  %v749_v44 = vrot.slane %v732_v14, %v3894_v23  ;;  %v667_v14 = vadd.f32 %v663_v16, %v615_v56  ;;  %v710_v37 = vmul.f32 %v697_v46, %v4178_v4 }
  0xd1   :  { %v727_v20 = vsel %vm726_vm15, %v4225_v10, %v4302_v41  ;;  %v730_v47 = vsel %vm726_vm15, %v4302_v41, %v4180_v11  ;;  %v705_v10 = vrot.slane %v685_v18, %v3894_v23  ;;  %v753_v11 = vrot.slane %v733_v43, %v3894_v23 }
  0xd2   :  { %v614_v41 = vmul.f32 %v601_v51, %v4097_v19  ;;  %v731_v57 = vmul.f32 %v4347_v12, %v730_v47  ;;  %v734_v63 = vmul.f32 %v4352_v52, %v727_v20  ;;  %v668_v20 = vadd.f32 %v664_v7, %v616_v35 }
  0xd3   :  { %v712_v18 = vmul.f32 %v705_v10, %v4178_v4  ;;  %v713_v47 = vmul.f32 %v709_v30, %v4178_v4  ;;  %v759_v19 = vmul.f32 %v749_v44, %v4304_v36  ;;  %v669_v3 = vadd.f32 %v665_v48, %v617_v50 }
  0xd4   :  { %v4382_v21 = vpop.permute.xlu1 %770  ;;  %v4384_v22 = vpop.permute.xlu0 %781  ;;  %v666_v51 = vadd.f32 %v662_v61, %v614_v41  ;;  %v715_v56 = vadd.f32 %v711_v58, %v667_v14  ;;  %v760_v2 = vmul.f32 %v753_v11, %v4304_v36  ;;  %v745_v16 = vrot.slane %v731_v57, %v3894_v23 }
  0xd5   :  { %v757_v4 = vrot.slane %v734_v63, %v3894_v23  ;;  %v716_v61 = vadd.f32 %v712_v18, %v668_v20  ;;  %v4590_v44 = vsel %vm4560_vm0, 1.0, %v5444_v15  ;;  %v4593_v48 = vsel %vm490_vm5, 1.0, %v5444_v15 }
  0xd6   :  { %v714_v46 = vadd.f32 %v710_v37, %v666_v51  ;;  %5495 = vst [vmem:[#allocation80_spill] sm:$0xff] %v4590_v44  ;;  %5496 = vst [vmem:[#allocation81_spill] sm:$0xff] %v4593_v48  ;;  %v717_v10 = vadd.f32 %v713_v47, %v669_v3  ;;  %v774_v41 = vmul.f32 %v4382_v21, %v3909_v29 }
  0xd7   :  { %v764_v11 = vadd.f32 %v760_v2, %v716_v61  ;;  %v758_v63 = vmul.f32 %v745_v16, %v4304_v36  ;;  %v761_v50 = vmul.f32 %v757_v4, %v4304_v36  ;;  %v773_v14 = vmul.f32 %v4382_v21, %v3901_v27  ;;  %v5498_v4 = vld [vmem:[#allocation74_spill] sm:$0xff] }
  0xd8   :  { %v4470_v31 = vpop.permute.xlu1 %783  ;;  %v4472_v9 = vpop.permute.xlu0 %785 }
  0xd9   :  { %v792_v62 = vsel %vm789_vm9, %v4384_v22, %v4470_v31  ;;  %v791_v6 = vsel %vm789_vm9, %v4470_v31, %v4472_v9  ;;  %v763_v31 = vadd.f32 %v759_v19, %v715_v56  ;;  %v762_v19 = vadd.f32 %v758_v63, %v714_v46 }
  0xda   :  { %v794_v58 = vmul.f32 %v4357_v54, %v792_v62  ;;  %v795_v35 = vmul.f32 %v4362_v59, %v791_v6  ;;  %v765_v3 = vadd.f32 %v761_v50, %v717_v10  ;;  %v5497_v62 = vld [vmem:[#allocation73_spill] sm:$0xff] }
  0xdb   :  { %v5502_v50 = vld [vmem:[#allocation77_spill] sm:$0xff] }
  0xdc   :  { %v4509_v53 = vpop.permute.xlu1 %787  ;;  %v4511_v32 = vpop.permute.xlu0 %802  ;;  %v808_v51 = vrot.slane %v794_v58, %v3894_v23  ;;  %v812_v20 = vrot.slane %v795_v35, %v3894_v23 }
  0xdd   :  { %v790_v1 = vsel %vm789_vm9, %v4472_v9, %v4509_v53  ;;  %v793_v9 = vsel %vm789_vm9, %v4509_v53, %v4384_v22  ;;  %v775_v22 = vmul.f32 %v4382_v21, %v3898_v26  ;;  %v776_v53 = vmul.f32 %v4382_v21, %v3907_v28 }
  0xde   :  { %v796_v57 = vmul.f32 %v4367_v0, %v790_v1  ;;  %v797_v29 = vmul.f32 %v4372_v55, %v793_v9  ;;  %v778_v21 = vadd.f32 %v774_v41, %v763_v31  ;;  %v5499_v1 = vld [vmem:[#allocation75_spill] sm:$0xff]  ;;  %v821_v9 = vmul.f32 %v808_v51, %v4511_v32  ;;  %v5500_v41 = vld [vmem:[#allocation72_spill] sm:$0xff] }
  0xdf   :  { %v822_v10 = vmul.f32 %v812_v20, %v4511_v32 }
  0xe0   :  { %v4535_v45 = vpop.permute.xlu1 %829  ;;  %v4537_v17 = vpop.permute.xlu0 %831  ;;  %v816_v47 = vrot.slane %v796_v57, %v3894_v23  ;;  %v820_v2 = vrot.slane %v797_v29, %v3894_v23  ;;  %v5501_v57 = vld [vmem:[#allocation76_spill] sm:$0xff] }
  0xe2   :  { %v823_v35 = vmul.f32 %v816_v47, %v4511_v32  ;;  %v780_v47 = vadd.f32 %v776_v53, %v765_v3 }
  0xe4   :  { %v834_v43 = vpop.permute.xlu1 %833  ;;  %v836_v34 = vpop.permute.xlu0 %835 }
  0xe5   :  { %v839_v37 = vsel %vm837_vm3, %v4537_v17, %v834_v43  ;;  %v838_v18 = vsel %vm837_vm3, %v834_v43, %v836_v34  ;;  %v841_v26 = vsel %vm837_vm3, %v836_v34, %v4535_v45  ;;  %v840_v43 = vsel %vm837_vm3, %v4535_v45, %v4537_v17 }
  0xe6   :  { %v843_v34 = vmul.f32 %v4394_v24, %v839_v37  ;;  %v844_v56 = vmul.f32 %v4399_v13, %v838_v18  ;;  %v845_v16 = vmul.f32 %v5497_v62, %v841_v26  ;;  %v842_v45 = vmul.f32 %v5500_v41, %v840_v43 }
  0xe7   :  { %v777_v37 = vadd.f32 %v773_v14, %v762_v19  ;;  %v779_v18 = vadd.f32 %v775_v22, %v764_v11  ;;  %v824_v26 = vmul.f32 %v820_v2, %v4511_v32  ;;  %v826_v19 = vadd.f32 %v822_v10, %v778_v21 }
  0xe8   :  { %v4585_v7 = vpop.permute.xlu1 %850  ;;  %v878_v30 = vpop.permute.xlu0 %877  ;;  %v864_v51 = vrot.slane %v844_v56, %v3894_v23  ;;  %v856_v43 = vrot.slane %v842_v45, %v3894_v23 }
  0xe9   :  { %v825_v22 = vadd.f32 %v821_v9, %v777_v37  ;;  %v828_v3 = vadd.f32 %v824_v26, %v780_v47 }
  0xea   :  { %v869_v56 = vmul.f32 %v856_v43, %v4585_v7 }
  0xec   :  { %v880_v5 = vpop.permute.xlu1 %879  ;;  %v882_v36 = vpop.permute.xlu0 %881 }
  0xed   :  { %v888_v27 = vsel %vm885_vm11, %v878_v30, %v880_v5  ;;  %v887_v28 = vsel %vm885_vm11, %v880_v5, %v882_v36  ;;  %v860_v5 = vrot.slane %v843_v34, %v3894_v23  ;;  %v827_v34 = vadd.f32 %v823_v35, %v779_v18 }
  0xee   :  { %v890_v6 = vmul.f32 %v5498_v4, %v888_v27  ;;  %v891_v61 = vmul.f32 %v5499_v1, %v887_v28 }
  0xef   :  { %v870_v2 = vmul.f32 %v860_v5, %v4585_v7  ;;  %v873_v5 = vadd.f32 %v869_v56, %v825_v22 }
  0xf0   :  { %v884_v31 = vpop.permute.xlu1 %883  ;;  %v899_v58 = vpop.permute.xlu0 %898  ;;  %v908_v27 = vrot.slane %v891_v61, %v3894_v23 }
  0xf1   :  { %v886_v17 = vsel %vm885_vm11, %v882_v36, %v884_v31  ;;  %v889_v46 = vsel %vm885_vm11, %v884_v31, %v878_v30  ;;  %v868_v36 = vrot.slane %v845_v16, %v3894_v23  ;;  %v904_v30 = vrot.slane %v890_v6, %v3894_v23  ;;  %v5503_v6 = vld [vmem:[#allocation78_spill] sm:$0xff] }
  0xf2   :  { %v892_v63 = vmul.f32 %v5501_v57, %v886_v17  ;;  %v893_v29 = vmul.f32 %v5502_v50, %v889_v46  ;;  %v871_v16 = vmul.f32 %v864_v51, %v4585_v7  ;;  %v918_v45 = vmul.f32 %v908_v27, %v899_v58 }
  0xf3   :  { %v872_v61 = vmul.f32 %v868_v36, %v4585_v7  ;;  %v917_v31 = vmul.f32 %v904_v30, %v899_v58  ;;  %v874_v51 = vadd.f32 %v870_v2, %v826_v19 }
  0xf4   :  { %v926_v28 = vpop.permute.xlu1 %925  ;;  %v928_v20 = vpop.permute.xlu0 %927  ;;  %v912_v14 = vrot.slane %v892_v63, %v3894_v23  ;;  %v916_v32 = vrot.slane %v893_v29, %v3894_v23  ;;  %v5504_v29 = vld [vmem:[#allocation79_spill] sm:$0xff]  ;;  %v875_v26 = vadd.f32 %v871_v16, %v827_v34 }
  0xf5   :  { %v936_v11 = vsel %vm933_vm2, %v926_v28, %v928_v20  ;;  %v876_v30 = vadd.f32 %v872_v61, %v828_v3  ;;  %v921_v43 = vadd.f32 %v917_v31, %v873_v5 }
  0xf6   :  { %v938_v53 = vmul.f32 %v5503_v6, %v936_v11  ;;  %v919_v9 = vmul.f32 %v912_v14, %v899_v58  ;;  %v920_v63 = vmul.f32 %v916_v32, %v899_v58  ;;  %v922_v14 = vadd.f32 %v918_v45, %v874_v51 }
  0xf8   :  { %v930_v17 = vpop.permute.xlu1 %929  ;;  %v932_v46 = vpop.permute.xlu0 %931  ;;  %v952_v36 = vrot.slane %v938_v53, %v3894_v23  ;;  %v923_v11 = vadd.f32 %v919_v9, %v875_v26  ;;  %v924_v22 = vadd.f32 %v920_v63, %v876_v30 }
  0xf9   :  { %v935_v21 = vsel %vm933_vm2, %v928_v20, %v930_v17  ;;  %v934_v10 = vsel %vm933_vm2, %v930_v17, %v932_v46  ;;  %v937_v35 = vsel %vm933_vm2, %v932_v46, %v926_v28 }
  0xfa   :  { %v939_v37 = vmul.f32 %v5504_v29, %v935_v21  ;;  %v940_v18 = vmul.f32 %v4590_v44, %v934_v10  ;;  %v941_v7 = vmul.f32 %v4593_v48, %v937_v35 }
  0xfc   :  { %v956_v27 = vrot.slane %v939_v37, %v3894_v23  ;;  %v960_v20 = vrot.slane %v940_v18, %v3894_v23  ;;  %v964_v47 = vrot.slane %v941_v7, %v3894_v23  ;;  %v947_v28 = vpop.permute.xlu1 %946  ;;  %v977_v34 = vpop.permute.xlu0 %976 }
  0xfd   :  { %v965_v58 = vmul.f32 %v952_v36, %v947_v28 }
  0xfe   :  { %v966_v32 = vmul.f32 %v956_v27, %v947_v28  ;;  %v967_v17 = vmul.f32 %v960_v20, %v947_v28  ;;  %v968_v46 = vmul.f32 %v964_v47, %v947_v28 }
  0xff   :  { %v969_v19 = vadd.f32 %v965_v58, %v921_v43 }
 0x100   :  { %v970_v56 = vadd.f32 %v966_v32, %v922_v14  ;;  %v971_v2 = vadd.f32 %v967_v17, %v923_v11  ;;  %v972_v16 = vadd.f32 %v968_v46, %v924_v22 }
 0x101   :  { %v4678_v53 = vadd.f32 %v977_v34, %v969_v19 }
 0x102   :  { %v4680_v3 = vadd.f32 %v977_v34, %v970_v56  ;;  %v4682_v61 = vadd.f32 %v977_v34, %v971_v2  ;;  %v4684_v21 = vadd.f32 %v977_v34, %v972_v16 }
 0x103   :  { %v983_v31 = vmax.f32 %v4678_v53, 0.0 }
 0x104   :  { %v984_v45 = vmax.f32 %v4680_v3, 0.0  ;;  %v985_v9 = vmax.f32 %v4682_v61, 0.0  ;;  %v986_v10 = vmax.f32 %v4684_v21, 0.0 }
 0x106   :  { %v3351_v35 = vpack.i.bf16 %v984_v45, %v983_v31 }
 0x107   :  { %3442 = dma.done.wait [#allocation6], 4096 }
 0x108   :  { %3443 = vsyncadd [#allocation6], 4294963200  ;;  %v5505_v63 = vmov 0   ;;  %3352 = vrot.lane.b32.xlu1 %v3351_v35, %s3457_s30  ;;  %3342 = vrot.lane.b32.xlu0 %v3351_v35, %s3455_s26  ;;  %v3356_v37 = vpack.i.bf16 %v986_v10, %v985_v9  ;;  %v3373_v18 = vld [vmem:[#allocation2 + $0x78] sm:$0xff]   ;;  %v3377_v26 = vld [vmem:[#allocation2 + $0x70] sm:$0xff]   ;;  %s3460_s21 = smov 120  }
 0x109   :  { %3372 = vset.pattern.permute.xlu1 %v5505_v63  ;;  %3371 = vset.pattern.permute.xlu0 %v5505_v63  ;;  %v3374_v7 = vld [vmem:[#allocation2 + $0xf8] sm:$0xff]   ;;  %v3378_v36 = vld [vmem:[#allocation2 + $0xf0] sm:$0xff]   ;;  %v3381_v20 = vld [vmem:[#allocation2 + $0x68] sm:$0xff]   ;;  %s3461_s14 = smov 119   ;;  %s3462_s27 = smov 121   ;;  %vm1417_vm4 = vcmask 588800  }
 0x10a   :  { %3126 = vmatprep.subr.bf16.mxu0 %v3373_v18  ;;  %v3375_v5 = vld [vmem:[#allocation2 + $0x38] sm:$0xff]   ;;  %3148 = vmatprep.subr.bf16.mxu1 %v3374_v7  ;;  %v3379_v30 = vld [vmem:[#allocation2 + $0x30] sm:$0xff]   ;;  %v3382_v47 = vld [vmem:[#allocation2 + $0xe8] sm:$0xff]   ;;  %s5506_s17 = sld [smem:[#allocation85_spill]]  ;;  %s3463_s20 = smov 7  }
 0x10b   :  { %v3376_v51 = vld [vmem:[#allocation2 + $0xb8] sm:$0xff]   ;;  %3127 = vmatpush3.bf16.msra.mxu0 %v3375_v5  ;;  %v3380_v27 = vld [vmem:[#allocation2 + $0xb0] sm:$0xff]   ;;  %v3383_v28 = vld [vmem:[#allocation2 + $0x28] sm:$0xff]   ;;  %s3464_s16 = smov 9   ;;  %s3465_s15 = smov 8  }
 0x10c   :  { %3357 = vrot.lane.b32.xlu1 %v3356_v37, %s3457_s30  ;;  %3347 = vrot.lane.b32.xlu0 %v3356_v37, %s3455_s26  ;;  %v3384_v58 = vld [vmem:[#allocation2 + $0xa8] sm:$0xff]   ;;  %v3385_v43 = vld [vmem:[#allocation2 + $0x60] sm:$0xff]   ;;  %v3389_v17 = vld [vmem:[#allocation2 + $0x58] sm:$0xff]  }
 0x10d   :  { %3149 = vmatpush3.bf16.msra.mxu1 %v3376_v51  ;;  %3128 = vmatprep.subr.bf16.mxu0 %v3377_v26  ;;  %v3386_v14 = vld [vmem:[#allocation2 + $0xe0] sm:$0xff]   ;;  %v3390_v46 = vld [vmem:[#allocation2 + $0xd8] sm:$0xff]   ;;  %v3393_v34 = vld [vmem:[#allocation2 + $0x50] sm:$0xff]  }
 0x10e   :  { %3150 = vmatprep.subr.bf16.mxu1 %v3378_v36  ;;  %v3387_v11 = vld [vmem:[#allocation2 + $0x20] sm:$0xff]   ;;  %v3391_v22 = vld [vmem:[#allocation2 + $0x18] sm:$0xff]   ;;  %v3394_v56 = vld [vmem:[#allocation2 + $0xd0] sm:$0xff]  }
 0x10f   :  { %3129 = vmatpush3.bf16.msra.mxu0 %v3379_v30  ;;  %v3388_v32 = vld [vmem:[#allocation2 + $0xa0] sm:$0xff]   ;;  %v3392_v19 = vld [vmem:[#allocation2 + $0x98] sm:$0xff]   ;;  %v3395_v2 = vld [vmem:[#allocation2 + $0x10] sm:$0xff]  }
 0x110   :  { %3367 = vrot.lane.b32.xlu1 %v3356_v37, %s5346_s22  ;;  %3362 = vrot.lane.b32.xlu0 %v3351_v35, %s5346_s22  ;;  %v3396_v16 = vld [vmem:[#allocation2 + $0x90] sm:$0xff]   ;;  %v3397_v35 = vld [vmem:[#allocation2 + $0x48] sm:$0xff]   ;;  %v3401_v5 = vld [vmem:[#allocation2 + $0x40] sm:$0xff]  }
 0x111   :  { %3151 = vmatpush3.bf16.msra.mxu1 %v3380_v27  ;;  %3130 = vmatprep.subr.bf16.mxu0 %v3381_v20  ;;  %v3398_v37 = vld [vmem:[#allocation2 + $0xc8] sm:$0xff]   ;;  %v3402_v51 = vld [vmem:[#allocation2 + $0xc0] sm:$0xff]  }
 0x112   :  { %3152 = vmatprep.subr.bf16.mxu1 %v3382_v47  ;;  %v3399_v18 = vld [vmem:[#allocation2 + $0x8] sm:$0xff]   ;;  %v3403_v26 = vld [vmem:[#allocation2] sm:$0xff]  }
 0x113   :  { %3131 = vmatpush3.bf16.msra.mxu0 %v3383_v28  ;;  %v3400_v7 = vld [vmem:[#allocation2 + $0x88] sm:$0xff]   ;;  %v3404_v36 = vld [vmem:[#allocation2 + $0x80] sm:$0xff]  }
 0x114   :  { %3132 = vmatprep.subr.bf16.mxu0 %v3385_v43 }
 0x115   :  { %3153 = vmatpush3.bf16.msra.mxu1 %v3384_v58 }
 0x116   :  { %3154 = vmatprep.subr.bf16.mxu1 %v3386_v14 }
 0x117   :  { %3133 = vmatpush3.bf16.msra.mxu0 %v3387_v11 }
 0x118   :  { %3134 = vmatprep.subr.bf16.mxu0 %v3389_v17 }
 0x119   :  { %3155 = vmatpush3.bf16.msra.mxu1 %v3388_v32 }
 0x11a   :  { %3156 = vmatprep.subr.bf16.mxu1 %v3390_v46 }
 0x11b   :  { %3135 = vmatpush3.bf16.msra.mxu0 %v3391_v22 }
 0x11c   :  { %3136 = vmatprep.subr.bf16.mxu0 %v3393_v34 }
 0x11d   :  { %3157 = vmatpush3.bf16.msra.mxu1 %v3392_v19 }
 0x11e   :  { %3158 = vmatprep.subr.bf16.mxu1 %v3394_v56 }
 0x11f   :  { %3137 = vmatpush3.bf16.msra.mxu0 %v3395_v2 }
 0x120   :  { %3138 = vmatprep.subr.bf16.mxu0 %v3397_v35 }
 0x121   :  { %3159 = vmatpush3.bf16.msra.mxu1 %v3396_v16 }
 0x122   :  { %3160 = vmatprep.subr.bf16.mxu1 %v3398_v37 }
 0x123   :  { %3139 = vmatpush3.bf16.msra.mxu0 %v3399_v18 }
 0x124   :  { %3140 = vmatprep.subr.bf16.mxu0 %v3401_v5 }
 0x125   :  { %3161 = vmatpush3.bf16.msra.mxu1 %v3400_v7 }
 0x126   :  { %3162 = vmatprep.subr.bf16.mxu1 %v3402_v51 }
 0x127   :  { %3141 = vmatpush3.bf16.msra.mxu0 %v3403_v26 }
 0x129   :  { %3163 = vmatpush3.bf16.msra.mxu1 %v3404_v36 }
 0x17a   :  { %v3353_v30 = vpop.permute.xlu1 %3352  ;;  %v3343_v27 = vpop.permute.xlu0 %3342 }
 0x17b   :  { %v3345_v20 = vunpack.i.h.bf16 %v3343_v27  ;;  %v3344_v47 = vunpack.i.l.bf16 %v3343_v27  ;;  %v3355_v28 = vunpack.i.h.bf16 %v3353_v30  ;;  %v3354_v58 = vunpack.i.l.bf16 %v3353_v30 }
 0x17d   :  { %v1001_v43 = vsel %vm789_vm9, %v3344_v47, %v3345_v20  ;;  %v1017_v19 = vsel %vm885_vm11, %v3354_v58, %v3355_v28 }
 0x17e   :  { %v3358_v14 = vpop.permute.xlu1 %3357  ;;  %v3348_v11 = vpop.permute.xlu0 %3347  ;;  %v1003_v2 = vmax.f32 %v983_v31, %v1001_v43 }
 0x17f   :  { %v3360_v32 = vunpack.i.h.bf16 %v3358_v14  ;;  %v3359_v17 = vunpack.i.l.bf16 %v3358_v14  ;;  %v3350_v46 = vunpack.i.h.bf16 %v3348_v11  ;;  %v3349_v22 = vunpack.i.l.bf16 %v3348_v11 }
 0x181   :  { %v999_v34 = vsel %vm789_vm9, %v3349_v22, %v3350_v46  ;;  %v1000_v56 = vsel %vm789_vm9, %v3345_v20, %v3349_v22  ;;  %v1015_v16 = vsel %vm885_vm11, %v3359_v17, %v3360_v32  ;;  %v1016_v18 = vsel %vm885_vm11, %v3355_v28, %v3359_v17 }
 0x182   :  { %v3368_v35 = vpop.permute.xlu1 %3367  ;;  %v3363_v37 = vpop.permute.xlu0 %3362  ;;  %v1002_v7 = vsel %vm789_vm9, %v3350_v46, %v3344_v47  ;;  %v1005_v30 = vmax.f32 %v985_v9, %v999_v34  ;;  %v1004_v53 = vmax.f32 %v984_v45, %v1000_v56  ;;  %v1018_v27 = vsel %vm885_vm11, %v3360_v32, %v3354_v58 }
 0x183   :  { %v3370_v5 = vunpack.i.h.bf16 %v3368_v35  ;;  %v3369_v51 = vunpack.i.l.bf16 %v3368_v35  ;;  %v3365_v26 = vunpack.i.h.bf16 %v3363_v37  ;;  %v3364_v36 = vunpack.i.l.bf16 %v3363_v37 }
 0x184   :  { %v1006_v31 = vmax.f32 %v986_v10, %v1002_v7 }
 0x185   :  { %v1027_v20 = vsel %vm933_vm2, %v3369_v51, %v3370_v5  ;;  %v1029_v47 = vsel %vm933_vm2, %v3364_v36, %v3365_v26  ;;  %v1028_v28 = vsel %vm933_vm2, %v3365_v26, %v3369_v51  ;;  %v1030_v61 = vsel %vm933_vm2, %v3370_v5, %v3364_v36  ;;  %v1403_v51 = vld [vmem:[%s5506_s17] sm:$0xff]  ;;  %v1406_v26 = vld [vmem:[%s5246_s4 + $0x8] sm:$0xff] }
 0x186   :  { %v1033_v3 = vmax.f32 %v1015_v16, %v1027_v20  ;;  %v1031_v45 = vmax.f32 %v1017_v19, %v1029_v47  ;;  %v1032_v9 = vmax.f32 %v1016_v18, %v1028_v28  ;;  %v1034_v21 = vmax.f32 %v1018_v27, %v1030_v61  ;;  %v1405_v36 = vld [vmem:[%s5246_s4] sm:$0xff] }
 0x187   :  { %v5508_v20 = vld [vmem:[#allocation53_spill] sm:$0xff] }
 0x188   :  { %v1036_v10 = vmax.f32 %v1004_v53, %v1032_v9  ;;  %v1038_v43 = vmax.f32 %v1006_v31, %v1034_v21  ;;  %v1035_v14 = vmax.f32 %v1003_v2, %v1031_v45  ;;  %v1037_v58 = vmax.f32 %v1005_v30, %v1033_v3  ;;  %v5507_v31 = vld [vmem:[#allocation61_spill] sm:$0xff]  ;;  %v5509_v3 = vld [vmem:[#allocation58_spill] sm:$0xff]  ;;  %v5510_v9 = vld [vmem:[#allocation52_spill] sm:$0xff] }
 0x18a   :  { %v1040_v11 = vpack.c.bf16 %v1036_v10, %v1036_v10  ;;  %v1042_v32 = vpack.c.bf16 %v1038_v43, %v1038_v43  ;;  %v1039_v17 = vpack.c.bf16 %v1035_v14, %v1035_v14  ;;  %v1041_v46 = vpack.c.bf16 %v1037_v58, %v1037_v58  ;;  %v5511_v14 = vld [vmem:[#allocation51_spill] sm:$0xff] }
 0x18c   :  { %1331 = vmatprep.mubr.bf16.mxu0 %v1040_v11  ;;  %1371 = vmatprep.mubr.bf16.mxu1 %v1042_v32  ;;  %v5512_v32 = vld [vmem:[#allocation55_spill] sm:$0xff] }
 0x18d   :  { %1332 = vmatmul.mubr.bf16.vlgmr.msra.gmra.mxu0 %v1039_v17  ;;  %1372 = vmatmul.mubr.bf16.vlgmr.msra.gmra.mxu1 %v1041_v46 }
 0x18e   :  { %3236 = vmatprep.mubr.msk.f32.mxu0 %vm1417_vm4, %v1403_v51 }
 0x24d   :  { %v3142_v22 = vpop.f32.mrf.mxu0  ;;  %v3164_v34 = vpop.f32.mrf.mxu1 }
 0x24f   :  { %v3143_v56 = vpop.f32.mrf.mxu0  ;;  %v3165_v35 = vpop.f32.mrf.mxu1 }
 0x250   :  { %v3144_v16 = vadd.f32 %v3143_v56, %v3142_v22  ;;  %v3166_v19 = vadd.f32 %v3165_v35, %v3164_v34  ;;  %v5513_v22 = vld [vmem:[#allocation50_spill] sm:$0xff] }
 0x251   :  { %v3145_v37 = vpop.f32.mrf.mxu0  ;;  %v3167_v18 = vpop.f32.mrf.mxu1  ;;  %v5514_v56 = vld [vmem:[#allocation54_spill] sm:$0xff] }
 0x252   :  { %v1374_v7 = vadd.f32 %v3166_v19, %v3144_v16  ;;  %v1404_v16 = vld [vmem:[%s5506_s17 + $0x8] sm:$0xff] }
 0x253   :  { %v3146_v5 = vpop.f32.mrf.mxu0  ;;  %v3168_v2 = vpop.f32.mrf.mxu1 }
 0x254   :  { %1397 = vrot.lane.b32.xlu1 %v1374_v7, %s3460_s21  ;;  %1400 = vrot.lane.b32.xlu0 %v1374_v7, %s3461_s14 }
 0x258   :  { %1391 = vrot.lane.b32.xlu1 %v1374_v7, %s3455_s26  ;;  %1394 = vrot.lane.b32.xlu0 %v1374_v7, %s3462_s27 }
 0x25c   :  { %1385 = vrot.lane.b32.xlu1 %v1374_v7, %s3463_s20  ;;  %1388 = vrot.lane.b32.xlu0 %v1374_v7, %s3454_s24 }
 0x260   :  { %1379 = vrot.lane.b32.xlu1 %v1374_v7, %s3464_s16  ;;  %1382 = vrot.lane.b32.xlu0 %v1374_v7, %s3465_s15 }
 0x264   :  { %1414 = vperm.xlu1 %3372, %v1406_v26   ;;  %1409 = vperm.xlu0 %3371, %v1405_v36  }
 0x2c6   :  { %v1398_v30 = vpop.permute.xlu1 %1397  ;;  %v1401_v53 = vpop.permute.xlu0 %1400 }
 0x2c7   :  { %v1402_v27 = vmul.f32 %v5507_v31, %v1401_v53  ;;  %v1399_v47 = vmul.f32 %v5508_v20, %v1398_v30 }
 0x2c9   :  { %3218 = vmatprep.subr.mxu0 %v1402_v27 }
 0x2ca   :  { %v1392_v28 = vpop.permute.xlu1 %1391  ;;  %3219 = vmatpush3.msra.mxu0 %v1402_v27  ;;  %v1395_v61 = vpop.permute.xlu0 %1394 }
 0x2cb   :  { %v1396_v45 = vmul.f32 %v5509_v3, %v1395_v61  ;;  %3220 = vmatprep.subr.mxu0 %v1399_v47  ;;  %v1393_v21 = vmul.f32 %v5510_v9, %v1392_v28 }
 0x2cc   :  { %3221 = vmatpush3.msra.mxu0 %v1399_v47 }
 0x2cd   :  { %3222 = vmatprep.subr.mxu0 %v1396_v45 }
 0x2ce   :  { %v1386_v10 = vpop.permute.xlu1 %1385  ;;  %3223 = vmatpush3.msra.mxu0 %v1396_v45  ;;  %v1389_v43 = vpop.permute.xlu0 %1388 }
 0x2cf   :  { %3224 = vmatprep.subr.mxu0 %v1393_v21  ;;  %v1390_v58 = vmul.f32 %v5511_v14, %v1389_v43  ;;  %v1387_v17 = vmul.f32 %v5512_v32, %v1386_v10 }
 0x2d0   :  { %3225 = vmatpush3.msra.mxu0 %v1393_v21 }
 0x2d1   :  { %3226 = vmatprep.subr.mxu0 %v1374_v7 }
 0x2d2   :  { %3227 = vmatpush3.msra.mxu0 %v1374_v7  ;;  %v1383_v11 = vpop.permute.xlu0 %1382  ;;  %v1380_v46 = vpop.permute.xlu1 %1379 }
 0x2d3   :  { %3228 = vmatprep.subr.mxu0 %v1390_v58  ;;  %v1384_v34 = vmul.f32 %v5513_v22, %v1383_v11  ;;  %v1381_v35 = vmul.f32 %v5514_v56, %v1380_v46 }
 0x2d4   :  { %3229 = vmatpush3.msra.mxu0 %v1390_v58 }
 0x2d5   :  { %3230 = vmatprep.subr.mxu0 %v1387_v17 }
 0x2d6   :  { %3231 = vmatpush3.msra.mxu0 %v1387_v17 }
 0x2d7   :  { %3232 = vmatprep.subr.mxu0 %v1384_v34 }
 0x2d8   :  { %3233 = vmatpush3.msra.mxu0 %v1384_v34 }
 0x2d9   :  { %3234 = vmatprep.subr.mxu0 %v1381_v35 }
 0x2da   :  { %3235 = vmatpush3.msra.mxu0 %v1381_v35 }
 0x2db   :  { %3237 = vmatmul.mubr.msk.f32.vlgmr.msra.gmra.mxu0 %vm1417_vm4, %v1404_v16 }
 0x2df   :  { %v1415_v19 = vpop.permute.xlu1 %1414  ;;  %v1410_v18 = vpop.permute.xlu0 %1409 }
 0x39b   :  { %v3238_v37 = vpop.f32.mrf.mxu0 }
 0x39c   :  { %v1496_v7 = vadd.f32 %v3238_v37, %v1415_v19 }
 0x39d   :  { %v1490_v5 = vpop.f32.mrf.mxu0 }
 0x39e   :  { %v1500_v2 = vmax.f32 %v1496_v7, 0.0  ;;  %v1491_v51 = vadd.f32 %v1490_v5, %v1410_v18 }
 0x3a0   :  { %v1499_v26 = vmax.f32 %v1491_v51, 0.0 }
 0x3a2   :  { %v3405_v36 = vpack.i.bf16 %v1500_v2, %v1499_v26 }
 0x3a3   :  { %3444 = dma.done.wait [#allocation6 + $0x1], 1024 }
 0x3a4   :  { %3445 = vsyncadd [#allocation6 + $0x1], 4294966272  ;;  %3239 = vmatprep.subr.bf16.mxu1 %v5444_v15  ;;  %1700 = vmatprep.subr.mxu0 %v5444_v15  ;;  %vm3466_vm12 = vmmov 0   ;;  %v3422_v30 = vld [vmem:[#allocation3 + $0x38] sm:$0xff]   ;;  %v3423_v53 = vld [vmem:[#allocation3 + $0x30] sm:$0xff]   ;;  %s3467_s0 = smov 124  }
 0x3a5   :  { %3255 = vmatprep.mubr.msk.bf16.mxu1 %vm3466_vm12, %v5444_v15  ;;  %3420 = vset.pattern.permute.xlu1 %v5505_v63  ;;  %v3424_v27 = vld [vmem:[#allocation3 + $0x28] sm:$0xff]   ;;  %v3425_v47 = vld [vmem:[#allocation3 + $0x20] sm:$0xff]   ;;  %v3426_v28 = vld [vmem:[#allocation3 + $0x18] sm:$0xff]   ;;  %s3468_s17 = smov 125   ;;  %s3469_s23 = smov 3   ;;  %vm1693_vm10 = vcmask 130048  }
 0x3a6   :  { %3406 = vrot.lane.b32.xlu0 %v3405_v36, %s3455_s26  ;;  %3416 = vrot.lane.b32.xlu1 %v3405_v36, %s3461_s14  ;;  %v3427_v61 = vld [vmem:[#allocation3 + $0x10] sm:$0xff]   ;;  %v3428_v45 = vld [vmem:[#allocation3 + $0x8] sm:$0xff]   ;;  %v3429_v21 = vld [vmem:[#allocation3] sm:$0xff]   ;;  %s3470_s25 = smov 4   ;;  %s3471_s12 = smov 5  }
 0x3a7   :  { %3421 = vset.pattern.permute.xlu0 %v5505_v63  ;;  %3240 = vmatpush3.bf16.msra.mxu1 %v3422_v30  ;;  %s3472_s28 = smov 123  }
 0x3a8   :  { %3241 = vmatprep.subr.bf16.mxu1 %v5444_v15 }
 0x3aa   :  { %3411 = vrot.lane.b32.xlu0 %v3405_v36, %s3460_s21 }
 0x3ab   :  { %3242 = vmatpush3.bf16.msra.mxu1 %v3423_v53 }
 0x3ac   :  { %3243 = vmatprep.subr.bf16.mxu1 %v5444_v15 }
 0x3af   :  { %3244 = vmatpush3.bf16.msra.mxu1 %v3424_v27 }
 0x3b0   :  { %3245 = vmatprep.subr.bf16.mxu1 %v5444_v15 }
 0x3b3   :  { %3246 = vmatpush3.bf16.msra.mxu1 %v3425_v47 }
 0x3b4   :  { %3247 = vmatprep.subr.bf16.mxu1 %v5444_v15 }
 0x3b7   :  { %3248 = vmatpush3.bf16.msra.mxu1 %v3426_v28  ;;  %v1681_v28 = vld [vmem:[%s5248_s6] sm:$0xff] }
 0x3b8   :  { %3249 = vmatprep.subr.bf16.mxu1 %v5444_v15 }
 0x3bb   :  { %3250 = vmatpush3.bf16.msra.mxu1 %v3427_v61 }
 0x3bc   :  { %3251 = vmatprep.subr.bf16.mxu1 %v5444_v15 }
 0x3bf   :  { %3252 = vmatpush3.bf16.msra.mxu1 %v3428_v45 }
 0x3c0   :  { %3253 = vmatprep.subr.bf16.mxu1 %v5444_v15 }
 0x3c3   :  { %3254 = vmatpush3.bf16.msra.mxu1 %v3429_v21 }
 0x418   :  { %v3407_v10 = vpop.permute.xlu0 %3406  ;;  %v3417_v43 = vpop.permute.xlu1 %3416 }
 0x419   :  { %v3409_v58 = vunpack.i.h.bf16 %v3407_v10  ;;  %v3408_v11 = vunpack.i.l.bf16 %v3407_v10  ;;  %v3419_v17 = vunpack.i.h.bf16 %v3417_v43  ;;  %v3418_v46 = vunpack.i.l.bf16 %v3417_v43  ;;  %v5515_v10 = vld [vmem:[#allocation60_spill] sm:$0xff] }
 0x41b   :  { %v1510_v19 = vmax.f32 %v1500_v2, %v3409_v58  ;;  %v1509_v37 = vmax.f32 %v1499_v26, %v3408_v11  ;;  %v1678_v2 = vld [vmem:[%s5247_s5 + $0x8] sm:$0xff] }
 0x41c   :  { %v3412_v34 = vpop.permute.xlu0 %3411  ;;  %3066 = vmatprep.mubr.msk.f32.mxu0 %vm1693_vm10, %v1678_v2  ;;  %v1682_v26 = vld [vmem:[%s5248_s6 + $0x8] sm:$0xff] }
 0x41d   :  { %v3414_v35 = vunpack.i.h.bf16 %v3412_v34  ;;  %v3413_v16 = vunpack.i.l.bf16 %v3412_v34 }
 0x41f   :  { %v1520_v18 = vmax.f32 %v3414_v35, %v3419_v17  ;;  %v1519_v7 = vmax.f32 %v3413_v16, %v3418_v46  ;;  %v5516_v46 = vld [vmem:[#allocation64_spill] sm:$0xff] }
 0x421   :  { %v1521_v5 = vmax.f32 %v1509_v37, %v1519_v7  ;;  %v1522_v51 = vmax.f32 %v1510_v19, %v1520_v18  ;;  %v5517_v37 = vld [vmem:[#allocation59_spill] sm:$0xff] }
 0x423   :  { %v1523_v36 = vpack.c.bf16 %v1522_v51, %v1521_v5 }
 0x425   :  { %3256 = vmatmul.mubr.bf16.vlgmr.msra.gmra.mxu1 %v1523_v36 }
 0x4e5   :  { %v4784_v30 = vpop.f32.mrf.mxu1 }
 0x4e6   :  { %1665 = vrot.lane.b32.xlu0 %v4784_v30, %s3467_s0 }
 0x4e7   :  { %v3257_v53 = vpop.f32.mrf.mxu1 }
 0x4e8   :  { %v5518_v53 = vld [vmem:[#allocation57_spill] sm:$0xff] }
 0x4e9   :  { %v1625_v27 = vpop.f32.mrf.mxu1 }
 0x4ea   :  { %1659 = vrot.lane.b32.xlu0 %v4784_v30, %s3468_s17  ;;  %1667 = vrot.lane.b32.xlu1 %v1625_v27, %s3467_s0 }
 0x4eb   :  { %v3258_v47 = vpop.f32.mrf.mxu1 }
 0x4ee   :  { %1653 = vrot.lane.b32.xlu0 %v4784_v30, %s3455_s26  ;;  %1661 = vrot.lane.b32.xlu1 %v1625_v27, %s3468_s17 }
 0x4f2   :  { %1647 = vrot.lane.b32.xlu0 %v4784_v30, %s3454_s24  ;;  %1655 = vrot.lane.b32.xlu1 %v1625_v27, %s3455_s26 }
 0x4f6   :  { %1641 = vrot.lane.b32.xlu0 %v4784_v30, %s3469_s23  ;;  %1649 = vrot.lane.b32.xlu1 %v1625_v27, %s3454_s24 }
 0x4fa   :  { %1635 = vrot.lane.b32.xlu0 %v4784_v30, %s3470_s25  ;;  %1643 = vrot.lane.b32.xlu1 %v1625_v27, %s3469_s23 }
 0x4fe   :  { %1629 = vrot.lane.b32.xlu0 %v4784_v30, %s3471_s12  ;;  %1637 = vrot.lane.b32.xlu1 %v1625_v27, %s3470_s25 }
 0x502   :  { %1671 = vrot.lane.b32.xlu0 %v4784_v30, %s3472_s28  ;;  %1631 = vrot.lane.b32.xlu1 %v1625_v27, %s3471_s12 }
 0x506   :  { %1673 = vrot.lane.b32.xlu1 %v1625_v27, %s3472_s28  ;;  %1690 = vperm.xlu0 %3421, %v1682_v26  }
 0x50a   :  { %1685 = vperm.xlu1 %3420, %v1681_v28  }
 0x558   :  { %v1666_v61 = vpop.permute.xlu0 %1665 }
 0x559   :  { %v1669_v58 = vmul.f32 %v5515_v10, %v1666_v61  ;;  %v5519_v61 = vld [vmem:[#allocation63_spill] sm:$0xff] }
 0x55c   :  { %v1660_v45 = vpop.permute.xlu0 %1659  ;;  %v1668_v21 = vpop.permute.xlu1 %1667 }
 0x55d   :  { %v1670_v43 = vmul.f32 %v5515_v10, %v1668_v21  ;;  %v1663_v35 = vmul.f32 %v5516_v46, %v1660_v45  ;;  %v5520_v21 = vld [vmem:[#allocation56_spill] sm:$0xff] }
 0x55f   :  { %1701 = vmatpush1.msra.mxu0 %v1670_v43 }
 0x560   :  { %v1654_v11 = vpop.permute.xlu0 %1653  ;;  %1702 = vmatprep.subr.mxu0 %v5444_v15  ;;  %v1662_v17 = vpop.permute.xlu1 %1661 }
 0x561   :  { %v1664_v34 = vmul.f32 %v5516_v46, %v1662_v17  ;;  %1703 = vmatpush1.msra.mxu0 %v1669_v58  ;;  %v1657_v7 = vmul.f32 %v5517_v37, %v1654_v11  ;;  %v5521_v11 = vld [vmem:[#allocation62_spill] sm:$0xff] }
 0x562   :  { %1704 = vmatprep.subr.mxu0 %v5444_v15 }
 0x563   :  { %1705 = vmatpush1.msra.mxu0 %v1664_v34 }
 0x564   :  { %v1648_v16 = vpop.permute.xlu0 %1647  ;;  %1706 = vmatprep.subr.mxu0 %v5444_v15  ;;  %v1656_v19 = vpop.permute.xlu1 %1655 }
 0x565   :  { %v1658_v18 = vmul.f32 %v5517_v37, %v1656_v19  ;;  %1707 = vmatpush1.msra.mxu0 %v1663_v35  ;;  %v1651_v2 = vmul.f32 %v5518_v53, %v1648_v16  ;;  %v5522_v16 = vld [vmem:[#allocation65_spill] sm:$0xff] }
 0x566   :  { %1708 = vmatprep.subr.mxu0 %v5444_v15 }
 0x567   :  { %1709 = vmatpush1.msra.mxu0 %v1658_v18  ;;  %v1677_v18 = vld [vmem:[%s5247_s5] sm:$0xff] }
 0x568   :  { %1710 = vmatprep.subr.mxu0 %v5444_v15  ;;  %v1650_v5 = vpop.permute.xlu1 %1649  ;;  %v1642_v51 = vpop.permute.xlu0 %1641 }
 0x569   :  { %1711 = vmatpush1.msra.mxu0 %v1657_v7  ;;  %v1652_v47 = vmul.f32 %v5518_v53, %v1650_v5  ;;  %v1680_v7 = vld [vmem:[%s5247_s5 + $0x18] sm:$0xff]  ;;  %v1679_v5 = vld [vmem:[%s5247_s5 + $0x10] sm:$0xff] }
 0x56a   :  { %1712 = vmatprep.subr.mxu0 %v5444_v15 }
 0x56b   :  { %1713 = vmatpush1.msra.mxu0 %v1625_v27  ;;  %v1645_v27 = vmul.f32 %v5519_v61, %v1642_v51 }
 0x56c   :  { %1714 = vmatprep.subr.mxu0 %v5444_v15  ;;  %v1644_v36 = vpop.permute.xlu1 %1643  ;;  %v1636_v26 = vpop.permute.xlu0 %1635 }
 0x56d   :  { %1715 = vmatpush1.msra.mxu0 %v4784_v30  ;;  %v1646_v45 = vmul.f32 %v5519_v61, %v1644_v36  ;;  %v1639_v58 = vmul.f32 %v5520_v21, %v1636_v26 }
 0x56e   :  { %1716 = vmatprep.subr.mxu0 %v5444_v15 }
 0x56f   :  { %1717 = vmatpush1.msra.mxu0 %v1652_v47 }
 0x570   :  { %1718 = vmatprep.subr.mxu0 %v5444_v15  ;;  %v1638_v28 = vpop.permute.xlu1 %1637  ;;  %v1630_v43 = vpop.permute.xlu0 %1629 }
 0x571   :  { %1719 = vmatpush1.msra.mxu0 %v1651_v2  ;;  %v1640_v10 = vmul.f32 %v5520_v21, %v1638_v28  ;;  %v1633_v34 = vmul.f32 %v5521_v11, %v1630_v43 }
 0x572   :  { %1720 = vmatprep.subr.mxu0 %v5444_v15 }
 0x573   :  { %1721 = vmatpush1.msra.mxu0 %v1646_v45 }
 0x574   :  { %1722 = vmatprep.subr.mxu0 %v5444_v15  ;;  %v1632_v30 = vpop.permute.xlu1 %1631  ;;  %v1672_v35 = vpop.permute.xlu0 %1671 }
 0x575   :  { %1723 = vmatpush1.msra.mxu0 %v1645_v27  ;;  %v1634_v17 = vmul.f32 %v5521_v11, %v1632_v30  ;;  %v1675_v37 = vmul.f32 %v5522_v16, %v1672_v35 }
 0x576   :  { %1724 = vmatprep.subr.mxu0 %v5444_v15 }
 0x577   :  { %1725 = vmatpush1.msra.mxu0 %v1640_v10 }
 0x578   :  { %1726 = vmatprep.subr.mxu0 %v5444_v15  ;;  %v1674_v46 = vpop.permute.xlu1 %1673 }
 0x579   :  { %1727 = vmatpush1.msra.mxu0 %v1639_v58  ;;  %v1676_v19 = vmul.f32 %v5522_v16, %v1674_v46 }
 0x57a   :  { %1728 = vmatprep.subr.mxu0 %v5444_v15 }
 0x57b   :  { %1729 = vmatpush1.msra.mxu0 %v1634_v17 }
 0x57c   :  { %1730 = vmatprep.subr.mxu0 %v5444_v15 }
 0x57d   :  { %1731 = vmatpush1.msra.mxu0 %v1633_v34 }
 0x57e   :  { %1760 = vmatprep.subr.mxu0 %v5444_v15 }
 0x57f   :  { %1761 = vmatpush2.msra.mxu0 %v1676_v19 }
 0x580   :  { %1762 = vmatprep.subr.mxu0 %v5444_v15 }
 0x581   :  { %1763 = vmatpush2.msra.mxu0 %v1675_v37  ;;  %v1691_v2 = vpop.permute.xlu0 %1690 }
 0x582   :  { %1765 = vmatmul.mubr.f32.vlgmr.msra.gmra.mxu0 %v1677_v18 }
 0x583   :  { %3067 = vmatprep.mubr.msk.f32.mxu0 %vm1693_vm10, %v1680_v7 }
 0x585   :  { %v1686_v51 = vpop.permute.xlu1 %1685 }
 0x586   :  { %1770 = vmatmul.mubr.f32.gmra.mxu0 %v1679_v5 }
 0x642   :  { %v1766_v36 = vpop.f32.mrf.mxu0 }
 0x643   :  { %v1767_v53 = vadd.f32 %v1766_v36, %v1686_v51 }
 0x644   :  { %v1768_v47 = vpop.f32.mrf.mxu0 }
 0x645   :  { %v1775_v26 = vmax.f32 %v1767_v53, 0.0 }
 0x646   :  { %v1771_v28 = vpop.f32.mrf.mxu0 }
 0x647   :  { %v1772_v61 = vadd.f32 %v1771_v28, %v1691_v2 }
 0x648   :  { %v1773_v45 = vpop.f32.mrf.mxu0 }
 0x649   :  { %v1776_v27 = vmax.f32 %v1772_v61, 0.0 }
 0x64a   :  { %3446 = dma.done.wait [#allocation6 + $0x2], 1024 }
 0x64b   :  { %3447 = vsyncadd [#allocation6 + $0x2], 4294966272  ;;  %3259 = vmatprep.subr.mxu1 %v1776_v27  ;;  %3430 = vset.pattern.permute.xlu0 %v5505_v63  ;;  %v1779_v30 = vld [vmem:[%s5249_s7] sm:$0xff]  ;;  %v1780_v21 = vld [vmem:[%s5249_s7 + $0x8] sm:$0xff] }
 0x64c   :  { %3260 = vmatpush3.msra.mxu1 %v1776_v27  ;;  %3289 = vmatprep.subr.mxu0 %v5444_v15  ;;  %v1781_v10 = vld [vmem:[%s5249_s7 + $0x10] sm:$0xff]  ;;  %v1782_v43 = vld [vmem:[%s5249_s7 + $0x18] sm:$0xff]  ;;  %v3434_v17 = vld [vmem:[#allocation4 + $0x28] sm:$0xff]  }
 0x64d   :  { %3261 = vmatprep.subr.mxu1 %v1775_v26  ;;  %3307 = vmatprep.mubr.msk.f32.mxu0 %vm3466_vm12, %v5444_v15  ;;  %v3432_v58 = vld [vmem:[#allocation4 + $0x38] sm:$0xff]   ;;  %v3433_v11 = vld [vmem:[#allocation4 + $0x30] sm:$0xff]   ;;  %v3435_v46 = vld [vmem:[#allocation4 + $0x20] sm:$0xff]  }
 0x64e   :  { %3262 = vmatpush3.msra.mxu1 %v1775_v26  ;;  %3431 = vset.pattern.permute.xlu1 %v5505_v63  ;;  %v3436_v34 = vld [vmem:[#allocation4 + $0x18] sm:$0xff]   ;;  %v3437_v35 = vld [vmem:[#allocation4 + $0x10] sm:$0xff]   ;;  %v3438_v16 = vld [vmem:[#allocation4 + $0x8] sm:$0xff]  }
 0x64f   :  { %3263 = vmatprep.mubr.msk.f32.mxu1 %vm1693_vm10, %v1779_v30  ;;  %3269 = vmatprep.subr.bf16.mxu1 %v3432_v58  ;;  %v3439_v19 = vld [vmem:[#allocation4] sm:$0xff]  }
 0x650   :  { %3264 = vmatmul.mubr.msk.f32.vlgmr.msra.gmra.mxu1 %vm1693_vm10, %v1780_v21  ;;  %v2004_v28 = vld [vmem:[%s5250_s8] sm:$0xff] }
 0x651   :  { %3266 = vmatprep.mubr.msk.f32.mxu1 %vm1693_vm10, %v1781_v10  ;;  %3270 = vmatpush3.bf16.msra.mxu1 %v3432_v58 }
 0x652   :  { %3271 = vmatprep.subr.bf16.mxu1 %v3433_v11 }
 0x654   :  { %3267 = vmatmul.mubr.msk.f32.gmra.mxu1 %vm1693_vm10, %v1782_v43 }
 0x655   :  { %3272 = vmatpush3.bf16.msra.mxu1 %v3433_v11  ;;  %v2036_v11 = vld [vmem:[%s5252_s10] sm:$0xff] }
 0x656   :  { %3273 = vmatprep.subr.bf16.mxu1 %v3434_v17 }
 0x659   :  { %3274 = vmatpush3.bf16.msra.mxu1 %v3434_v17 }
 0x65a   :  { %3275 = vmatprep.subr.bf16.mxu1 %v3435_v46 }
 0x65d   :  { %3276 = vmatpush3.bf16.msra.mxu1 %v3435_v46 }
 0x65e   :  { %3277 = vmatprep.subr.bf16.mxu1 %v3436_v34 }
 0x661   :  { %3278 = vmatpush3.bf16.msra.mxu1 %v3436_v34 }
 0x662   :  { %3279 = vmatprep.subr.bf16.mxu1 %v3437_v35 }
 0x665   :  { %3280 = vmatpush3.bf16.msra.mxu1 %v3437_v35 }
 0x666   :  { %3281 = vmatprep.subr.bf16.mxu1 %v3438_v16 }
 0x669   :  { %3282 = vmatpush3.bf16.msra.mxu1 %v3438_v16 }
 0x66a   :  { %3283 = vmatprep.subr.bf16.mxu1 %v3439_v19 }
 0x66d   :  { %3284 = vmatpush3.bf16.msra.mxu1 %v3439_v19 }
 0x710   :  { %v3265_v37 = vpop.f32.mrf.mxu1 }
 0x712   :  { %v1861_v18 = vpop.f32.mrf.mxu1 }
 0x713   :  { %v1880_v7 = vpack.c.bf16 %v3265_v37, %v1861_v18 }
 0x714   :  { %v3268_v5 = vpop.f32.mrf.mxu1 }
 0x715   :  { %3285 = vmatprep.mubr.bf16.mxu1 %v1880_v7 }
 0x716   :  { %v1871_v51 = vpop.f32.mrf.mxu1 }
 0x717   :  { %v1881_v36 = vpack.c.bf16 %v3268_v5, %v1871_v51 }
 0x719   :  { %3286 = vmatmul.mubr.bf16.vlgmr.msra.gmra.mxu1 %v1881_v36 }
 0x7d9   :  { %v3287_v53 = vpop.f32.mrf.mxu1 }
 0x7da   :  { %1998 = vrot.lane.b32.xlu1 %v3287_v53, %s3465_s15 }
 0x7db   :  { %v1980_v47 = vpop.f32.mrf.mxu1 }
 0x7dd   :  { %v3288_v2 = vpop.f32.mrf.mxu1 }
 0x7de   :  { %2001 = vrot.lane.b32.xlu1 %v3288_v2, %s3464_s16 }
 0x7df   :  { %v1983_v26 = vpop.f32.mrf.mxu1 }
 0x7e0   :  { %1995 = vrot.lane.b32.xlu0 %v1983_v26, %s3454_s24 }
 0x7e4   :  { %2007 = vperm.xlu0 %3430, %v2004_v28  }
 0x84c   :  { %v1999_v27 = vpop.permute.xlu1 %1998 }
 0x850   :  { %v2002_v21 = vpop.permute.xlu1 %2001 }
 0x852   :  { %v1996_v61 = vpop.permute.xlu0 %1995 }
 0x853   :  { %v1997_v45 = vadd.f32 %v1996_v61, %v1980_v47 }
 0x855   :  { %v2000_v30 = vadd.f32 %v1999_v27, %v1997_v45 }
 0x857   :  { %v2003_v10 = vadd.f32 %v2002_v21, %v2000_v30 }
 0x85f   :  { %v2008_v43 = vpop.permute.xlu0 %2007 }
 0x860   :  { %v2010_v58 = vadd.f32 %v2008_v43, %v2003_v10 }
 0x862   :  { %2029 = vrot.lane.b32.xlu0 %v2010_v58, %s3460_s21  ;;  %2032 = vrot.lane.b32.xlu1 %v2010_v58, %s3461_s14 }
 0x866   :  { %2023 = vrot.lane.b32.xlu0 %v2010_v58, %s3455_s26  ;;  %2026 = vrot.lane.b32.xlu1 %v2010_v58, %s3462_s27 }
 0x86a   :  { %2017 = vrot.lane.b32.xlu0 %v2010_v58, %s3463_s20  ;;  %2020 = vrot.lane.b32.xlu1 %v2010_v58, %s3454_s24 }
 0x86e   :  { %2011 = vrot.lane.b32.xlu0 %v2010_v58, %s3464_s16  ;;  %2014 = vrot.lane.b32.xlu1 %v2010_v58, %s3465_s15 }
 0x872   :  { %2039 = vperm.xlu1 %3431, %v2036_v11  }
 0x8d4   :  { %v2030_v17 = vpop.permute.xlu0 %2029  ;;  %v2033_v46 = vpop.permute.xlu1 %2032 }
 0x8d5   :  { %v2034_v34 = vmul.f32 %v5507_v31, %v2033_v46  ;;  %v2031_v35 = vmul.f32 %v5508_v20, %v2030_v17 }
 0x8d7   :  { %3290 = vmatpush3.msra.mxu0 %v2034_v34 }
 0x8d8   :  { %v2024_v16 = vpop.permute.xlu0 %2023  ;;  %3291 = vmatprep.subr.mxu0 %v5444_v15  ;;  %v2027_v19 = vpop.permute.xlu1 %2026 }
 0x8d9   :  { %v2028_v37 = vmul.f32 %v5509_v3, %v2027_v19  ;;  %3292 = vmatpush3.msra.mxu0 %v2031_v35  ;;  %v2025_v18 = vmul.f32 %v5510_v9, %v2024_v16 }
 0x8da   :  { %3293 = vmatprep.subr.mxu0 %v5444_v15 }
 0x8db   :  { %3294 = vmatpush3.msra.mxu0 %v2028_v37 }
 0x8dc   :  { %v2018_v7 = vpop.permute.xlu0 %2017  ;;  %3295 = vmatprep.subr.mxu0 %v5444_v15  ;;  %v2021_v5 = vpop.permute.xlu1 %2020 }
 0x8dd   :  { %3296 = vmatpush3.msra.mxu0 %v2025_v18  ;;  %v2022_v31 = vmul.f32 %v5511_v14, %v2021_v5  ;;  %v2019_v3 = vmul.f32 %v5512_v32, %v2018_v7  ;;  %v2035_v14 = vld [vmem:[%s5251_s9] sm:$0xff] }
 0x8de   :  { %3297 = vmatprep.subr.mxu0 %v5444_v15 }
 0x8df   :  { %3298 = vmatpush3.msra.mxu0 %v2010_v58 }
 0x8e0   :  { %3299 = vmatprep.subr.mxu0 %v5444_v15  ;;  %v2015_v20 = vpop.permute.xlu1 %2014  ;;  %v2012_v51 = vpop.permute.xlu0 %2011 }
 0x8e1   :  { %3300 = vmatpush3.msra.mxu0 %v2022_v31  ;;  %v2016_v9 = vmul.f32 %v5513_v22, %v2015_v20  ;;  %v2013_v36 = vmul.f32 %v5514_v56, %v2012_v51 }
 0x8e2   :  { %3301 = vmatprep.subr.mxu0 %v5444_v15 }
 0x8e3   :  { %3302 = vmatpush3.msra.mxu0 %v2019_v3 }
 0x8e4   :  { %3303 = vmatprep.subr.mxu0 %v5444_v15 }
 0x8e5   :  { %3304 = vmatpush3.msra.mxu0 %v2016_v9 }
 0x8e6   :  { %3305 = vmatprep.subr.mxu0 %v5444_v15 }
 0x8e7   :  { %3306 = vmatpush3.msra.mxu0 %v2013_v36 }
 0x8e8   :  { %3308 = vmatmul.mubr.msk.f32.vlgmr.msra.gmra.mxu0 %vm1417_vm4, %v2035_v14 }
 0x8ed   :  { %v2040_v32 = vpop.permute.xlu1 %2039 }
 0x9a8   :  { %v2111_v53 = vpop.f32.mrf.mxu0 }
 0x9a9   :  { %v2112_v47 = vadd.f32 %v2111_v53, %v2040_v32 }
 0x9aa   :  { %v3309_v2 = vpop.f32.mrf.mxu0 }
 0x9ab   :  { %v2115_v22 = vmax.f32 %v2112_v47, 0.0 }
 0x9ac   :  { %3448 = dma.done.wait [#allocation6 + $0x3], 4096 }
 0x9ad   :  { %3449 = vsyncadd [#allocation6 + $0x3], 4294963200  ;;  %3310 = vmatprep.subr.mxu0 %v5444_v15  ;;  %3312 = vmatprep.mubr.msk.f32.mxu0 %vm3466_vm12, %v5444_v15  ;;  %v5523_v56 = vld [vmem:[#allocation47_spill] sm:$0xff]  ;;  %v5524_v26 = vld [vmem:[#allocation45_spill] sm:$0xff]  ;;  %vm2120_vm1 = vcmask 64512   ;;  %vm5557_vm13 = vcmp.lt.s32.totalorder %v3992_v38, 17 }
 0x9ae   :  { %v3111_v28 = vcombine.high %v5524_v26, %v5523_v56  ;;  %v5525_v61 = vld [vmem:[#allocation48_spill] sm:$0xff]  ;;  %v5526_v45 = vld [vmem:[#allocation46_spill] sm:$0xff]  ;;  %v3110_v30 = vcombine.low %v5524_v26, %v5523_v56  ;;  %3311 = vmatpush3.msra.mxu0 %v2115_v22  ;;  %v5527_v21 = vld [vmem:[#allocation43_spill] sm:$0xff]  ;;  %2419 = vmatprep.mubr.bf16.mxu1 %v5505_v63 }
 0x9af   :  { %v3113_v27 = vcombine.high %v5526_v45, %v5525_v61  ;;  %v5528_v10 = vld [vmem:[#allocation41_spill] sm:$0xff]  ;;  %v5529_v15 = vld [vmem:[#allocation39_spill] sm:$0xff]  ;;  %v3112_v46 = vcombine.low %v5526_v45, %v5525_v61  ;;  %v5531_v34 = vld [vmem:[#allocation44_spill] sm:$0xff]  ;;  %3440 = vset.pattern.permute.xlu0 %v5505_v63  ;;  %3441 = vset.pattern.permute.xlu1 %v5505_v63 }
 0x9b0   :  { %v3107_v43 = vcombine.high %v5528_v10, %v5527_v21  ;;  %2387 = vmatprep.subr.bf16.mxu1 %v3111_v28  ;;  %v3106_v58 = vcombine.low %v5528_v10, %v5527_v21  ;;  %v5530_v11 = vld [vmem:[#allocation37_spill] sm:$0xff]  ;;  %v5532_v35 = vld [vmem:[#allocation42_spill] sm:$0xff]  ;;  %v5533_v18 = vld [vmem:[#allocation35_spill] sm:$0xff] }
 0x9b1   :  { %2428 = vmatprep.subr.bf16.mxu0 %v3113_v27  ;;  %2388 = vmatpush1.bf16.msra.mxu1 %v3110_v30  ;;  %v3103_v17 = vcombine.high %v5530_v11, %v5529_v15  ;;  %v3109_v16 = vcombine.high %v5532_v35, %v5531_v34  ;;  %v2119_v19 = vld [vmem:[%s5253_s11] sm:$0xf]  ;;  %v3102_v37 = vcombine.low %v5530_v11, %v5529_v15  ;;  %v5536_v3 = vld [vmem:[#allocation38_spill] sm:$0xff]  ;;  %v5537_v36 = vld [vmem:[#allocation31_spill] sm:$0xff] }
 0x9b2   :  { %2389 = vmatprep.subr.bf16.mxu1 %v3107_v43  ;;  %3313 = vmatmul.mubr.msk.f32.vlgmr.msra.gmra.mxu0 %vm2120_vm1, %v2119_v19  ;;  %v5534_v7 = vld [vmem:[#allocation33_spill] sm:$0xff]  ;;  %v3108_v31 = vcombine.low %v5532_v35, %v5531_v34  ;;  %v5535_v20 = vld [vmem:[#allocation40_spill] sm:$0xff]  ;;  %v5540_v2 = vld [vmem:[#allocation34_spill] sm:$0xff] }
 0x9b3   :  { %v3099_v5 = vcombine.high %v5534_v7, %v5533_v18  ;;  %2429 = vmatpush1.bf16.msra.mxu0 %v3112_v46  ;;  %2460 = vmatprep.mubr.bf16.mxu0 %v5505_v63  ;;  %v3105_v51 = vcombine.high %v5536_v3, %v5535_v20  ;;  %v3098_v9 = vcombine.low %v5534_v7, %v5533_v18  ;;  %v5538_v14 = vld [vmem:[#allocation29_spill] sm:$0xff]  ;;  %v5539_v47 = vld [vmem:[#allocation36_spill] sm:$0xff]  ;;  %v5541_v56 = vld [vmem:[#allocation27_spill] sm:$0xff] }
 0x9b4   :  { %2430 = vmatprep.subr.bf16.mxu0 %v3109_v16  ;;  %v3095_v32 = vcombine.high %v5538_v14, %v5537_v36  ;;  %v3104_v53 = vcombine.low %v5536_v3, %v5535_v20  ;;  %v3101_v22 = vcombine.high %v5540_v2, %v5539_v47  ;;  %v3094_v63 = vcombine.low %v5538_v14, %v5537_v36  ;;  %v5542_v26 = vld [vmem:[#allocation25_spill] sm:$0xff]  ;;  %v5543_v45 = vld [vmem:[#allocation32_spill] sm:$0xff]  ;;  %v5544_v27 = vld [vmem:[#allocation30_spill] sm:$0xff] }
 0x9b5   :  { %2390 = vmatpush1.bf16.msra.mxu1 %v3106_v58  ;;  %v3091_v28 = vcombine.high %v5542_v26, %v5541_v56  ;;  %v3100_v61 = vcombine.low %v5540_v2, %v5539_v47  ;;  %v3097_v30 = vcombine.high %v5544_v27, %v5543_v45  ;;  %v3090_v21 = vcombine.low %v5542_v26, %v5541_v56  ;;  %v5545_v10 = vld [vmem:[#allocation23_spill] sm:$0xff]  ;;  %v5546_v43 = vld [vmem:[#allocation21_spill] sm:$0xff]  ;;  %v5547_v11 = vld [vmem:[#allocation28_spill] sm:$0xff] }
 0x9b6   :  { %2391 = vmatprep.subr.bf16.mxu1 %v3103_v17  ;;  %v3087_v58 = vcombine.high %v5546_v43, %v5545_v10  ;;  %v3096_v15 = vcombine.low %v5544_v27, %v5543_v45  ;;  %v5548_v17 = vld [vmem:[#allocation26_spill] sm:$0xff]  ;;  %v3086_v34 = vcombine.low %v5546_v43, %v5545_v10  ;;  %v5549_v35 = vld [vmem:[#allocation19_spill] sm:$0xff]  ;;  %v5550_v16 = vld [vmem:[#allocation17_spill] sm:$0xff] }
 0x9b7   :  { %2431 = vmatpush1.bf16.msra.mxu0 %v3108_v31  ;;  %v3093_v46 = vcombine.high %v5548_v17, %v5547_v11  ;;  %v3083_v19 = vcombine.high %v5550_v16, %v5549_v35  ;;  %v5551_v18 = vld [vmem:[#allocation24_spill] sm:$0xff]  ;;  %v5552_v7 = vld [vmem:[#allocation22_spill] sm:$0xff]  ;;  %vm5555_vm8 = vmmov %vm5487_vm7 }
 0x9b8   :  { %2432 = vmatprep.subr.bf16.mxu0 %v3105_v51  ;;  %v3088_v31 = vcombine.low %v5552_v7, %v5551_v18  ;;  %v5553_v20 = vld [vmem:[#allocation20_spill] sm:$0xff]  ;;  %v5554_v3 = vld [vmem:[#allocation18_spill] sm:$0xff]  ;;  %vm5556_vm14 = vmmov %vm5487_vm7 }
 0x9b9   :  { %2392 = vmatpush1.bf16.msra.mxu1 %v3102_v37  ;;  %v3092_v37 = vcombine.low %v5548_v17, %v5547_v11  ;;  %v3085_v51 = vcombine.high %v5554_v3, %v5553_v20  ;;  %v3084_v36 = vcombine.low %v5554_v3, %v5553_v20  ;;  %v2545_v14 = vld [vmem:[#allocation7] sm:$0x1]  ;;  %v3118_v20 = vld [vmem:[%s5255_s13 + $0x5] sm:$0x1]  ;;  %v3120_v3 = vld [vmem:[%s5255_s13 + $0x7] sm:$0x1] }
 0x9ba   :  { %2393 = vmatprep.subr.bf16.mxu1 %v3099_v5  ;;  %v3089_v5 = vcombine.high %v5552_v7, %v5551_v18  ;;  %2548 = vperm.xlu0 %3440, %v2545_v14   ;;  %v3119_v7 = vld [vmem:[%s5255_s13 + $0x6] sm:$0x1]  ;;  %vm5558_vm0 = vmmov %vm5487_vm7  ;;  %v5576_v48 = vld [vmem:[#allocation71_spill] sm:$0xff] }
 0x9bb   :  { %2433 = vmatpush1.bf16.msra.mxu0 %v3104_v53  ;;  %v2575_v53 = vld [vmem:[%s5255_s13] sm:$0x1]  ;;  %vm5559_vm5 = vmmov %vm5557_vm13  ;;  %v5580_v38 = vld [vmem:[#allocation49_spill] sm:$0xff] }
 0x9bc   :  { %2434 = vmatprep.subr.bf16.mxu0 %v3101_v22  ;;  %vm5560_vm4 = vmmov %vm5559_vm5 }
 0x9bd   :  { %2394 = vmatpush1.bf16.msra.mxu1 %v3098_v9  ;;  %v3082_v9 = vcombine.low %v5550_v16, %v5549_v35  ;;  %v3115_v16 = vld [vmem:[%s5255_s13 + $0x2] sm:$0x1]  ;;  %vm5561_vm12 = vmmov %vm5560_vm4 }
 0x9be   :  { %2395 = vmatprep.subr.bf16.mxu1 %v3095_v32  ;;  %v3114_v32 = vld [vmem:[%s5255_s13 + $0x1] sm:$0x1]  ;;  %2578 = vperm.xlu0 %3440, %v2575_v53   ;;  %vm5563_vm10 = vmmov %vm5558_vm0 }
 0x9bf   :  { %2435 = vmatpush1.bf16.msra.mxu0 %v3100_v61  ;;  %2613 = vperm.xlu1 %3441, %v3114_v32   ;;  %vm5564_vm1 = vmmov %vm5558_vm0 }
 0x9c0   :  { %2436 = vmatprep.subr.bf16.mxu0 %v3097_v30 }
 0x9c1   :  { %2396 = vmatpush1.bf16.msra.mxu1 %v3094_v63 }
 0x9c2   :  { %2397 = vmatprep.subr.bf16.mxu1 %v3091_v28 }
 0x9c3   :  { %2437 = vmatpush1.bf16.msra.mxu0 %v3096_v15 }
 0x9c4   :  { %2438 = vmatprep.subr.bf16.mxu0 %v3093_v46 }
 0x9c5   :  { %2398 = vmatpush1.bf16.msra.mxu1 %v3090_v21 }
 0x9c6   :  { %2399 = vmatprep.subr.bf16.mxu1 %v3087_v58 }
 0x9c7   :  { %2439 = vmatpush1.bf16.msra.mxu0 %v3092_v37  ;;  %v3117_v37 = vld [vmem:[%s5255_s13 + $0x4] sm:$0x1] }
 0x9c8   :  { %2440 = vmatprep.subr.bf16.mxu0 %v3089_v5  ;;  %v3116_v5 = vld [vmem:[%s5255_s13 + $0x3] sm:$0x1] }
 0x9c9   :  { %2400 = vmatpush1.bf16.msra.mxu1 %v3086_v34 }
 0x9ca   :  { %2401 = vmatprep.subr.bf16.mxu1 %v3083_v19 }
 0x9cb   :  { %2441 = vmatpush1.bf16.msra.mxu0 %v3088_v31  ;;  %v3121_v31 = vld [vmem:[%s5255_s13 + $0x8] sm:$0x1]  ;;  %s5562_s13 = smov 111  }
 0x9cc   :  { %2442 = vmatprep.subr.bf16.mxu0 %v3085_v51 }
 0x9cd   :  { %2402 = vmatpush1.bf16.msra.mxu1 %v3082_v9 }
 0x9cf   :  { %2443 = vmatpush1.bf16.msra.mxu0 %v3084_v36 }
 0xa35   :  { %v2549_v51 = vpop.permute.xlu0 %2548 }
 0xa39   :  { %v5040_v36 = vpop.permute.xlu0 %2578 }
 0xa3a   :  { %v5038_v9 = vpop.permute.xlu1 %2613 }
 0xa72   :  { %v2190_v47 = vpop.f32.mrf.mxu0 }
 0xa73   :  { %v2194_v2 = vpack.c.bf16 %v2190_v47, %v2190_v47 }
 0xa74   :  { %v3314_v22 = vpop.f32.mrf.mxu0 }
 0xa75   :  { %2420 = vmatmul.mubr.bf16.vlgmr.msra.gmra.mxu1 %v2194_v2  ;;  %2461 = vmatmul.mubr.bf16.vlgmr.msra.gmra.mxu0 %v2194_v2 }
 0xb35   :  { %v4990_v63 = vpop.f32.mrf.mxu1  ;;  %v4992_v56 = vpop.f32.mrf.mxu0 }
 0xb36   :  { %v2473_v26 = vrot.slane %v4990_v63, 1  ;;  %v2475_v28 = vrot.slane %v4992_v56, 1  ;;  %v2499_v21 = vrot.slane %v4992_v56, 2  ;;  %v2497_v10 = vrot.slane %v4990_v63, 2 }
 0xb37   :  { %v2423_v61 = vpop.f32.mrf.mxu1  ;;  %v4996_v45 = vpop.f32.mrf.mxu0  ;;  %v2521_v15 = vrot.slane %v4990_v63, 3  ;;  %v2523_v17 = vrot.slane %v4992_v56, 3 }
 0xb38   :  { %2481 = vrot.lane.b32.xlu0 %v2473_v26, %s3454_s24  ;;  %2485 = vrot.lane.b32.xlu1 %v2475_v28, %s3454_s24  ;;  %v2476_v11 = vrot.slane %v4996_v45, 1  ;;  %v2498_v46 = vrot.slane %v2423_v61, 2  ;;  %v2474_v34 = vrot.slane %v2423_v61, 1  ;;  %v2500_v35 = vrot.slane %v4996_v45, 2 }
 0xb39   :  { %v2425_v27 = vpop.f32.mrf.mxu1  ;;  %v2466_v30 = vpop.f32.mrf.mxu0  ;;  %v2522_v19 = vrot.slane %v2423_v61, 3  ;;  %v2524_v18 = vrot.slane %v4996_v45, 3 }
 0xb3b   :  { %v2426_v43 = vpop.f32.mrf.mxu1  ;;  %v2467_v58 = vpop.f32.mrf.mxu0 }
 0xb3c   :  { %2509 = vrot.lane.b32.xlu0 %v2499_v21, %s3452_s1  ;;  %2505 = vrot.lane.b32.xlu1 %v2497_v10, %s3452_s1 }
 0xb40   :  { %2529 = vrot.lane.b32.xlu0 %v2521_v15, %s3451_s18  ;;  %2487 = vrot.lane.b32.xlu1 %v2476_v11, %s3454_s24 }
 0xb44   :  { %2533 = vrot.lane.b32.xlu0 %v2523_v17, %s3451_s18  ;;  %2507 = vrot.lane.b32.xlu1 %v2498_v46, %s3452_s1 }
 0xb48   :  { %2483 = vrot.lane.b32.xlu0 %v2474_v34, %s3454_s24  ;;  %2511 = vrot.lane.b32.xlu1 %v2500_v35, %s3452_s1 }
 0xb4c   :  { %2648 = vperm.xlu0 %3440, %v3115_v16   ;;  %2531 = vrot.lane.b32.xlu1 %v2522_v19, %s3451_s18  ;;  %v2554_v19 = vrot.slane %v2549_v51, %v3894_v23 }
 0xb50   :  { %2702 = vperm.xlu0 %3440, %v3117_v37   ;;  %2535 = vrot.lane.b32.xlu1 %v2524_v18, %s3451_s18 }
 0xb54   :  { %2772 = vperm.xlu0 %3440, %v3119_v7   ;;  %2683 = vperm.xlu1 %3441, %v3116_v5  }
 0xb58   :  { %2842 = vperm.xlu0 %3440, %v3121_v31   ;;  %2737 = vperm.xlu1 %3441, %v3118_v20  }
 0xb5c   :  { %2807 = vperm.xlu1 %3441, %v3120_v3  }
 0xbaa   :  { %v2482_v14 = vpop.permute.xlu0 %2481  ;;  %v2486_v32 = vpop.permute.xlu1 %2485 }
 0xbae   :  { %v2510_v53 = vpop.permute.xlu0 %2509  ;;  %v2506_v47 = vpop.permute.xlu1 %2505 }
 0xbb2   :  { %v2530_v2 = vpop.permute.xlu0 %2529  ;;  %v2488_v22 = vpop.permute.xlu1 %2487 }
 0xbb3   :  { %v2489_v58 = vsel %vm726_vm15, %v2486_v32, %v2488_v22  ;;  %v2492_v15 = vsel %vm726_vm15, %v2488_v22, %v2482_v14 }
 0xbb4   :  { %v2493_v37 = vadd.f32 %v2492_v15, %v4990_v63  ;;  %v2496_v18 = vadd.f32 %v2489_v58, %v4996_v45  ;;  %v2857_v15 = vld [vmem:[#allocation8] sm:$0x1] }
 0xbb6   :  { %v2534_v26 = vpop.permute.xlu0 %2533  ;;  %v2508_v28 = vpop.permute.xlu1 %2507 }
 0xbb7   :  { %v2515_v11 = vsel %vm5487_vm7, %v2506_v47, %v2508_v28  ;;  %vm5565_vm7 = vmmov %vm5560_vm4 }
 0xbba   :  { %v2484_v27 = vpop.permute.xlu0 %2483  ;;  %v2512_v30 = vpop.permute.xlu1 %2511 }
 0xbbb   :  { %v2490_v21 = vsel %vm726_vm15, %v2484_v27, %v2486_v32  ;;  %v2491_v10 = vsel %vm726_vm15, %v2482_v14, %v2484_v27  ;;  %v2513_v35 = vsel %vm5555_vm8, %v2510_v53, %v2512_v30  ;;  %v2516_v16 = vsel %vm5556_vm14, %v2512_v30, %v2506_v47  ;;  %vm5566_vm8 = vmmov %vm5560_vm4 }
 0xbbc   :  { %v2494_v43 = vadd.f32 %v2491_v10, %v2423_v61  ;;  %v2495_v17 = vadd.f32 %v2490_v21, %v4992_v56  ;;  %v2514_v56 = vsel %vm5558_vm0, %v2508_v28, %v2510_v53  ;;  %v2517_v5 = vadd.f32 %v2516_v16, %v2493_v37  ;;  %vm5567_vm14 = vmmov %vm5558_vm0 }
 0xbbd   :  { %v2520_v31 = vadd.f32 %v2513_v35, %v2496_v18 }
 0xbbe   :  { %v2518_v46 = vadd.f32 %v2515_v11, %v2494_v43  ;;  %v2532_v34 = vpop.permute.xlu1 %2531  ;;  %v2519_v20 = vadd.f32 %v2514_v56, %v2495_v17 }
 0xbbf   :  { %v2539_v61 = vsel %vm5557_vm13, %v2530_v2, %v2532_v34  ;;  %v2538_v32 = vsel %vm5559_vm5, %v2532_v34, %v2534_v26  ;;  %vm5568_vm13 = vmmov %vm5558_vm0 }
 0xbc0   :  { %v2542_v7 = vadd.f32 %v2539_v61, %v2518_v46  ;;  %v2543_v22 = vadd.f32 %v2538_v32, %v2519_v20  ;;  %vm5569_vm0 = vmmov %vm5560_vm4 }
 0xbc1   :  { %vm5570_vm5 = vmmov %vm5569_vm0 }
 0xbc2   :  { %v2556_v3 = vadd.f32 %v2554_v19, %v2542_v7  ;;  %v2536_v14 = vpop.permute.xlu1 %2535  ;;  %v2557_v30 = vadd.f32 %v2554_v19, %v2543_v22 }
 0xbc3   :  { %v2537_v47 = vsel %vm5560_vm4, %v2534_v26, %v2536_v14  ;;  %v2540_v63 = vsel %vm5561_vm12, %v2536_v14, %v2530_v2 }
 0xbc4   :  { %v2541_v51 = vadd.f32 %v2540_v63, %v2517_v5  ;;  %v2544_v45 = vadd.f32 %v2537_v47, %v2520_v31  ;;  %2561 = vrot.lane.b32.xlu1 %v2556_v3, %s3451_s18  ;;  %v2619_v63 = vrot.slane %v5038_v9, %v3894_v23 }
 0xbc6   :  { %v2555_v53 = vadd.f32 %v2554_v19, %v2541_v51  ;;  %v2558_v28 = vadd.f32 %v2554_v19, %v2544_v45 }
 0xbc7   :  { %v5071_v27 = vpop.permute.xlu0 %2648 }
 0xbc8   :  { %2559 = vrot.lane.b32.xlu0 %v2555_v53, %s3451_s18  ;;  %2565 = vrot.lane.b32.xlu1 %v2558_v28, %s3451_s18  ;;  %v2654_v9 = vrot.slane %v5071_v27, %v3894_v23  ;;  %v5573_v27 = vld [vmem:[#allocation69_spill] sm:$0xff] }
 0xbcb   :  { %v2703_v21 = vpop.permute.xlu0 %2702 }
 0xbcc   :  { %v2708_v26 = vrot.slane %v2703_v21, %v3894_v23  ;;  %2563 = vrot.lane.b32.xlu0 %v2557_v30, %s3451_s18  ;;  %2593 = vrot.lane.b32.xlu1 %v2555_v53, %s3452_s1  ;;  %v2584_v21 = vrot.slane %v5040_v36, %v3894_v23 }
 0xbce   :  { %v5078_v2 = vmul.f32 %v2708_v26, %v2555_v53  ;;  %v5080_v10 = vmul.f32 %v2708_v26, %v2556_v3  ;;  %v5082_v43 = vmul.f32 %v2708_v26, %v2557_v30  ;;  %v5084_v58 = vmul.f32 %v2708_v26, %v2558_v28 }
 0xbcf   :  { %v2684_v11 = vpop.permute.xlu1 %2683  ;;  %v5115_v46 = vpop.permute.xlu0 %2772 }
 0xbd0   :  { %2595 = vrot.lane.b32.xlu0 %v2556_v3, %s3452_s1  ;;  %2597 = vrot.lane.b32.xlu1 %v2557_v30, %s3452_s1 }
 0xbd3   :  { %v5113_v17 = vpop.permute.xlu1 %2737  ;;  %v5119_v35 = vpop.permute.xlu0 %2842 }
 0xbd4   :  { %2599 = vrot.lane.b32.xlu0 %v2558_v28, %s3452_s1  ;;  %2630 = vrot.lane.b32.xlu1 %v2556_v3, %s3453_s2 }
 0xbd7   :  { %v5117_v34 = vpop.permute.xlu1 %2807 }
 0xbd8   :  { %2628 = vrot.lane.b32.xlu0 %v2555_v53, %s3453_s2  ;;  %2634 = vrot.lane.b32.xlu1 %v2558_v28, %s3453_s2 }
 0xbdc   :  { %2632 = vrot.lane.b32.xlu0 %v2557_v30, %s3453_s2  ;;  %2663 = vrot.lane.b32.xlu1 %v2555_v53, %s3454_s24 }
 0xbe0   :  { %2665 = vrot.lane.b32.xlu0 %v2556_v3, %s3454_s24  ;;  %2667 = vrot.lane.b32.xlu1 %v2557_v30, %s3454_s24 }
 0xbe4   :  { %2669 = vrot.lane.b32.xlu0 %v2558_v28, %s3454_s24  ;;  %2717 = vrot.lane.b32.xlu1 %v2555_v53, %s3455_s26 }
 0xbe8   :  { %2719 = vrot.lane.b32.xlu0 %v2556_v3, %s3455_s26  ;;  %2721 = vrot.lane.b32.xlu1 %v2557_v30, %s3455_s26 }
 0xbec   :  { %2723 = vrot.lane.b32.xlu0 %v2558_v28, %s3455_s26  ;;  %2754 = vrot.lane.b32.xlu1 %v2556_v3, %s3456_s29 }
 0xbf0   :  { %2752 = vrot.lane.b32.xlu0 %v2555_v53, %s3456_s29  ;;  %2758 = vrot.lane.b32.xlu1 %v2558_v28, %s3456_s29 }
 0xbf4   :  { %2756 = vrot.lane.b32.xlu0 %v2557_v30, %s3456_s29  ;;  %2787 = vrot.lane.b32.xlu1 %v2555_v53, %s3457_s30 }
 0xbf8   :  { %2789 = vrot.lane.b32.xlu0 %v2556_v3, %s3457_s30  ;;  %2791 = vrot.lane.b32.xlu1 %v2557_v30, %s3457_s30 }
 0xbfc   :  { %2793 = vrot.lane.b32.xlu0 %v2558_v28, %s3457_s30  ;;  %2822 = vrot.lane.b32.xlu1 %v2555_v53, %s5562_s13 }
 0xc00   :  { %2824 = vrot.lane.b32.xlu0 %v2556_v3, %s5562_s13  ;;  %2826 = vrot.lane.b32.xlu1 %v2557_v30, %s5562_s13 }
 0xc04   :  { %2828 = vrot.lane.b32.xlu0 %v2558_v28, %s5562_s13  ;;  %2860 = vperm.xlu1 %3441, %v2857_v15  }
 0xc36   :  { %v2562_v16 = vpop.permute.xlu1 %2561 }
 0xc3a   :  { %v2560_v61 = vpop.permute.xlu0 %2559  ;;  %v2566_v19 = vpop.permute.xlu1 %2565 }
 0xc3b   :  { %v2569_v14 = vsel %vm5565_vm7, %v2560_v61, %v2562_v16  ;;  %v2570_v15 = vsel %vm5569_vm0, %v2566_v19, %v2560_v61 }
 0xc3c   :  { %v2572_v26 = vmul.f32 %v4289_v40, %v2569_v14 }
 0xc3e   :  { %v2564_v37 = vpop.permute.xlu0 %2563  ;;  %v2594_v18 = vpop.permute.xlu1 %2593 }
 0xc3f   :  { %v2568_v51 = vsel %vm5566_vm8, %v2562_v16, %v2564_v37  ;;  %v5571_v16 = vld [vmem:[#allocation70_spill] sm:$0xff] }
 0xc42   :  { %v2596_v7 = vpop.permute.xlu0 %2595  ;;  %v2598_v56 = vpop.permute.xlu1 %2597 }
 0xc43   :  { %v2603_v20 = vsel %vm5563_vm10, %v2594_v18, %v2596_v7  ;;  %v2602_v3 = vsel %vm5564_vm1, %v2596_v7, %v2598_v56 }
 0xc44   :  { %v2606_v22 = vmul.f32 %v4266_v42, %v2603_v20  ;;  %v2607_v53 = vmul.f32 %v4271_v39, %v2602_v3  ;;  %v2567_v39 = vsel %vm5570_vm5, %v2564_v37, %v2566_v19  ;;  %v2573_v42 = vmul.f32 %v4294_v33, %v2568_v51  ;;  %v5574_v51 = vld [vmem:[#allocation66_spill] sm:$0xff] }
 0xc45   :  { %v2689_v19 = vrot.slane %v2684_v11, %v3894_v23 }
 0xc46   :  { %v2600_v5 = vpop.permute.xlu0 %2599  ;;  %v2631_v31 = vpop.permute.xlu1 %2630  ;;  %v2621_v33 = vmul.f32 %v2619_v63, %v2606_v22  ;;  %v2622_v37 = vmul.f32 %v2619_v63, %v2607_v53 }
 0xc47   :  { %v2601_v28 = vsel %vm5567_vm14, %v2598_v56, %v2600_v5  ;;  %v2604_v30 = vsel %vm5568_vm13, %v2600_v5, %v2594_v18  ;;  %v5572_v5 = vld [vmem:[#allocation67_spill] sm:$0xff] }
 0xc48   :  { %v2605_v20 = vmul.f32 %v5572_v5, %v2604_v30  ;;  %v2608_v3 = vmul.f32 %v5573_v27, %v2601_v28  ;;  %v2586_v5 = vmul.f32 %v2584_v21, %v2572_v26  ;;  %v2587_v27 = vmul.f32 %v2584_v21, %v2573_v42 }
 0xc4a   :  { %v2629_v32 = vpop.permute.xlu0 %2628  ;;  %v2635_v47 = vpop.permute.xlu1 %2634  ;;  %v2623_v11 = vmul.f32 %v2619_v63, %v2608_v3  ;;  %v2625_v53 = vadd.f32 %v2621_v33, %v2586_v5 }
 0xc4b   :  { %v2638_v45 = vsel %vm678_vm6, %v2629_v32, %v2631_v31  ;;  %v2639_v18 = vsel %vm678_vm6, %v2635_v47, %v2629_v32  ;;  %v2571_v32 = vmul.f32 %v5574_v51, %v2570_v15  ;;  %v2626_v15 = vadd.f32 %v2622_v37, %v2587_v27 }
 0xc4c   :  { %v2641_v7 = vmul.f32 %v5571_v16, %v2638_v45  ;;  %v5575_v45 = vld [vmem:[#allocation68_spill] sm:$0xff]  ;;  %v2640_v30 = vmul.f32 %v5576_v48, %v2639_v18 }
 0xc4d   :  { %v2574_v16 = vmul.f32 %v5575_v45, %v2567_v39  ;;  %v2585_v26 = vmul.f32 %v2584_v21, %v2571_v32 }
 0xc4e   :  { %v2633_v56 = vpop.permute.xlu0 %2632  ;;  %v2664_v36 = vpop.permute.xlu1 %2663  ;;  %v2655_v42 = vmul.f32 %v2654_v9, %v2640_v30 }
 0xc4f   :  { %v2636_v40 = vsel %vm678_vm6, %v2633_v56, %v2635_v47  ;;  %v2637_v61 = vsel %vm678_vm6, %v2631_v31, %v2633_v56  ;;  %v2656_v47 = vmul.f32 %v2654_v9, %v2641_v7  ;;  %v2620_v56 = vmul.f32 %v2619_v63, %v2605_v20 }
 0xc50   :  { %v2642_v14 = vmul.f32 %v4317_v60, %v2637_v61  ;;  %v2643_v28 = vmul.f32 %v4327_v25, %v2636_v40  ;;  %v2588_v39 = vmul.f32 %v2584_v21, %v2574_v16 }
 0xc51   :  { %v2660_v18 = vadd.f32 %v2656_v47, %v2625_v53 }
 0xc52   :  { %v2657_v44 = vmul.f32 %v2654_v9, %v2642_v14  ;;  %v2666_v29 = vpop.permute.xlu0 %2665  ;;  %v2668_v31 = vpop.permute.xlu1 %2667  ;;  %v2658_v7 = vmul.f32 %v2654_v9, %v2643_v28  ;;  %v2624_v14 = vadd.f32 %v2620_v56, %v2585_v26  ;;  %v2627_v51 = vadd.f32 %v2623_v11, %v2588_v39 }
 0xc53   :  { %v2673_v22 = vsel %vm726_vm15, %v2664_v36, %v2666_v29  ;;  %v2672_v60 = vsel %vm726_vm15, %v2666_v29, %v2668_v31  ;;  %v2778_v26 = vrot.slane %v5115_v46, %v3894_v23 }
 0xc54   :  { %v2676_v48 = vmul.f32 %v4332_v49, %v2673_v22  ;;  %v2677_v25 = vmul.f32 %v4342_v8, %v2672_v60  ;;  %v2661_v40 = vadd.f32 %v2657_v44, %v2626_v15  ;;  %v2659_v37 = vadd.f32 %v2655_v42, %v2624_v14 }
 0xc55   :  { %v2662_v44 = vadd.f32 %v2658_v7, %v2627_v51 }
 0xc56   :  { %v2691_v20 = vmul.f32 %v2689_v19, %v2676_v48  ;;  %v2692_v63 = vmul.f32 %v2689_v19, %v2677_v25  ;;  %v2670_v3 = vpop.permute.xlu0 %2669  ;;  %v2718_v61 = vpop.permute.xlu1 %2717 }
 0xc57   :  { %v2671_v29 = vsel %vm726_vm15, %v2668_v31, %v2670_v3  ;;  %v2674_v49 = vsel %vm726_vm15, %v2670_v3, %v2664_v36 }
 0xc58   :  { %v2695_v33 = vadd.f32 %v2691_v20, %v2660_v18  ;;  %v2696_v8 = vadd.f32 %v2692_v63, %v2661_v40  ;;  %v2675_v21 = vmul.f32 %v4347_v12, %v2674_v49  ;;  %v2678_v9 = vmul.f32 %v4352_v52, %v2671_v29 }
 0xc5a   :  { %v2690_v32 = vmul.f32 %v2689_v19, %v2675_v21  ;;  %v2693_v45 = vmul.f32 %v2689_v19, %v2678_v9  ;;  %v2720_v16 = vpop.permute.xlu0 %2719  ;;  %v2714_v30 = vadd.f32 %v5080_v10, %v2695_v33  ;;  %v2722_v28 = vpop.permute.xlu1 %2721  ;;  %v2715_v5 = vadd.f32 %v5082_v43, %v2696_v8 }
 0xc5b   :  { %v2727_v27 = vsel %vm789_vm9, %v2718_v61, %v2720_v16  ;;  %v2726_v52 = vsel %vm789_vm9, %v2720_v16, %v2722_v28  ;;  %v2743_v10 = vrot.slane %v5113_v17, %v3894_v23 }
 0xc5c   :  { %v2694_v36 = vadd.f32 %v2690_v32, %v2659_v37  ;;  %v2697_v47 = vadd.f32 %v2693_v45, %v2662_v44  ;;  %v2729_v31 = vmul.f32 %v4357_v54, %v2727_v27 }
 0xc5e   :  { %v2713_v12 = vadd.f32 %v5078_v2, %v2694_v36  ;;  %v2724_v56 = vpop.permute.xlu0 %2723  ;;  %v2716_v19 = vadd.f32 %v5084_v58, %v2697_v47  ;;  %v2755_v11 = vpop.permute.xlu1 %2754  ;;  %v2744_v60 = vmul.f32 %v2743_v10, %v2729_v31  ;;  %v2730_v2 = vmul.f32 %v4362_v59, %v2726_v52 }
 0xc5f   :  { %v2725_v43 = vsel %vm789_vm9, %v2722_v28, %v2724_v56  ;;  %v2728_v22 = vsel %vm789_vm9, %v2724_v56, %v2718_v61  ;;  %v2848_v52 = vrot.slane %v5119_v35, %v3894_v23  ;;  %v5578_v35 = vld [vmem:[#allocation80_spill] sm:$0xff] }
 0xc60   :  { %v2732_v54 = vmul.f32 %v4372_v55, %v2728_v22  ;;  %v2731_v53 = vmul.f32 %v4367_v0, %v2725_v43  ;;  %v2748_v42 = vadd.f32 %v2744_v60, %v2713_v12  ;;  %v2745_v59 = vmul.f32 %v2743_v10, %v2730_v2 }
 0xc62   :  { %v2747_v15 = vmul.f32 %v2743_v10, %v2732_v54  ;;  %v2753_v48 = vpop.permute.xlu0 %2752  ;;  %v2759_v58 = vpop.permute.xlu1 %2758  ;;  %v2746_v7 = vmul.f32 %v2743_v10, %v2731_v53  ;;  %v2749_v51 = vadd.f32 %v2745_v59, %v2714_v30  ;;  %v2813_v30 = vrot.slane %v5117_v34, %v3894_v23 }
 0xc63   :  { %v2762_v25 = vsel %vm837_vm3, %v2753_v48, %v2755_v11  ;;  %v2763_v17 = vsel %vm837_vm3, %v2759_v58, %v2753_v48 }
 0xc64   :  { %v2764_v39 = vmul.f32 %v5500_v41, %v2762_v25  ;;  %v2767_v55 = vmul.f32 %v5497_v62, %v2763_v17  ;;  %v2751_v0 = vadd.f32 %v2747_v15, %v2716_v19  ;;  %v2750_v29 = vadd.f32 %v2746_v7, %v2715_v5  ;;  %v5577_v19 = vld [vmem:[#allocation79_spill] sm:$0xff] }
 0xc65   :  { %v3473_v17 = vmov 1966171168  }
 0xc66   :  { %v2779_v18 = vmul.f32 %v2778_v26, %v2764_v39  ;;  %v2782_v40 = vmul.f32 %v2778_v26, %v2767_v55  ;;  %v2757_v20 = vpop.permute.xlu0 %2756  ;;  %v2788_v63 = vpop.permute.xlu1 %2787 }
 0xc67   :  { %v2760_v3 = vsel %vm837_vm3, %v2757_v20, %v2759_v58  ;;  %v2761_v61 = vsel %vm837_vm3, %v2755_v11, %v2757_v20 }
 0xc68   :  { %v2783_v14 = vadd.f32 %v2779_v18, %v2748_v42  ;;  %v2786_v46 = vadd.f32 %v2782_v40, %v2751_v0  ;;  %v2765_v41 = vmul.f32 %v4394_v24, %v2761_v61  ;;  %v2766_v62 = vmul.f32 %v4399_v13, %v2760_v3 }
 0xc6a   :  { %v2780_v49 = vmul.f32 %v2778_v26, %v2765_v41  ;;  %v2781_v33 = vmul.f32 %v2778_v26, %v2766_v62  ;;  %v2790_v8 = vpop.permute.xlu0 %2789  ;;  %v2792_v21 = vpop.permute.xlu1 %2791  ;;  %v2878_v26 = vunpack.c.l.s4 %v3473_v17 }
 0xc6b   :  { %v2797_v9 = vsel %vm885_vm11, %v2788_v63, %v2790_v8  ;;  %v2796_v37 = vsel %vm885_vm11, %v2790_v8, %v2792_v21 }
 0xc6c   :  { %v2784_v44 = vadd.f32 %v2780_v49, %v2749_v51  ;;  %v2785_v32 = vadd.f32 %v2781_v33, %v2750_v29  ;;  %v2799_v45 = vmul.f32 %v5498_v4, %v2797_v9  ;;  %v2800_v24 = vmul.f32 %v5499_v1, %v2796_v37 }
 0xc6d   :  { %v2879_v18 = vunpack.c.0.s8 %v2878_v26 }
 0xc6e   :  { %v2794_v16 = vpop.permute.xlu0 %2793  ;;  %v2823_v13 = vpop.permute.xlu1 %2822  ;;  %v2814_v27 = vmul.f32 %v2813_v30, %v2799_v45  ;;  %v2815_v36 = vmul.f32 %v2813_v30, %v2800_v24 }
 0xc6f   :  { %v2795_v28 = vsel %vm885_vm11, %v2792_v21, %v2794_v16  ;;  %v2798_v5 = vsel %vm885_vm11, %v2794_v16, %v2788_v63  ;;  %v2882_v63 = vsub.s32 %v2879_v18, %v5580_v38 }
 0xc70   :  { %v2801_v47 = vmul.f32 %v5501_v57, %v2795_v28  ;;  %v2802_v31 = vmul.f32 %v5502_v50, %v2798_v5  ;;  %v2818_v10 = vadd.f32 %v2814_v27, %v2783_v14  ;;  %v2819_v43 = vadd.f32 %v2815_v36, %v2784_v44 }
 0xc72   :  { %v2825_v4 = vpop.permute.xlu0 %2824  ;;  %v2827_v12 = vpop.permute.xlu1 %2826  ;;  %v2816_v57 = vmul.f32 %v2813_v30, %v2801_v47  ;;  %v2817_v22 = vmul.f32 %v2813_v30, %v2802_v31 }
 0xc73   :  { %v2832_v1 = vsel %vm933_vm2, %v2823_v13, %v2825_v4  ;;  %v2831_v34 = vsel %vm933_vm2, %v2825_v4, %v2827_v12 }
 0xc74   :  { %v2834_v56 = vmul.f32 %v5503_v6, %v2832_v1  ;;  %v2835_v11 = vmul.f32 %v5577_v19, %v2831_v34  ;;  %v5579_v6 = vld [vmem:[#allocation81_spill] sm:$0xff]  ;;  %v2820_v39 = vadd.f32 %v2816_v57, %v2785_v32  ;;  %v2821_v55 = vadd.f32 %v2817_v22, %v2786_v46 }
 0xc75   :  { %v5581_v46 = vlaneseq }
 0xc76   :  { %v2849_v50 = vmul.f32 %v2848_v52, %v2834_v56  ;;  %v2850_v54 = vmul.f32 %v2848_v52, %v2835_v11  ;;  %v2829_v60 = vpop.permute.xlu0 %2828 }
 0xc77   :  { %v2830_v2 = vsel %vm933_vm2, %v2827_v12, %v2829_v60  ;;  %v2833_v53 = vsel %vm933_vm2, %v2829_v60, %v2823_v13  ;;  %vm2902_vm6 = vcmp.lt.s32.totalorder %v5581_v46, 512 }
 0xc78   :  { %v2853_v15 = vadd.f32 %v2849_v50, %v2818_v10  ;;  %v2854_v48 = vadd.f32 %v2850_v54, %v2819_v43  ;;  %v2836_v58 = vmul.f32 %v5578_v35, %v2830_v2  ;;  %v2837_v25 = vmul.f32 %v5579_v6, %v2833_v53 }
 0xc7a   :  { %v2851_v42 = vmul.f32 %v2848_v52, %v2836_v58  ;;  %v2852_v59 = vmul.f32 %v2848_v52, %v2837_v25 }
 0xc7c   :  { %v2855_v7 = vadd.f32 %v2851_v42, %v2820_v39  ;;  %v2856_v0 = vadd.f32 %v2852_v59, %v2821_v55 }
 0xc7f   :  { %v2861_v40 = vpop.permute.xlu1 %2860 }
 0xc80   :  { %v2866_v20 = vrot.slane %v2861_v40, %v3894_v23 }
 0xc82   :  { %v2867_v3 = vadd.f32 %v2866_v20, %v2853_v15  ;;  %v2868_v61 = vadd.f32 %v2866_v20, %v2854_v48  ;;  %v2869_v14 = vadd.f32 %v2866_v20, %v2855_v7  ;;  %v2870_v41 = vadd.f32 %v2866_v20, %v2856_v0 }
 0xc84   :  { %v2875_v62 = vcombine.low %v2867_v3, %v2868_v61  ;;  %v2876_v51 = vcombine.low %v2869_v14, %v2870_v41 }
 0xc86   :  { %v2883_v29 = vrot.slane %v2875_v62, %v2882_v63  ;;  %v2890_v49 = vrot.slane %v2876_v51, %v2882_v63 }
 0xc88   :  { %v2891_v33 = vcombine.low %v2883_v29, %v2890_v49 }
 0xc8a   :  { %v2898_v8 = vrot.slane %v2891_v33, %v2882_v63 }
 0xc8c   :  { %2904 = vst.msk [vmem:[%s5259_s19] sm:$0xf] %vm2902_vm6, %v2898_v8 }
 0xc8d   :  { %2909 = vsyncmov [#allocation6] }
 0xc90   :  { %s2910_s2 = vpop.sfrf %2909 }
 0xc91   :  { %p3122_p0 = scmp.ne.s32.totalorder %s2910_s2, 0 }
 0xc93   :  { %2914 = shalt.err (%p3122_p0)  }
 0xc94   :  { %2916 = vsyncmov [#allocation6 + $0x1] }
 0xc97   :  { %s2917_s24 = vpop.sfrf %2916 }
 0xc98   :  { %p3123_p1 = scmp.ne.s32.totalorder %s2917_s24, 0 }
 0xc9a   :  { %2921 = shalt.err (%p3123_p1)  }
 0xc9b   :  { %2923 = vsyncmov [#allocation6 + $0x2] }
 0xc9e   :  { %s2924_s26 = vpop.sfrf %2923 }
 0xc9f   :  { %p3124_p2 = scmp.ne.s32.totalorder %s2924_s26, 0 }
 0xca1   :  { %2928 = shalt.err (%p3124_p2)  }
 0xca2   :  { %2930 = vsyncmov [#allocation6 + $0x3] }
 0xca5   :  { %s2931_s29 = vpop.sfrf %2930 }
 0xca6   :  { %p3125_p3 = scmp.ne.s32.totalorder %s2931_s29, 0 }
 0xca8   :  { %2935 = shalt.err (%p3125_p3)  }

</bundles_post_ra>
